<compile_context>
chip_gen: v6e
topology: v6e:2x2x1
jax: 0.10.0
libtpu: 0.0.40
codegen_flags: <defaults>
</compile_context>

<pallas_src>
import functools
import math

import jax
import jax.numpy as jnp
import numpy as np
from jax import lax
from jax.experimental import pallas as pl
from jax.experimental.pallas import tpu as pltpu


def _round_up(x, m):
    return ((x + m - 1) // m) * m


def _layer_norm(z, gamma, beta, eps=1e-5):
    mu = jnp.mean(z, axis=-1, keepdims=True)
    var = jnp.mean((z - mu) * (z - mu), axis=-1, keepdims=True)
    return (z - mu) * lax.rsqrt(var + eps) * gamma + beta


# -----------------------------------------------------------------------------
# Static slab layout (shared by init and kernel): name -> (row, nrows, ncols).
# One bf16 weight slab + one f32 vector slab, both (rows, width) with width a
# multiple of 128 and every matrix starting at column 0 (clean, aligned loads).
# -----------------------------------------------------------------------------
def _layout(D, F, H, n_enc, n_dec, C):
    HD = H * D
    enc_pc = HD + 2 * D          # encoder packed projection: [WVO | WQ | WK]
    dec_kc = HD + D              # decoder hoisted K/V:       [WVO | WK]
    width = _round_up(max(enc_pc, dec_kc, F, D, C, 128), 128)

    wl, vl = {}, {}
    wr = 0
    vr = 0

    def add_w(name, rows, cols):
        nonlocal wr
        wl[name] = (wr, rows, cols)
        wr += rows

    def add_v(name, cols):
        nonlocal vr
        vl[name] = (vr, 1, cols)
        vr += 1

    for l in range(n_enc):
        add_w(f'enc_qkvo_{l}', D, enc_pc)
        add_w(f'enc_w1_{l}', D, F)
        add_w(f'enc_w2_{l}', F, D)
        add_v(f'enc_pb_{l}', enc_pc)
        for nm, c in (('bo', D), ('g1', D), ('be1', D), ('b1', F),
                      ('b2', D), ('g2', D), ('be2', D)):
            add_v(f'enc_{nm}_{l}', c)
    for l in range(n_dec):
        add_w(f'dec_q_{l}', D, D)
        add_w(f'dec_kvo_{l}', D, dec_kc)
        add_w(f'dec_w1_{l}', D, F)
        add_w(f'dec_w2_{l}', F, D)
        add_v(f'dec_qb_{l}', D)
        add_v(f'dec_kvob_{l}', dec_kc)
        for nm, c in (('bo', D), ('g1', D), ('be1', D), ('b1', F),
                      ('b2', D), ('g2', D), ('be2', D)):
            add_v(f'dec_{nm}_{l}', c)
    add_w('head_w', D, C)
    add_v('head_b', C)
    return width, wl, _round_up(wr, 8), vl, _round_up(vr, 8)


# -----------------------------------------------------------------------------
# Fused kernel: single program, no grid; x + both slabs resident in VMEM.
# -----------------------------------------------------------------------------
def _fused_transformer_kernel(x_ref, w_ref, v_ref, out_ref, *,
                              B, S, D, F, H, n_enc, n_dec, C, wl, vl):
    f32 = jnp.float32
    bf16 = jnp.bfloat16
    BS = B * S
    hd = D // H
    HD = H * D

    def W(name):                      # bf16 (rows, cols) weight view
        r, n, c = wl[name]
        return w_ref[r:r + n, 0:c]

    def V(name):                      # f32 (1, cols) bias / LN vector view
        r, n, c = vl[name]
        return v_ref[r:r + n, 0:c]

    def attention(q, k3, vt3):
        # q  : (BS, D)    f32   (1/sqrt(hd) already folded into WQ/bq at init)
        # k3 : (B, S, D)  bf16
        # vt3: (B, S, HD) bf16  where vt_h = x @ (WV_h @ WO_h) + bv_h @ WO_h
        # The V/WO fold makes head-merge + output projection implicit:
        #   out = sum_h P_h @ vt_h   (no concat, no separate WO matmul).
        q3 = q.astype(bf16).reshape(B, S, D)
        acc = None
        for h in range(H):
            qh = q3[:, :, h * hd:(h + 1) * hd]
            kh = k3[:, :, h * hd:(h + 1) * hd]
            s = lax.dot_general(qh, kh, (((2,), (2,)), ((0,), (0,))),
                                preferred_element_type=f32)            # (B,S,S)
            s = s - jnp.max(s, axis=-1, keepdims=True)
            p = jnp.exp(s)
            p = p * pl.reciprocal(jnp.sum(p, axis=-1, keepdims=True), approx=True)
            vth = vt3[:, :, h * D:(h + 1) * D]
            o = lax.dot_general(p.astype(bf16), vth,
                                (((2,), (1,)), ((0,), (0,))),
                                preferred_element_type=f32)            # (B,S,D)
            acc = o if acc is None else acc + o
        return acc.reshape(BS, D)

    def ffn(prefix, l, y):
        h1 = jnp.dot(y.astype(bf16), W(f'{prefix}_w1_{l}'),
                     preferred_element_type=f32) + V(f'{prefix}_b1_{l}')
        h1 = jnp.maximum(h1, 0.0)
        return jnp.dot(h1.astype(bf16), W(f'{prefix}_w2_{l}'),
                       preferred_element_type=f32) + V(f'{prefix}_b2_{l}')

    xf = x_ref[...].reshape(BS, D)                                      # f32

    # ---------------- encoder stack (self-attention) ----------------
    for l in range(n_enc):
        xb = xf.astype(bf16)
        proj = jnp.dot(xb, W(f'enc_qkvo_{l}'),
                       preferred_element_type=f32) + V(f'enc_pb_{l}')   # (BS, HD+2D)
        vt3 = proj[:, 0:HD].astype(bf16).reshape(B, S, HD)
        q = proj[:, HD:HD + D]
        k3 = proj[:, HD + D:HD + 2 * D].astype(bf16).reshape(B, S, D)
        attn = attention(q, k3, vt3) + V(f'enc_bo_{l}')
        y = _layer_norm(xf + attn, V(f'enc_g1_{l}'), V(f'enc_be1_{l}'))
        xf = _layer_norm(y + ffn('enc', l, y),
                         V(f'enc_g2_{l}'), V(f'enc_be2_{l}'))

    # -------- decoder stack: K/V hoisted (source = encoder output) --------
    x_enc_b = xf.astype(bf16)
    dec_k3, dec_vt3 = [], []
    for l in range(n_dec):
        kvo = jnp.dot(x_enc_b, W(f'dec_kvo_{l}'),
                      preferred_element_type=f32) + V(f'dec_kvob_{l}')  # (BS, HD+D)
        dec_vt3.append(kvo[:, 0:HD].astype(bf16).reshape(B, S, HD))
        dec_k3.append(kvo[:, HD:HD + D].astype(bf16).reshape(B, S, D))

    for l in range(n_dec):
        xb = xf.astype(bf16)
        q = jnp.dot(xb, W(f'dec_q_{l}'),
                    preferred_element_type=f32) + V(f'dec_qb_{l}')
        attn = attention(q, dec_k3[l], dec_vt3[l]) + V(f'dec_bo_{l}')
        y = _layer_norm(xf + attn, V(f'dec_g1_{l}'), V(f'dec_be1_{l}'))
        xf = _layer_norm(y + ffn('dec', l, y),
                         V(f'dec_g2_{l}'), V(f'dec_be2_{l}'))

    # ------------- linear head + LogSoftmax over dim 0 (legacy rule) -------------
    logits = jnp.dot(xf.astype(bf16), W('head_w'),
                     preferred_element_type=f32) + V('head_b')          # (BS, C)
    logits3 = logits.reshape(B, S, C)
    m = jnp.max(logits3, axis=0)                                        # (S, C)
    ssum = jnp.sum(jnp.exp(logits3 - m[None]), axis=0)                  # (S, C)
    out_ref[...] = logits3 - (m + jnp.log(ssum))[None]


# -----------------------------------------------------------------------------
# Wrapper: 3 operands (x, bf16 weight slab, f32 vector slab), one pallas_call.
# -----------------------------------------------------------------------------
def transformer_forward(params, x):
    cfg = params['config']
    D, F, H, ns, C = cfg['D'], cfg['F'], cfg['H'], cfg['n_stacks'], cfg['C']
    B, S, Dx = x.shape
    assert Dx == D
    width, wl, _, vl, _ = _layout(D, F, H, ns, ns, C)

    # Whole model + activations stay resident in VMEM (no grid, no pipelining).
    foot = (params['w'].size * 2 + params['v'].size * 4
            + x.size * 4 + B * S * C * 4)
    try:
        vmem_cap = pltpu.get_tpu_info().vmem_capacity_bytes
    except Exception:  # pragma: no cover - conservative fallback
        vmem_cap = 16 * 1024 * 1024
    # TODO(synk): fall back to a layer-/K-tiled grid (pltpu.emit_pipeline) once
    # the footprint approaches ~half of scoped VMEM (v7x has only 64 MiB).
    assert foot < vmem_cap // 2, "model too large for the fused grid-less kernel"

    kernel = functools.partial(
        _fused_transformer_kernel, B=B, S=S, D=D, F=F, H=H,
        n_enc=ns, n_dec=ns, C=C, wl=wl, vl=vl)
    vmem = pl.BlockSpec(memory_space=pltpu.MemorySpace.VMEM)
    return pl.pallas_call(
        kernel,
        out_shape=jax.ShapeDtypeStruct((B, S, C), jnp.float32),
        in_specs=[vmem, vmem, vmem],
        out_specs=vmem,
    )(x, params['w'], params['v'])


# -----------------------------------------------------------------------------
# Deterministic parameter construction, packed into the two slabs.
#   * 1/sqrt(hd) is folded into WQ and bq.
#   * Per head, WV_h @ WO_h (and bv_h @ WO_h) are pre-multiplied ("V/WO fold").
#   * Raw f32 weights are kept under 'ref' for the pure-JAX reference check.
# -----------------------------------------------------------------------------
def init_transformer_params(key, model_dim, feed_forward_hidden_dim,
                            number_attention_heads, number_stacks,
                            number_classes=None):
    D, F, H = model_dim, feed_forward_hidden_dim, number_attention_heads
    assert D % H == 0
    hd = D // H
    HD = H * D
    C = D if number_classes is None else number_classes
    n_enc = n_dec = number_stacks
    scale = 1.0 / math.sqrt(hd)
    std = 0.02

    width, wl, WR, vl, VR = _layout(D, F, H, n_enc, n_dec, C)
    w_slab = np.zeros((WR, width), np.float32)
    v_slab = np.zeros((VR, width), np.float32)

    def put_w(name, mat):
        r, n, c = wl[name]
        w_slab[r:r + n, :c] = mat

    def put_v(name, vec):
        r, _, c = vl[name]
        v_slab[r, :c] = vec

    L = n_enc + n_dec
    keys = jax.random.split(key, 6 * L + 1)

    def nrm(k, shape):
        return np.asarray(jax.random.normal(k, shape, dtype=jnp.float32)) * std

    ref = {'enc': [], 'dec': []}
    for l in range(L):
        kq, kk, kv_, ko, k1, k2 = keys[6 * l:6 * l + 6]
        p = dict(wq=nrm(kq, (D, D)), wk=nrm(kk, (D, D)), wv=nrm(kv_, (D, D)),
                 wo=nrm(ko, (D, D)), w1=nrm(k1, (D, F)), w2=nrm(k2, (F, D)),
                 bq=np.zeros(D, np.float32), bk=np.zeros(D, np.float32),
                 bv=np.zeros(D, np.float32), bo=np.zeros(D, np.float32),
                 b1=np.zeros(F, np.float32), b2=np.zeros(D, np.float32),
                 g1=np.ones(D, np.float32), be1=np.zeros(D, np.float32),
                 g2=np.ones(D, np.float32), be2=np.zeros(D, np.float32))
        # V/WO fold (exact):  vt_h = x @ (WV_h @ WO_h) + bv_h @ WO_h
        wvo = np.zeros((D, HD), np.float32)
        bvo = np.zeros((HD,), np.float32)
        for h in range(H):
            wo_h = p['wo'][h * hd:(h + 1) * hd, :]
            wvo[:, h * D:(h + 1) * D] = p['wv'][:, h * hd:(h + 1) * hd] @ wo_h
            bvo[h * D:(h + 1) * D] = p['bv'][h * hd:(h + 1) * hd] @ wo_h
        wq_s = p['wq'] * scale          # fold 1/sqrt(hd) into WQ *and* bq
        bq_s = p['bq'] * scale
        if l < n_enc:
            pre, li = 'enc', l
            put_w(f'enc_qkvo_{li}', np.concatenate([wvo, wq_s, p['wk']], axis=1))
            put_v(f'enc_pb_{li}', np.concatenate([bvo, bq_s, p['bk']]))
        else:
            pre, li = 'dec', l - n_enc
            put_w(f'dec_q_{li}', wq_s)
            put_v(f'dec_qb_{li}', bq_s)
            put_w(f'dec_kvo_{li}', np.concatenate([wvo, p['wk']], axis=1))
            put_v(f'dec_kvob_{li}', np.concatenate([bvo, p['bk']]))
        put_w(f'{pre}_w1_{li}', p['w1'])
        put_w(f'{pre}_w2_{li}', p['w2'])
        for nm in ('bo', 'g1', 'be1', 'b1', 'b2', 'g2', 'be2'):
            put_v(f'{pre}_{nm}_{li}', p[nm])
        ref[pre].append(p)

    head_w = nrm(keys[-1], (D, C))
    head_b = np.zeros(C, np.float32)
    put_w('head_w', head_w)
    put_v('head_b', head_b)
    ref['head_w'] = head_w
    ref['head_b'] = head_b

    return {
        'w': jnp.asarray(w_slab, jnp.bfloat16),
        'v': jnp.asarray(v_slab, jnp.float32),
        'ref': ref,
        'config': dict(D=D, F=F, H=H, n_stacks=number_stacks, C=C),
    }


# -----------------------------------------------------------------------------
# Pure-JAX f32 reference (module semantics, unfused) for a tolerance check.
# -----------------------------------------------------------------------------
def _reference_forward(ref, x, H, n_stacks):
    D = x.shape[-1]
    hd = D // H
    scale = 1.0 / math.sqrt(hd)

    def ln(z, g, b):
        mu = jnp.mean(z, axis=-1, keepdims=True)
        var = jnp.mean((z - mu) ** 2, axis=-1, keepdims=True)
        return (z - mu) * lax.rsqrt(var + 1e-5) * g + b

    def layer(p, xq, xkv):
        q = xq @ p['wq'] + p['bq']
        k = xkv @ p['wk'] + p['bk']
        v = xkv @ p['wv'] + p['bv']
        outs = []
        for h in range(H):
            sl = slice(h * hd, (h + 1) * hd)
            s = jnp.einsum('bid,bjd->bij', q[..., sl], k[..., sl]) * scale
            a = jax.nn.softmax(s, axis=-1)
            outs.append(jnp.einsum('bij,bjd->bid', a, v[..., sl]))
        attn = jnp.concatenate(outs, axis=-1) @ p['wo'] + p['bo']
        y = ln(xq + attn, p['g1'], p['be1'])
        m = jax.nn.relu(y @ p['w1'] + p['b1']) @ p['w2'] + p['b2']
        return ln(y + m, p['g2'], p['be2'])

    xr = x
    for l in range(n_stacks):
        xr = layer(ref['enc'][l], xr, xr)
    x_dec = xr
    for l in range(n_stacks):
        xr = layer(ref['dec'][l], xr, x_dec)
    logits = xr @ ref['head_w'] + ref['head_b']
    return jax.nn.log_softmax(logits, axis=0)   # legacy dim inference -> dim 0


if __name__ == "__main__":
    MODEL_DIM = 32
    FF_HIDDEN = 64
    NUM_HEADS = 4
    NUM_STACKS = 2
    BATCH = 2
    SEQ = 8

    key = jax.random.PRNGKey(0)
    pkey, xkey = jax.random.split(key)
    params = init_transformer_params(pkey, MODEL_DIM, FF_HIDDEN, NUM_HEADS,
                                     NUM_STACKS, number_classes=None)
    x = jax.random.normal(xkey, (BATCH, SEQ, MODEL_DIM), dtype=jnp.float32)

    out = transformer_forward(params, x)
    jax.block_until_ready(out)

    assert out.shape == (BATCH, SEQ, MODEL_DIM)
    assert bool(jnp.all(jnp.isfinite(out)))
    # log_softmax over dim 0 => exp(out) sums to 1 along the batch axis
    assert bool(jnp.allclose(jnp.sum(jnp.exp(out), axis=0), 1.0, atol=1e-4))
    # f32 reference; tolerance covers bf16 weights + approx softmax reciprocal
    ref_out = _reference_forward(params['ref'], x, NUM_HEADS, NUM_STACKS)
    assert bool(jnp.max(jnp.abs(out - ref_out)) < 5e-2)
    print("KERNEL_OK")
</pallas_src>

<mosaic_0001>
module attributes {stable_mosaic.version = 11 : i64} {
  func.func @_fused_transformer_kernel(%arg0: memref<2x8x32xf32, #tpu.memory_space<vmem>>, %arg1: memref<608x256xbf16, #tpu.memory_space<vmem>>, %arg2: memref<40x256xf32, #tpu.memory_space<vmem>>, %arg3: memref<2x8x32xf32, #tpu.memory_space<vmem>>) attributes {dimension_semantics = [], scalar_prefetch = 0 : i64, scratch_operands = 0 : i64, tpu.core_type = #tpu.core_type<tc>} {
    %c0 = arith.constant 0 : index
    %c0_0 = arith.constant 0 : index
    %c0_1 = arith.constant 0 : index
    %0 = vector.load %arg0[%c0, %c0_0, %c0_1] : memref<2x8x32xf32, #tpu.memory_space<vmem>>, vector<2x8x32xf32>
    %1 = vector.shape_cast %0 : vector<2x8x32xf32> to vector<16x32xf32>
    %2 = arith.truncf %1 : vector<16x32xf32> to vector<16x32xbf16>
    %c0_2 = arith.constant 0 : index
    %c0_3 = arith.constant 0 : index
    %3 = vector.load %arg1[%c0_2, %c0_3] : memref<608x256xbf16, #tpu.memory_space<vmem>>, vector<32x192xbf16>
    %cst = arith.constant dense<0.000000e+00> : vector<16x192xf32>
    %4 = tpu.matmul %2, %3, %cst {dimension_numbers = #tpu.dot_dimension_numbers<[1], [0], [0], [1], [0, 0, 1, 1], [], []>} : vector<16x32xbf16>, vector<32x192xbf16>, vector<16x192xf32> -> vector<16x192xf32>
    %c0_4 = arith.constant 0 : index
    %c0_5 = arith.constant 0 : index
    %5 = vector.load %arg2[%c0_4, %c0_5] : memref<40x256xf32, #tpu.memory_space<vmem>>, vector<1x192xf32>
    %6 = vector.broadcast %5 : vector<1x192xf32> to vector<16x192xf32>
    %7 = arith.addf %4, %6 : vector<16x192xf32>
    %8 = vector.extract_strided_slice %7 {offsets = [0, 0], sizes = [16, 128], strides = [1, 1]} : vector<16x192xf32> to vector<16x128xf32>
    %9 = arith.truncf %8 : vector<16x128xf32> to vector<16x128xbf16>
    %10 = vector.shape_cast %9 : vector<16x128xbf16> to vector<2x8x128xbf16>
    %11 = vector.extract_strided_slice %7 {offsets = [0, 128], sizes = [16, 32], strides = [1, 1]} : vector<16x192xf32> to vector<16x32xf32>
    %12 = vector.extract_strided_slice %7 {offsets = [0, 160], sizes = [16, 32], strides = [1, 1]} : vector<16x192xf32> to vector<16x32xf32>
    %13 = arith.truncf %12 : vector<16x32xf32> to vector<16x32xbf16>
    %14 = vector.shape_cast %13 : vector<16x32xbf16> to vector<2x8x32xbf16>
    %15 = arith.truncf %11 : vector<16x32xf32> to vector<16x32xbf16>
    %16 = vector.shape_cast %15 : vector<16x32xbf16> to vector<2x8x32xbf16>
    %17 = vector.extract_strided_slice %16 {offsets = [0, 0, 0], sizes = [2, 8, 8], strides = [1, 1, 1]} : vector<2x8x32xbf16> to vector<2x8x8xbf16>
    %18 = vector.extract_strided_slice %14 {offsets = [0, 0, 0], sizes = [2, 8, 8], strides = [1, 1, 1]} : vector<2x8x32xbf16> to vector<2x8x8xbf16>
    %cst_6 = arith.constant dense<0.000000e+00> : vector<2x8x8xf32>
    %19 = tpu.matmul %17, %18, %cst_6 {dimension_numbers = #tpu.dot_dimension_numbers<[2], [2], [1], [1], [0, 0, 0, 1, 1, 1], [0], [0]>} : vector<2x8x8xbf16>, vector<2x8x8xbf16>, vector<2x8x8xf32> -> vector<2x8x8xf32>
    %cst_7 = arith.constant dense<0xFF800000> : vector<2x8xf32>
    %20 = vector.multi_reduction <maximumf>, %19, %cst_7 [2] : vector<2x8x8xf32> to vector<2x8xf32>
    %21 = vector.shape_cast %20 : vector<2x8xf32> to vector<2x8x1xf32>
    %22 = vector.broadcast %21 : vector<2x8x1xf32> to vector<2x8x8xf32>
    %23 = arith.subf %19, %22 : vector<2x8x8xf32>
    %24 = math.exp %23 : vector<2x8x8xf32>
    %cst_8 = arith.constant dense<0.000000e+00> : vector<2x8xf32>
    %25 = vector.multi_reduction <add>, %24, %cst_8 [2] : vector<2x8x8xf32> to vector<2x8xf32>
    %26 = vector.shape_cast %25 : vector<2x8xf32> to vector<2x8x1xf32>
    %27 = tpu.reciprocal %26 {approx = true} : vector<2x8x1xf32> -> vector<2x8x1xf32>
    %28 = vector.broadcast %27 : vector<2x8x1xf32> to vector<2x8x8xf32>
    %29 = arith.mulf %24, %28 : vector<2x8x8xf32>
    %30 = vector.extract_strided_slice %10 {offsets = [0, 0, 0], sizes = [2, 8, 32], strides = [1, 1, 1]} : vector<2x8x128xbf16> to vector<2x8x32xbf16>
    %31 = arith.truncf %29 : vector<2x8x8xf32> to vector<2x8x8xbf16>
    %cst_9 = arith.constant dense<0.000000e+00> : vector<2x8x32xf32>
    %32 = tpu.matmul %31, %30, %cst_9 {dimension_numbers = #tpu.dot_dimension_numbers<[2], [1], [1], [2], [0, 0, 0, 1, 1, 2], [0], [0]>} : vector<2x8x8xbf16>, vector<2x8x32xbf16>, vector<2x8x32xf32> -> vector<2x8x32xf32>
    %33 = vector.extract_strided_slice %16 {offsets = [0, 0, 8], sizes = [2, 8, 8], strides = [1, 1, 1]} : vector<2x8x32xbf16> to vector<2x8x8xbf16>
    %34 = vector.extract_strided_slice %14 {offsets = [0, 0, 8], sizes = [2, 8, 8], strides = [1, 1, 1]} : vector<2x8x32xbf16> to vector<2x8x8xbf16>
    %cst_10 = arith.constant dense<0.000000e+00> : vector<2x8x8xf32>
    %35 = tpu.matmul %33, %34, %cst_10 {dimension_numbers = #tpu.dot_dimension_numbers<[2], [2], [1], [1], [0, 0, 0, 1, 1, 1], [0], [0]>} : vector<2x8x8xbf16>, vector<2x8x8xbf16>, vector<2x8x8xf32> -> vector<2x8x8xf32>
    %cst_11 = arith.constant dense<0xFF800000> : vector<2x8xf32>
    %36 = vector.multi_reduction <maximumf>, %35, %cst_11 [2] : vector<2x8x8xf32> to vector<2x8xf32>
    %37 = vector.shape_cast %36 : vector<2x8xf32> to vector<2x8x1xf32>
    %38 = vector.broadcast %37 : vector<2x8x1xf32> to vector<2x8x8xf32>
    %39 = arith.subf %35, %38 : vector<2x8x8xf32>
    %40 = math.exp %39 : vector<2x8x8xf32>
    %cst_12 = arith.constant dense<0.000000e+00> : vector<2x8xf32>
    %41 = vector.multi_reduction <add>, %40, %cst_12 [2] : vector<2x8x8xf32> to vector<2x8xf32>
    %42 = vector.shape_cast %41 : vector<2x8xf32> to vector<2x8x1xf32>
    %43 = tpu.reciprocal %42 {approx = true} : vector<2x8x1xf32> -> vector<2x8x1xf32>
    %44 = vector.broadcast %43 : vector<2x8x1xf32> to vector<2x8x8xf32>
    %45 = arith.mulf %40, %44 : vector<2x8x8xf32>
    %46 = vector.extract_strided_slice %10 {offsets = [0, 0, 32], sizes = [2, 8, 32], strides = [1, 1, 1]} : vector<2x8x128xbf16> to vector<2x8x32xbf16>
    %47 = arith.truncf %45 : vector<2x8x8xf32> to vector<2x8x8xbf16>
    %cst_13 = arith.constant dense<0.000000e+00> : vector<2x8x32xf32>
    %48 = tpu.matmul %47, %46, %cst_13 {dimension_numbers = #tpu.dot_dimension_numbers<[2], [1], [1], [2], [0, 0, 0, 1, 1, 2], [0], [0]>} : vector<2x8x8xbf16>, vector<2x8x32xbf16>, vector<2x8x32xf32> -> vector<2x8x32xf32>
    %49 = arith.addf %32, %48 : vector<2x8x32xf32>
    %50 = vector.extract_strided_slice %16 {offsets = [0, 0, 16], sizes = [2, 8, 8], strides = [1, 1, 1]} : vector<2x8x32xbf16> to vector<2x8x8xbf16>
    %51 = vector.extract_strided_slice %14 {offsets = [0, 0, 16], sizes = [2, 8, 8], strides = [1, 1, 1]} : vector<2x8x32xbf16> to vector<2x8x8xbf16>
    %cst_14 = arith.constant dense<0.000000e+00> : vector<2x8x8xf32>
    %52 = tpu.matmul %50, %51, %cst_14 {dimension_numbers = #tpu.dot_dimension_numbers<[2], [2], [1], [1], [0, 0, 0, 1, 1, 1], [0], [0]>} : vector<2x8x8xbf16>, vector<2x8x8xbf16>, vector<2x8x8xf32> -> vector<2x8x8xf32>
    %cst_15 = arith.constant dense<0xFF800000> : vector<2x8xf32>
    %53 = vector.multi_reduction <maximumf>, %52, %cst_15 [2] : vector<2x8x8xf32> to vector<2x8xf32>
    %54 = vector.shape_cast %53 : vector<2x8xf32> to vector<2x8x1xf32>
    %55 = vector.broadcast %54 : vector<2x8x1xf32> to vector<2x8x8xf32>
    %56 = arith.subf %52, %55 : vector<2x8x8xf32>
    %57 = math.exp %56 : vector<2x8x8xf32>
    %cst_16 = arith.constant dense<0.000000e+00> : vector<2x8xf32>
    %58 = vector.multi_reduction <add>, %57, %cst_16 [2] : vector<2x8x8xf32> to vector<2x8xf32>
    %59 = vector.shape_cast %58 : vector<2x8xf32> to vector<2x8x1xf32>
    %60 = tpu.reciprocal %59 {approx = true} : vector<2x8x1xf32> -> vector<2x8x1xf32>
    %61 = vector.broadcast %60 : vector<2x8x1xf32> to vector<2x8x8xf32>
    %62 = arith.mulf %57, %61 : vector<2x8x8xf32>
    %63 = vector.extract_strided_slice %10 {offsets = [0, 0, 64], sizes = [2, 8, 32], strides = [1, 1, 1]} : vector<2x8x128xbf16> to vector<2x8x32xbf16>
    %64 = arith.truncf %62 : vector<2x8x8xf32> to vector<2x8x8xbf16>
    %cst_17 = arith.constant dense<0.000000e+00> : vector<2x8x32xf32>
    %65 = tpu.matmul %64, %63, %cst_17 {dimension_numbers = #tpu.dot_dimension_numbers<[2], [1], [1], [2], [0, 0, 0, 1, 1, 2], [0], [0]>} : vector<2x8x8xbf16>, vector<2x8x32xbf16>, vector<2x8x32xf32> -> vector<2x8x32xf32>
    %66 = arith.addf %49, %65 : vector<2x8x32xf32>
    %67 = vector.extract_strided_slice %16 {offsets = [0, 0, 24], sizes = [2, 8, 8], strides = [1, 1, 1]} : vector<2x8x32xbf16> to vector<2x8x8xbf16>
    %68 = vector.extract_strided_slice %14 {offsets = [0, 0, 24], sizes = [2, 8, 8], strides = [1, 1, 1]} : vector<2x8x32xbf16> to vector<2x8x8xbf16>
    %cst_18 = arith.constant dense<0.000000e+00> : vector<2x8x8xf32>
    %69 = tpu.matmul %67, %68, %cst_18 {dimension_numbers = #tpu.dot_dimension_numbers<[2], [2], [1], [1], [0, 0, 0, 1, 1, 1], [0], [0]>} : vector<2x8x8xbf16>, vector<2x8x8xbf16>, vector<2x8x8xf32> -> vector<2x8x8xf32>
    %cst_19 = arith.constant dense<0xFF800000> : vector<2x8xf32>
    %70 = vector.multi_reduction <maximumf>, %69, %cst_19 [2] : vector<2x8x8xf32> to vector<2x8xf32>
    %71 = vector.shape_cast %70 : vector<2x8xf32> to vector<2x8x1xf32>
    %72 = vector.broadcast %71 : vector<2x8x1xf32> to vector<2x8x8xf32>
    %73 = arith.subf %69, %72 : vector<2x8x8xf32>
    %74 = math.exp %73 : vector<2x8x8xf32>
    %cst_20 = arith.constant dense<0.000000e+00> : vector<2x8xf32>
    %75 = vector.multi_reduction <add>, %74, %cst_20 [2] : vector<2x8x8xf32> to vector<2x8xf32>
    %76 = vector.shape_cast %75 : vector<2x8xf32> to vector<2x8x1xf32>
    %77 = tpu.reciprocal %76 {approx = true} : vector<2x8x1xf32> -> vector<2x8x1xf32>
    %78 = vector.broadcast %77 : vector<2x8x1xf32> to vector<2x8x8xf32>
    %79 = arith.mulf %74, %78 : vector<2x8x8xf32>
    %80 = vector.extract_strided_slice %10 {offsets = [0, 0, 96], sizes = [2, 8, 32], strides = [1, 1, 1]} : vector<2x8x128xbf16> to vector<2x8x32xbf16>
    %81 = arith.truncf %79 : vector<2x8x8xf32> to vector<2x8x8xbf16>
    %cst_21 = arith.constant dense<0.000000e+00> : vector<2x8x32xf32>
    %82 = tpu.matmul %81, %80, %cst_21 {dimension_numbers = #tpu.dot_dimension_numbers<[2], [1], [1], [2], [0, 0, 0, 1, 1, 2], [0], [0]>} : vector<2x8x8xbf16>, vector<2x8x32xbf16>, vector<2x8x32xf32> -> vector<2x8x32xf32>
    %83 = arith.addf %66, %82 : vector<2x8x32xf32>
    %84 = vector.shape_cast %83 : vector<2x8x32xf32> to vector<16x32xf32>
    %c1 = arith.constant 1 : index
    %c0_22 = arith.constant 0 : index
    %85 = vector.load %arg2[%c1, %c0_22] : memref<40x256xf32, #tpu.memory_space<vmem>>, vector<1x32xf32>
    %86 = vector.broadcast %85 : vector<1x32xf32> to vector<16x32xf32>
    %87 = arith.addf %84, %86 : vector<16x32xf32>
    %88 = arith.addf %1, %87 : vector<16x32xf32>
    %c2 = arith.constant 2 : index
    %c0_23 = arith.constant 0 : index
    %89 = vector.load %arg2[%c2, %c0_23] : memref<40x256xf32, #tpu.memory_space<vmem>>, vector<1x32xf32>
    %c3 = arith.constant 3 : index
    %c0_24 = arith.constant 0 : index
    %90 = vector.load %arg2[%c3, %c0_24] : memref<40x256xf32, #tpu.memory_space<vmem>>, vector<1x32xf32>
    %cst_25 = arith.constant dense<0.000000e+00> : vector<16xf32>
    %91 = vector.multi_reduction <add>, %88, %cst_25 [1] : vector<16x32xf32> to vector<16xf32>
    %92 = vector.shape_cast %91 : vector<16xf32> to vector<16x1xf32>
    %cst_26 = arith.constant 3.200000e+01 : f32
    %93 = vector.broadcast %cst_26 : f32 to vector<16x1xf32>
    %94 = arith.divf %92, %93 : vector<16x1xf32>
    %95 = vector.broadcast %94 : vector<16x1xf32> to vector<16x32xf32>
    %96 = arith.subf %88, %95 : vector<16x32xf32>
    %97 = vector.broadcast %94 : vector<16x1xf32> to vector<16x32xf32>
    %98 = arith.subf %88, %97 : vector<16x32xf32>
    %99 = arith.mulf %96, %98 : vector<16x32xf32>
    %cst_27 = arith.constant dense<0.000000e+00> : vector<16xf32>
    %100 = vector.multi_reduction <add>, %99, %cst_27 [1] : vector<16x32xf32> to vector<16xf32>
    %101 = vector.shape_cast %100 : vector<16xf32> to vector<16x1xf32>
    %cst_28 = arith.constant 3.200000e+01 : f32
    %102 = vector.broadcast %cst_28 : f32 to vector<16x1xf32>
    %103 = arith.divf %101, %102 : vector<16x1xf32>
    %104 = vector.broadcast %94 : vector<16x1xf32> to vector<16x32xf32>
    %105 = arith.subf %88, %104 : vector<16x32xf32>
    %cst_29 = arith.constant 9.99999974E-6 : f32
    %106 = vector.broadcast %cst_29 : f32 to vector<16x1xf32>
    %107 = arith.addf %103, %106 : vector<16x1xf32>
    %108 = math.rsqrt %107 : vector<16x1xf32>
    %109 = vector.broadcast %108 : vector<16x1xf32> to vector<16x32xf32>
    %110 = arith.mulf %105, %109 : vector<16x32xf32>
    %111 = vector.broadcast %89 : vector<1x32xf32> to vector<16x32xf32>
    %112 = arith.mulf %110, %111 : vector<16x32xf32>
    %113 = vector.broadcast %90 : vector<1x32xf32> to vector<16x32xf32>
    %114 = arith.addf %112, %113 : vector<16x32xf32>
    %115 = arith.truncf %114 : vector<16x32xf32> to vector<16x32xbf16>
    %c32 = arith.constant 32 : index
    %c0_30 = arith.constant 0 : index
    %116 = vector.load %arg1[%c32, %c0_30] : memref<608x256xbf16, #tpu.memory_space<vmem>>, vector<32x64xbf16>
    %cst_31 = arith.constant dense<0.000000e+00> : vector<16x64xf32>
    %117 = tpu.matmul %115, %116, %cst_31 {dimension_numbers = #tpu.dot_dimension_numbers<[1], [0], [0], [1], [0, 0, 1, 1], [], []>} : vector<16x32xbf16>, vector<32x64xbf16>, vector<16x64xf32> -> vector<16x64xf32>
    %c4 = arith.constant 4 : index
    %c0_32 = arith.constant 0 : index
    %118 = vector.load %arg2[%c4, %c0_32] : memref<40x256xf32, #tpu.memory_space<vmem>>, vector<1x64xf32>
    %119 = vector.broadcast %118 : vector<1x64xf32> to vector<16x64xf32>
    %120 = arith.addf %117, %119 : vector<16x64xf32>
    %cst_33 = arith.constant 0.000000e+00 : f32
    %121 = vector.broadcast %cst_33 : f32 to vector<16x64xf32>
    %122 = arith.maximumf %120, %121 : vector<16x64xf32>
    %123 = arith.truncf %122 : vector<16x64xf32> to vector<16x64xbf16>
    %c64 = arith.constant 64 : index
    %c0_34 = arith.constant 0 : index
    %124 = vector.load %arg1[%c64, %c0_34] : memref<608x256xbf16, #tpu.memory_space<vmem>>, vector<64x32xbf16>
    %cst_35 = arith.constant dense<0.000000e+00> : vector<16x32xf32>
    %125 = tpu.matmul %123, %124, %cst_35 {dimension_numbers = #tpu.dot_dimension_numbers<[1], [0], [0], [1], [0, 0, 1, 1], [], []>} : vector<16x64xbf16>, vector<64x32xbf16>, vector<16x32xf32> -> vector<16x32xf32>
    %c5 = arith.constant 5 : index
    %c0_36 = arith.constant 0 : index
    %126 = vector.load %arg2[%c5, %c0_36] : memref<40x256xf32, #tpu.memory_space<vmem>>, vector<1x32xf32>
    %127 = vector.broadcast %126 : vector<1x32xf32> to vector<16x32xf32>
    %128 = arith.addf %125, %127 : vector<16x32xf32>
    %129 = arith.addf %114, %128 : vector<16x32xf32>
    %c6 = arith.constant 6 : index
    %c0_37 = arith.constant 0 : index
    %130 = vector.load %arg2[%c6, %c0_37] : memref<40x256xf32, #tpu.memory_space<vmem>>, vector<1x32xf32>
    %c7 = arith.constant 7 : index
    %c0_38 = arith.constant 0 : index
    %131 = vector.load %arg2[%c7, %c0_38] : memref<40x256xf32, #tpu.memory_space<vmem>>, vector<1x32xf32>
    %cst_39 = arith.constant dense<0.000000e+00> : vector<16xf32>
    %132 = vector.multi_reduction <add>, %129, %cst_39 [1] : vector<16x32xf32> to vector<16xf32>
    %133 = vector.shape_cast %132 : vector<16xf32> to vector<16x1xf32>
    %cst_40 = arith.constant 3.200000e+01 : f32
    %134 = vector.broadcast %cst_40 : f32 to vector<16x1xf32>
    %135 = arith.divf %133, %134 : vector<16x1xf32>
    %136 = vector.broadcast %135 : vector<16x1xf32> to vector<16x32xf32>
    %137 = arith.subf %129, %136 : vector<16x32xf32>
    %138 = vector.broadcast %135 : vector<16x1xf32> to vector<16x32xf32>
    %139 = arith.subf %129, %138 : vector<16x32xf32>
    %140 = arith.mulf %137, %139 : vector<16x32xf32>
    %cst_41 = arith.constant dense<0.000000e+00> : vector<16xf32>
    %141 = vector.multi_reduction <add>, %140, %cst_41 [1] : vector<16x32xf32> to vector<16xf32>
    %142 = vector.shape_cast %141 : vector<16xf32> to vector<16x1xf32>
    %cst_42 = arith.constant 3.200000e+01 : f32
    %143 = vector.broadcast %cst_42 : f32 to vector<16x1xf32>
    %144 = arith.divf %142, %143 : vector<16x1xf32>
    %145 = vector.broadcast %135 : vector<16x1xf32> to vector<16x32xf32>
    %146 = arith.subf %129, %145 : vector<16x32xf32>
    %cst_43 = arith.constant 9.99999974E-6 : f32
    %147 = vector.broadcast %cst_43 : f32 to vector<16x1xf32>
    %148 = arith.addf %144, %147 : vector<16x1xf32>
    %149 = math.rsqrt %148 : vector<16x1xf32>
    %150 = vector.broadcast %149 : vector<16x1xf32> to vector<16x32xf32>
    %151 = arith.mulf %146, %150 : vector<16x32xf32>
    %152 = vector.broadcast %130 : vector<1x32xf32> to vector<16x32xf32>
    %153 = arith.mulf %151, %152 : vector<16x32xf32>
    %154 = vector.broadcast %131 : vector<1x32xf32> to vector<16x32xf32>
    %155 = arith.addf %153, %154 : vector<16x32xf32>
    %156 = arith.truncf %155 : vector<16x32xf32> to vector<16x32xbf16>
    %c128 = arith.constant 128 : index
    %c0_44 = arith.constant 0 : index
    %157 = vector.load %arg1[%c128, %c0_44] : memref<608x256xbf16, #tpu.memory_space<vmem>>, vector<32x192xbf16>
    %cst_45 = arith.constant dense<0.000000e+00> : vector<16x192xf32>
    %158 = tpu.matmul %156, %157, %cst_45 {dimension_numbers = #tpu.dot_dimension_numbers<[1], [0], [0], [1], [0, 0, 1, 1], [], []>} : vector<16x32xbf16>, vector<32x192xbf16>, vector<16x192xf32> -> vector<16x192xf32>
    %c8 = arith.constant 8 : index
    %c0_46 = arith.constant 0 : index
    %159 = vector.load %arg2[%c8, %c0_46] : memref<40x256xf32, #tpu.memory_space<vmem>>, vector<1x192xf32>
    %160 = vector.broadcast %159 : vector<1x192xf32> to vector<16x192xf32>
    %161 = arith.addf %158, %160 : vector<16x192xf32>
    %162 = vector.extract_strided_slice %161 {offsets = [0, 0], sizes = [16, 128], strides = [1, 1]} : vector<16x192xf32> to vector<16x128xf32>
    %163 = arith.truncf %162 : vector<16x128xf32> to vector<16x128xbf16>
    %164 = vector.shape_cast %163 : vector<16x128xbf16> to vector<2x8x128xbf16>
    %165 = vector.extract_strided_slice %161 {offsets = [0, 128], sizes = [16, 32], strides = [1, 1]} : vector<16x192xf32> to vector<16x32xf32>
    %166 = vector.extract_strided_slice %161 {offsets = [0, 160], sizes = [16, 32], strides = [1, 1]} : vector<16x192xf32> to vector<16x32xf32>
    %167 = arith.truncf %166 : vector<16x32xf32> to vector<16x32xbf16>
    %168 = vector.shape_cast %167 : vector<16x32xbf16> to vector<2x8x32xbf16>
    %169 = arith.truncf %165 : vector<16x32xf32> to vector<16x32xbf16>
    %170 = vector.shape_cast %169 : vector<16x32xbf16> to vector<2x8x32xbf16>
    %171 = vector.extract_strided_slice %170 {offsets = [0, 0, 0], sizes = [2, 8, 8], strides = [1, 1, 1]} : vector<2x8x32xbf16> to vector<2x8x8xbf16>
    %172 = vector.extract_strided_slice %168 {offsets = [0, 0, 0], sizes = [2, 8, 8], strides = [1, 1, 1]} : vector<2x8x32xbf16> to vector<2x8x8xbf16>
    %cst_47 = arith.constant dense<0.000000e+00> : vector<2x8x8xf32>
    %173 = tpu.matmul %171, %172, %cst_47 {dimension_numbers = #tpu.dot_dimension_numbers<[2], [2], [1], [1], [0, 0, 0, 1, 1, 1], [0], [0]>} : vector<2x8x8xbf16>, vector<2x8x8xbf16>, vector<2x8x8xf32> -> vector<2x8x8xf32>
    %cst_48 = arith.constant dense<0xFF800000> : vector<2x8xf32>
    %174 = vector.multi_reduction <maximumf>, %173, %cst_48 [2] : vector<2x8x8xf32> to vector<2x8xf32>
    %175 = vector.shape_cast %174 : vector<2x8xf32> to vector<2x8x1xf32>
    %176 = vector.broadcast %175 : vector<2x8x1xf32> to vector<2x8x8xf32>
    %177 = arith.subf %173, %176 : vector<2x8x8xf32>
    %178 = math.exp %177 : vector<2x8x8xf32>
    %cst_49 = arith.constant dense<0.000000e+00> : vector<2x8xf32>
    %179 = vector.multi_reduction <add>, %178, %cst_49 [2] : vector<2x8x8xf32> to vector<2x8xf32>
    %180 = vector.shape_cast %179 : vector<2x8xf32> to vector<2x8x1xf32>
    %181 = tpu.reciprocal %180 {approx = true} : vector<2x8x1xf32> -> vector<2x8x1xf32>
    %182 = vector.broadcast %181 : vector<2x8x1xf32> to vector<2x8x8xf32>
    %183 = arith.mulf %178, %182 : vector<2x8x8xf32>
    %184 = vector.extract_strided_slice %164 {offsets = [0, 0, 0], sizes = [2, 8, 32], strides = [1, 1, 1]} : vector<2x8x128xbf16> to vector<2x8x32xbf16>
    %185 = arith.truncf %183 : vector<2x8x8xf32> to vector<2x8x8xbf16>
    %cst_50 = arith.constant dense<0.000000e+00> : vector<2x8x32xf32>
    %186 = tpu.matmul %185, %184, %cst_50 {dimension_numbers = #tpu.dot_dimension_numbers<[2], [1], [1], [2], [0, 0, 0, 1, 1, 2], [0], [0]>} : vector<2x8x8xbf16>, vector<2x8x32xbf16>, vector<2x8x32xf32> -> vector<2x8x32xf32>
    %187 = vector.extract_strided_slice %170 {offsets = [0, 0, 8], sizes = [2, 8, 8], strides = [1, 1, 1]} : vector<2x8x32xbf16> to vector<2x8x8xbf16>
    %188 = vector.extract_strided_slice %168 {offsets = [0, 0, 8], sizes = [2, 8, 8], strides = [1, 1, 1]} : vector<2x8x32xbf16> to vector<2x8x8xbf16>
    %cst_51 = arith.constant dense<0.000000e+00> : vector<2x8x8xf32>
    %189 = tpu.matmul %187, %188, %cst_51 {dimension_numbers = #tpu.dot_dimension_numbers<[2], [2], [1], [1], [0, 0, 0, 1, 1, 1], [0], [0]>} : vector<2x8x8xbf16>, vector<2x8x8xbf16>, vector<2x8x8xf32> -> vector<2x8x8xf32>
    %cst_52 = arith.constant dense<0xFF800000> : vector<2x8xf32>
    %190 = vector.multi_reduction <maximumf>, %189, %cst_52 [2] : vector<2x8x8xf32> to vector<2x8xf32>
    %191 = vector.shape_cast %190 : vector<2x8xf32> to vector<2x8x1xf32>
    %192 = vector.broadcast %191 : vector<2x8x1xf32> to vector<2x8x8xf32>
    %193 = arith.subf %189, %192 : vector<2x8x8xf32>
    %194 = math.exp %193 : vector<2x8x8xf32>
    %cst_53 = arith.constant dense<0.000000e+00> : vector<2x8xf32>
    %195 = vector.multi_reduction <add>, %194, %cst_53 [2] : vector<2x8x8xf32> to vector<2x8xf32>
    %196 = vector.shape_cast %195 : vector<2x8xf32> to vector<2x8x1xf32>
    %197 = tpu.reciprocal %196 {approx = true} : vector<2x8x1xf32> -> vector<2x8x1xf32>
    %198 = vector.broadcast %197 : vector<2x8x1xf32> to vector<2x8x8xf32>
    %199 = arith.mulf %194, %198 : vector<2x8x8xf32>
    %200 = vector.extract_strided_slice %164 {offsets = [0, 0, 32], sizes = [2, 8, 32], strides = [1, 1, 1]} : vector<2x8x128xbf16> to vector<2x8x32xbf16>
    %201 = arith.truncf %199 : vector<2x8x8xf32> to vector<2x8x8xbf16>
    %cst_54 = arith.constant dense<0.000000e+00> : vector<2x8x32xf32>
    %202 = tpu.matmul %201, %200, %cst_54 {dimension_numbers = #tpu.dot_dimension_numbers<[2], [1], [1], [2], [0, 0, 0, 1, 1, 2], [0], [0]>} : vector<2x8x8xbf16>, vector<2x8x32xbf16>, vector<2x8x32xf32> -> vector<2x8x32xf32>
    %203 = arith.addf %186, %202 : vector<2x8x32xf32>
    %204 = vector.extract_strided_slice %170 {offsets = [0, 0, 16], sizes = [2, 8, 8], strides = [1, 1, 1]} : vector<2x8x32xbf16> to vector<2x8x8xbf16>
    %205 = vector.extract_strided_slice %168 {offsets = [0, 0, 16], sizes = [2, 8, 8], strides = [1, 1, 1]} : vector<2x8x32xbf16> to vector<2x8x8xbf16>
    %cst_55 = arith.constant dense<0.000000e+00> : vector<2x8x8xf32>
    %206 = tpu.matmul %204, %205, %cst_55 {dimension_numbers = #tpu.dot_dimension_numbers<[2], [2], [1], [1], [0, 0, 0, 1, 1, 1], [0], [0]>} : vector<2x8x8xbf16>, vector<2x8x8xbf16>, vector<2x8x8xf32> -> vector<2x8x8xf32>
    %cst_56 = arith.constant dense<0xFF800000> : vector<2x8xf32>
    %207 = vector.multi_reduction <maximumf>, %206, %cst_56 [2] : vector<2x8x8xf32> to vector<2x8xf32>
    %208 = vector.shape_cast %207 : vector<2x8xf32> to vector<2x8x1xf32>
    %209 = vector.broadcast %208 : vector<2x8x1xf32> to vector<2x8x8xf32>
    %210 = arith.subf %206, %209 : vector<2x8x8xf32>
    %211 = math.exp %210 : vector<2x8x8xf32>
    %cst_57 = arith.constant dense<0.000000e+00> : vector<2x8xf32>
    %212 = vector.multi_reduction <add>, %211, %cst_57 [2] : vector<2x8x8xf32> to vector<2x8xf32>
    %213 = vector.shape_cast %212 : vector<2x8xf32> to vector<2x8x1xf32>
    %214 = tpu.reciprocal %213 {approx = true} : vector<2x8x1xf32> -> vector<2x8x1xf32>
    %215 = vector.broadcast %214 : vector<2x8x1xf32> to vector<2x8x8xf32>
    %216 = arith.mulf %211, %215 : vector<2x8x8xf32>
    %217 = vector.extract_strided_slice %164 {offsets = [0, 0, 64], sizes = [2, 8, 32], strides = [1, 1, 1]} : vector<2x8x128xbf16> to vector<2x8x32xbf16>
    %218 = arith.truncf %216 : vector<2x8x8xf32> to vector<2x8x8xbf16>
    %cst_58 = arith.constant dense<0.000000e+00> : vector<2x8x32xf32>
    %219 = tpu.matmul %218, %217, %cst_58 {dimension_numbers = #tpu.dot_dimension_numbers<[2], [1], [1], [2], [0, 0, 0, 1, 1, 2], [0], [0]>} : vector<2x8x8xbf16>, vector<2x8x32xbf16>, vector<2x8x32xf32> -> vector<2x8x32xf32>
    %220 = arith.addf %203, %219 : vector<2x8x32xf32>
    %221 = vector.extract_strided_slice %170 {offsets = [0, 0, 24], sizes = [2, 8, 8], strides = [1, 1, 1]} : vector<2x8x32xbf16> to vector<2x8x8xbf16>
    %222 = vector.extract_strided_slice %168 {offsets = [0, 0, 24], sizes = [2, 8, 8], strides = [1, 1, 1]} : vector<2x8x32xbf16> to vector<2x8x8xbf16>
    %cst_59 = arith.constant dense<0.000000e+00> : vector<2x8x8xf32>
    %223 = tpu.matmul %221, %222, %cst_59 {dimension_numbers = #tpu.dot_dimension_numbers<[2], [2], [1], [1], [0, 0, 0, 1, 1, 1], [0], [0]>} : vector<2x8x8xbf16>, vector<2x8x8xbf16>, vector<2x8x8xf32> -> vector<2x8x8xf32>
    %cst_60 = arith.constant dense<0xFF800000> : vector<2x8xf32>
    %224 = vector.multi_reduction <maximumf>, %223, %cst_60 [2] : vector<2x8x8xf32> to vector<2x8xf32>
    %225 = vector.shape_cast %224 : vector<2x8xf32> to vector<2x8x1xf32>
    %226 = vector.broadcast %225 : vector<2x8x1xf32> to vector<2x8x8xf32>
    %227 = arith.subf %223, %226 : vector<2x8x8xf32>
    %228 = math.exp %227 : vector<2x8x8xf32>
    %cst_61 = arith.constant dense<0.000000e+00> : vector<2x8xf32>
    %229 = vector.multi_reduction <add>, %228, %cst_61 [2] : vector<2x8x8xf32> to vector<2x8xf32>
    %230 = vector.shape_cast %229 : vector<2x8xf32> to vector<2x8x1xf32>
    %231 = tpu.reciprocal %230 {approx = true} : vector<2x8x1xf32> -> vector<2x8x1xf32>
    %232 = vector.broadcast %231 : vector<2x8x1xf32> to vector<2x8x8xf32>
    %233 = arith.mulf %228, %232 : vector<2x8x8xf32>
    %234 = vector.extract_strided_slice %164 {offsets = [0, 0, 96], sizes = [2, 8, 32], strides = [1, 1, 1]} : vector<2x8x128xbf16> to vector<2x8x32xbf16>
    %235 = arith.truncf %233 : vector<2x8x8xf32> to vector<2x8x8xbf16>
    %cst_62 = arith.constant dense<0.000000e+00> : vector<2x8x32xf32>
    %236 = tpu.matmul %235, %234, %cst_62 {dimension_numbers = #tpu.dot_dimension_numbers<[2], [1], [1], [2], [0, 0, 0, 1, 1, 2], [0], [0]>} : vector<2x8x8xbf16>, vector<2x8x32xbf16>, vector<2x8x32xf32> -> vector<2x8x32xf32>
    %237 = arith.addf %220, %236 : vector<2x8x32xf32>
    %238 = vector.shape_cast %237 : vector<2x8x32xf32> to vector<16x32xf32>
    %c9 = arith.constant 9 : index
    %c0_63 = arith.constant 0 : index
    %239 = vector.load %arg2[%c9, %c0_63] : memref<40x256xf32, #tpu.memory_space<vmem>>, vector<1x32xf32>
    %240 = vector.broadcast %239 : vector<1x32xf32> to vector<16x32xf32>
    %241 = arith.addf %238, %240 : vector<16x32xf32>
    %242 = arith.addf %155, %241 : vector<16x32xf32>
    %c10 = arith.constant 10 : index
    %c0_64 = arith.constant 0 : index
    %243 = vector.load %arg2[%c10, %c0_64] : memref<40x256xf32, #tpu.memory_space<vmem>>, vector<1x32xf32>
    %c11 = arith.constant 11 : index
    %c0_65 = arith.constant 0 : index
    %244 = vector.load %arg2[%c11, %c0_65] : memref<40x256xf32, #tpu.memory_space<vmem>>, vector<1x32xf32>
    %cst_66 = arith.constant dense<0.000000e+00> : vector<16xf32>
    %245 = vector.multi_reduction <add>, %242, %cst_66 [1] : vector<16x32xf32> to vector<16xf32>
    %246 = vector.shape_cast %245 : vector<16xf32> to vector<16x1xf32>
    %cst_67 = arith.constant 3.200000e+01 : f32
    %247 = vector.broadcast %cst_67 : f32 to vector<16x1xf32>
    %248 = arith.divf %246, %247 : vector<16x1xf32>
    %249 = vector.broadcast %248 : vector<16x1xf32> to vector<16x32xf32>
    %250 = arith.subf %242, %249 : vector<16x32xf32>
    %251 = vector.broadcast %248 : vector<16x1xf32> to vector<16x32xf32>
    %252 = arith.subf %242, %251 : vector<16x32xf32>
    %253 = arith.mulf %250, %252 : vector<16x32xf32>
    %cst_68 = arith.constant dense<0.000000e+00> : vector<16xf32>
    %254 = vector.multi_reduction <add>, %253, %cst_68 [1] : vector<16x32xf32> to vector<16xf32>
    %255 = vector.shape_cast %254 : vector<16xf32> to vector<16x1xf32>
    %cst_69 = arith.constant 3.200000e+01 : f32
    %256 = vector.broadcast %cst_69 : f32 to vector<16x1xf32>
    %257 = arith.divf %255, %256 : vector<16x1xf32>
    %258 = vector.broadcast %248 : vector<16x1xf32> to vector<16x32xf32>
    %259 = arith.subf %242, %258 : vector<16x32xf32>
    %cst_70 = arith.constant 9.99999974E-6 : f32
    %260 = vector.broadcast %cst_70 : f32 to vector<16x1xf32>
    %261 = arith.addf %257, %260 : vector<16x1xf32>
    %262 = math.rsqrt %261 : vector<16x1xf32>
    %263 = vector.broadcast %262 : vector<16x1xf32> to vector<16x32xf32>
    %264 = arith.mulf %259, %263 : vector<16x32xf32>
    %265 = vector.broadcast %243 : vector<1x32xf32> to vector<16x32xf32>
    %266 = arith.mulf %264, %265 : vector<16x32xf32>
    %267 = vector.broadcast %244 : vector<1x32xf32> to vector<16x32xf32>
    %268 = arith.addf %266, %267 : vector<16x32xf32>
    %269 = arith.truncf %268 : vector<16x32xf32> to vector<16x32xbf16>
    %c160 = arith.constant 160 : index
    %c0_71 = arith.constant 0 : index
    %270 = vector.load %arg1[%c160, %c0_71] : memref<608x256xbf16, #tpu.memory_space<vmem>>, vector<32x64xbf16>
    %cst_72 = arith.constant dense<0.000000e+00> : vector<16x64xf32>
    %271 = tpu.matmul %269, %270, %cst_72 {dimension_numbers = #tpu.dot_dimension_numbers<[1], [0], [0], [1], [0, 0, 1, 1], [], []>} : vector<16x32xbf16>, vector<32x64xbf16>, vector<16x64xf32> -> vector<16x64xf32>
    %c12 = arith.constant 12 : index
    %c0_73 = arith.constant 0 : index
    %272 = vector.load %arg2[%c12, %c0_73] : memref<40x256xf32, #tpu.memory_space<vmem>>, vector<1x64xf32>
    %273 = vector.broadcast %272 : vector<1x64xf32> to vector<16x64xf32>
    %274 = arith.addf %271, %273 : vector<16x64xf32>
    %cst_74 = arith.constant 0.000000e+00 : f32
    %275 = vector.broadcast %cst_74 : f32 to vector<16x64xf32>
    %276 = arith.maximumf %274, %275 : vector<16x64xf32>
    %277 = arith.truncf %276 : vector<16x64xf32> to vector<16x64xbf16>
    %c192 = arith.constant 192 : index
    %c0_75 = arith.constant 0 : index
    %278 = vector.load %arg1[%c192, %c0_75] : memref<608x256xbf16, #tpu.memory_space<vmem>>, vector<64x32xbf16>
    %cst_76 = arith.constant dense<0.000000e+00> : vector<16x32xf32>
    %279 = tpu.matmul %277, %278, %cst_76 {dimension_numbers = #tpu.dot_dimension_numbers<[1], [0], [0], [1], [0, 0, 1, 1], [], []>} : vector<16x64xbf16>, vector<64x32xbf16>, vector<16x32xf32> -> vector<16x32xf32>
    %c13 = arith.constant 13 : index
    %c0_77 = arith.constant 0 : index
    %280 = vector.load %arg2[%c13, %c0_77] : memref<40x256xf32, #tpu.memory_space<vmem>>, vector<1x32xf32>
    %281 = vector.broadcast %280 : vector<1x32xf32> to vector<16x32xf32>
    %282 = arith.addf %279, %281 : vector<16x32xf32>
    %283 = arith.addf %268, %282 : vector<16x32xf32>
    %c14 = arith.constant 14 : index
    %c0_78 = arith.constant 0 : index
    %284 = vector.load %arg2[%c14, %c0_78] : memref<40x256xf32, #tpu.memory_space<vmem>>, vector<1x32xf32>
    %c15 = arith.constant 15 : index
    %c0_79 = arith.constant 0 : index
    %285 = vector.load %arg2[%c15, %c0_79] : memref<40x256xf32, #tpu.memory_space<vmem>>, vector<1x32xf32>
    %cst_80 = arith.constant dense<0.000000e+00> : vector<16xf32>
    %286 = vector.multi_reduction <add>, %283, %cst_80 [1] : vector<16x32xf32> to vector<16xf32>
    %287 = vector.shape_cast %286 : vector<16xf32> to vector<16x1xf32>
    %cst_81 = arith.constant 3.200000e+01 : f32
    %288 = vector.broadcast %cst_81 : f32 to vector<16x1xf32>
    %289 = arith.divf %287, %288 : vector<16x1xf32>
    %290 = vector.broadcast %289 : vector<16x1xf32> to vector<16x32xf32>
    %291 = arith.subf %283, %290 : vector<16x32xf32>
    %292 = vector.broadcast %289 : vector<16x1xf32> to vector<16x32xf32>
    %293 = arith.subf %283, %292 : vector<16x32xf32>
    %294 = arith.mulf %291, %293 : vector<16x32xf32>
    %cst_82 = arith.constant dense<0.000000e+00> : vector<16xf32>
    %295 = vector.multi_reduction <add>, %294, %cst_82 [1] : vector<16x32xf32> to vector<16xf32>
    %296 = vector.shape_cast %295 : vector<16xf32> to vector<16x1xf32>
    %cst_83 = arith.constant 3.200000e+01 : f32
    %297 = vector.broadcast %cst_83 : f32 to vector<16x1xf32>
    %298 = arith.divf %296, %297 : vector<16x1xf32>
    %299 = vector.broadcast %289 : vector<16x1xf32> to vector<16x32xf32>
    %300 = arith.subf %283, %299 : vector<16x32xf32>
    %cst_84 = arith.constant 9.99999974E-6 : f32
    %301 = vector.broadcast %cst_84 : f32 to vector<16x1xf32>
    %302 = arith.addf %298, %301 : vector<16x1xf32>
    %303 = math.rsqrt %302 : vector<16x1xf32>
    %304 = vector.broadcast %303 : vector<16x1xf32> to vector<16x32xf32>
    %305 = arith.mulf %300, %304 : vector<16x32xf32>
    %306 = vector.broadcast %284 : vector<1x32xf32> to vector<16x32xf32>
    %307 = arith.mulf %305, %306 : vector<16x32xf32>
    %308 = vector.broadcast %285 : vector<1x32xf32> to vector<16x32xf32>
    %309 = arith.addf %307, %308 : vector<16x32xf32>
    %310 = arith.truncf %309 : vector<16x32xf32> to vector<16x32xbf16>
    %c288 = arith.constant 288 : index
    %c0_85 = arith.constant 0 : index
    %311 = vector.load %arg1[%c288, %c0_85] : memref<608x256xbf16, #tpu.memory_space<vmem>>, vector<32x160xbf16>
    %cst_86 = arith.constant dense<0.000000e+00> : vector<16x160xf32>
    %312 = tpu.matmul %310, %311, %cst_86 {dimension_numbers = #tpu.dot_dimension_numbers<[1], [0], [0], [1], [0, 0, 1, 1], [], []>} : vector<16x32xbf16>, vector<32x160xbf16>, vector<16x160xf32> -> vector<16x160xf32>
    %c17 = arith.constant 17 : index
    %c0_87 = arith.constant 0 : index
    %313 = vector.load %arg2[%c17, %c0_87] : memref<40x256xf32, #tpu.memory_space<vmem>>, vector<1x160xf32>
    %314 = vector.broadcast %313 : vector<1x160xf32> to vector<16x160xf32>
    %315 = arith.addf %312, %314 : vector<16x160xf32>
    %316 = vector.extract_strided_slice %315 {offsets = [0, 0], sizes = [16, 128], strides = [1, 1]} : vector<16x160xf32> to vector<16x128xf32>
    %317 = arith.truncf %316 : vector<16x128xf32> to vector<16x128xbf16>
    %318 = vector.shape_cast %317 : vector<16x128xbf16> to vector<2x8x128xbf16>
    %319 = vector.extract_strided_slice %315 {offsets = [0, 128], sizes = [16, 32], strides = [1, 1]} : vector<16x160xf32> to vector<16x32xf32>
    %320 = arith.truncf %319 : vector<16x32xf32> to vector<16x32xbf16>
    %321 = vector.shape_cast %320 : vector<16x32xbf16> to vector<2x8x32xbf16>
    %c448 = arith.constant 448 : index
    %c0_88 = arith.constant 0 : index
    %322 = vector.load %arg1[%c448, %c0_88] : memref<608x256xbf16, #tpu.memory_space<vmem>>, vector<32x160xbf16>
    %cst_89 = arith.constant dense<0.000000e+00> : vector<16x160xf32>
    %323 = tpu.matmul %310, %322, %cst_89 {dimension_numbers = #tpu.dot_dimension_numbers<[1], [0], [0], [1], [0, 0, 1, 1], [], []>} : vector<16x32xbf16>, vector<32x160xbf16>, vector<16x160xf32> -> vector<16x160xf32>
    %c26 = arith.constant 26 : index
    %c0_90 = arith.constant 0 : index
    %324 = vector.load %arg2[%c26, %c0_90] : memref<40x256xf32, #tpu.memory_space<vmem>>, vector<1x160xf32>
    %325 = vector.broadcast %324 : vector<1x160xf32> to vector<16x160xf32>
    %326 = arith.addf %323, %325 : vector<16x160xf32>
    %327 = vector.extract_strided_slice %326 {offsets = [0, 0], sizes = [16, 128], strides = [1, 1]} : vector<16x160xf32> to vector<16x128xf32>
    %328 = arith.truncf %327 : vector<16x128xf32> to vector<16x128xbf16>
    %329 = vector.shape_cast %328 : vector<16x128xbf16> to vector<2x8x128xbf16>
    %330 = vector.extract_strided_slice %326 {offsets = [0, 128], sizes = [16, 32], strides = [1, 1]} : vector<16x160xf32> to vector<16x32xf32>
    %331 = arith.truncf %330 : vector<16x32xf32> to vector<16x32xbf16>
    %332 = vector.shape_cast %331 : vector<16x32xbf16> to vector<2x8x32xbf16>
    %333 = arith.truncf %309 : vector<16x32xf32> to vector<16x32xbf16>
    %c256 = arith.constant 256 : index
    %c0_91 = arith.constant 0 : index
    %334 = vector.load %arg1[%c256, %c0_91] : memref<608x256xbf16, #tpu.memory_space<vmem>>, vector<32x32xbf16>
    %cst_92 = arith.constant dense<0.000000e+00> : vector<16x32xf32>
    %335 = tpu.matmul %333, %334, %cst_92 {dimension_numbers = #tpu.dot_dimension_numbers<[1], [0], [0], [1], [0, 0, 1, 1], [], []>} : vector<16x32xbf16>, vector<32x32xbf16>, vector<16x32xf32> -> vector<16x32xf32>
    %c16 = arith.constant 16 : index
    %c0_93 = arith.constant 0 : index
    %336 = vector.load %arg2[%c16, %c0_93] : memref<40x256xf32, #tpu.memory_space<vmem>>, vector<1x32xf32>
    %337 = vector.broadcast %336 : vector<1x32xf32> to vector<16x32xf32>
    %338 = arith.addf %335, %337 : vector<16x32xf32>
    %339 = arith.truncf %338 : vector<16x32xf32> to vector<16x32xbf16>
    %340 = vector.shape_cast %339 : vector<16x32xbf16> to vector<2x8x32xbf16>
    %341 = vector.extract_strided_slice %340 {offsets = [0, 0, 0], sizes = [2, 8, 8], strides = [1, 1, 1]} : vector<2x8x32xbf16> to vector<2x8x8xbf16>
    %342 = vector.extract_strided_slice %321 {offsets = [0, 0, 0], sizes = [2, 8, 8], strides = [1, 1, 1]} : vector<2x8x32xbf16> to vector<2x8x8xbf16>
    %cst_94 = arith.constant dense<0.000000e+00> : vector<2x8x8xf32>
    %343 = tpu.matmul %341, %342, %cst_94 {dimension_numbers = #tpu.dot_dimension_numbers<[2], [2], [1], [1], [0, 0, 0, 1, 1, 1], [0], [0]>} : vector<2x8x8xbf16>, vector<2x8x8xbf16>, vector<2x8x8xf32> -> vector<2x8x8xf32>
    %cst_95 = arith.constant dense<0xFF800000> : vector<2x8xf32>
    %344 = vector.multi_reduction <maximumf>, %343, %cst_95 [2] : vector<2x8x8xf32> to vector<2x8xf32>
    %345 = vector.shape_cast %344 : vector<2x8xf32> to vector<2x8x1xf32>
    %346 = vector.broadcast %345 : vector<2x8x1xf32> to vector<2x8x8xf32>
    %347 = arith.subf %343, %346 : vector<2x8x8xf32>
    %348 = math.exp %347 : vector<2x8x8xf32>
    %cst_96 = arith.constant dense<0.000000e+00> : vector<2x8xf32>
    %349 = vector.multi_reduction <add>, %348, %cst_96 [2] : vector<2x8x8xf32> to vector<2x8xf32>
    %350 = vector.shape_cast %349 : vector<2x8xf32> to vector<2x8x1xf32>
    %351 = tpu.reciprocal %350 {approx = true} : vector<2x8x1xf32> -> vector<2x8x1xf32>
    %352 = vector.broadcast %351 : vector<2x8x1xf32> to vector<2x8x8xf32>
    %353 = arith.mulf %348, %352 : vector<2x8x8xf32>
    %354 = vector.extract_strided_slice %318 {offsets = [0, 0, 0], sizes = [2, 8, 32], strides = [1, 1, 1]} : vector<2x8x128xbf16> to vector<2x8x32xbf16>
    %355 = arith.truncf %353 : vector<2x8x8xf32> to vector<2x8x8xbf16>
    %cst_97 = arith.constant dense<0.000000e+00> : vector<2x8x32xf32>
    %356 = tpu.matmul %355, %354, %cst_97 {dimension_numbers = #tpu.dot_dimension_numbers<[2], [1], [1], [2], [0, 0, 0, 1, 1, 2], [0], [0]>} : vector<2x8x8xbf16>, vector<2x8x32xbf16>, vector<2x8x32xf32> -> vector<2x8x32xf32>
    %357 = vector.extract_strided_slice %340 {offsets = [0, 0, 8], sizes = [2, 8, 8], strides = [1, 1, 1]} : vector<2x8x32xbf16> to vector<2x8x8xbf16>
    %358 = vector.extract_strided_slice %321 {offsets = [0, 0, 8], sizes = [2, 8, 8], strides = [1, 1, 1]} : vector<2x8x32xbf16> to vector<2x8x8xbf16>
    %cst_98 = arith.constant dense<0.000000e+00> : vector<2x8x8xf32>
    %359 = tpu.matmul %357, %358, %cst_98 {dimension_numbers = #tpu.dot_dimension_numbers<[2], [2], [1], [1], [0, 0, 0, 1, 1, 1], [0], [0]>} : vector<2x8x8xbf16>, vector<2x8x8xbf16>, vector<2x8x8xf32> -> vector<2x8x8xf32>
    %cst_99 = arith.constant dense<0xFF800000> : vector<2x8xf32>
    %360 = vector.multi_reduction <maximumf>, %359, %cst_99 [2] : vector<2x8x8xf32> to vector<2x8xf32>
    %361 = vector.shape_cast %360 : vector<2x8xf32> to vector<2x8x1xf32>
    %362 = vector.broadcast %361 : vector<2x8x1xf32> to vector<2x8x8xf32>
    %363 = arith.subf %359, %362 : vector<2x8x8xf32>
    %364 = math.exp %363 : vector<2x8x8xf32>
    %cst_100 = arith.constant dense<0.000000e+00> : vector<2x8xf32>
    %365 = vector.multi_reduction <add>, %364, %cst_100 [2] : vector<2x8x8xf32> to vector<2x8xf32>
    %366 = vector.shape_cast %365 : vector<2x8xf32> to vector<2x8x1xf32>
    %367 = tpu.reciprocal %366 {approx = true} : vector<2x8x1xf32> -> vector<2x8x1xf32>
    %368 = vector.broadcast %367 : vector<2x8x1xf32> to vector<2x8x8xf32>
    %369 = arith.mulf %364, %368 : vector<2x8x8xf32>
    %370 = vector.extract_strided_slice %318 {offsets = [0, 0, 32], sizes = [2, 8, 32], strides = [1, 1, 1]} : vector<2x8x128xbf16> to vector<2x8x32xbf16>
    %371 = arith.truncf %369 : vector<2x8x8xf32> to vector<2x8x8xbf16>
    %cst_101 = arith.constant dense<0.000000e+00> : vector<2x8x32xf32>
    %372 = tpu.matmul %371, %370, %cst_101 {dimension_numbers = #tpu.dot_dimension_numbers<[2], [1], [1], [2], [0, 0, 0, 1, 1, 2], [0], [0]>} : vector<2x8x8xbf16>, vector<2x8x32xbf16>, vector<2x8x32xf32> -> vector<2x8x32xf32>
    %373 = arith.addf %356, %372 : vector<2x8x32xf32>
    %374 = vector.extract_strided_slice %340 {offsets = [0, 0, 16], sizes = [2, 8, 8], strides = [1, 1, 1]} : vector<2x8x32xbf16> to vector<2x8x8xbf16>
    %375 = vector.extract_strided_slice %321 {offsets = [0, 0, 16], sizes = [2, 8, 8], strides = [1, 1, 1]} : vector<2x8x32xbf16> to vector<2x8x8xbf16>
    %cst_102 = arith.constant dense<0.000000e+00> : vector<2x8x8xf32>
    %376 = tpu.matmul %374, %375, %cst_102 {dimension_numbers = #tpu.dot_dimension_numbers<[2], [2], [1], [1], [0, 0, 0, 1, 1, 1], [0], [0]>} : vector<2x8x8xbf16>, vector<2x8x8xbf16>, vector<2x8x8xf32> -> vector<2x8x8xf32>
    %cst_103 = arith.constant dense<0xFF800000> : vector<2x8xf32>
    %377 = vector.multi_reduction <maximumf>, %376, %cst_103 [2] : vector<2x8x8xf32> to vector<2x8xf32>
    %378 = vector.shape_cast %377 : vector<2x8xf32> to vector<2x8x1xf32>
    %379 = vector.broadcast %378 : vector<2x8x1xf32> to vector<2x8x8xf32>
    %380 = arith.subf %376, %379 : vector<2x8x8xf32>
    %381 = math.exp %380 : vector<2x8x8xf32>
    %cst_104 = arith.constant dense<0.000000e+00> : vector<2x8xf32>
    %382 = vector.multi_reduction <add>, %381, %cst_104 [2] : vector<2x8x8xf32> to vector<2x8xf32>
    %383 = vector.shape_cast %382 : vector<2x8xf32> to vector<2x8x1xf32>
    %384 = tpu.reciprocal %383 {approx = true} : vector<2x8x1xf32> -> vector<2x8x1xf32>
    %385 = vector.broadcast %384 : vector<2x8x1xf32> to vector<2x8x8xf32>
    %386 = arith.mulf %381, %385 : vector<2x8x8xf32>
    %387 = vector.extract_strided_slice %318 {offsets = [0, 0, 64], sizes = [2, 8, 32], strides = [1, 1, 1]} : vector<2x8x128xbf16> to vector<2x8x32xbf16>
    %388 = arith.truncf %386 : vector<2x8x8xf32> to vector<2x8x8xbf16>
    %cst_105 = arith.constant dense<0.000000e+00> : vector<2x8x32xf32>
    %389 = tpu.matmul %388, %387, %cst_105 {dimension_numbers = #tpu.dot_dimension_numbers<[2], [1], [1], [2], [0, 0, 0, 1, 1, 2], [0], [0]>} : vector<2x8x8xbf16>, vector<2x8x32xbf16>, vector<2x8x32xf32> -> vector<2x8x32xf32>
    %390 = arith.addf %373, %389 : vector<2x8x32xf32>
    %391 = vector.extract_strided_slice %340 {offsets = [0, 0, 24], sizes = [2, 8, 8], strides = [1, 1, 1]} : vector<2x8x32xbf16> to vector<2x8x8xbf16>
    %392 = vector.extract_strided_slice %321 {offsets = [0, 0, 24], sizes = [2, 8, 8], strides = [1, 1, 1]} : vector<2x8x32xbf16> to vector<2x8x8xbf16>
    %cst_106 = arith.constant dense<0.000000e+00> : vector<2x8x8xf32>
    %393 = tpu.matmul %391, %392, %cst_106 {dimension_numbers = #tpu.dot_dimension_numbers<[2], [2], [1], [1], [0, 0, 0, 1, 1, 1], [0], [0]>} : vector<2x8x8xbf16>, vector<2x8x8xbf16>, vector<2x8x8xf32> -> vector<2x8x8xf32>
    %cst_107 = arith.constant dense<0xFF800000> : vector<2x8xf32>
    %394 = vector.multi_reduction <maximumf>, %393, %cst_107 [2] : vector<2x8x8xf32> to vector<2x8xf32>
    %395 = vector.shape_cast %394 : vector<2x8xf32> to vector<2x8x1xf32>
    %396 = vector.broadcast %395 : vector<2x8x1xf32> to vector<2x8x8xf32>
    %397 = arith.subf %393, %396 : vector<2x8x8xf32>
    %398 = math.exp %397 : vector<2x8x8xf32>
    %cst_108 = arith.constant dense<0.000000e+00> : vector<2x8xf32>
    %399 = vector.multi_reduction <add>, %398, %cst_108 [2] : vector<2x8x8xf32> to vector<2x8xf32>
    %400 = vector.shape_cast %399 : vector<2x8xf32> to vector<2x8x1xf32>
    %401 = tpu.reciprocal %400 {approx = true} : vector<2x8x1xf32> -> vector<2x8x1xf32>
    %402 = vector.broadcast %401 : vector<2x8x1xf32> to vector<2x8x8xf32>
    %403 = arith.mulf %398, %402 : vector<2x8x8xf32>
    %404 = vector.extract_strided_slice %318 {offsets = [0, 0, 96], sizes = [2, 8, 32], strides = [1, 1, 1]} : vector<2x8x128xbf16> to vector<2x8x32xbf16>
    %405 = arith.truncf %403 : vector<2x8x8xf32> to vector<2x8x8xbf16>
    %cst_109 = arith.constant dense<0.000000e+00> : vector<2x8x32xf32>
    %406 = tpu.matmul %405, %404, %cst_109 {dimension_numbers = #tpu.dot_dimension_numbers<[2], [1], [1], [2], [0, 0, 0, 1, 1, 2], [0], [0]>} : vector<2x8x8xbf16>, vector<2x8x32xbf16>, vector<2x8x32xf32> -> vector<2x8x32xf32>
    %407 = arith.addf %390, %406 : vector<2x8x32xf32>
    %408 = vector.shape_cast %407 : vector<2x8x32xf32> to vector<16x32xf32>
    %c18 = arith.constant 18 : index
    %c0_110 = arith.constant 0 : index
    %409 = vector.load %arg2[%c18, %c0_110] : memref<40x256xf32, #tpu.memory_space<vmem>>, vector<1x32xf32>
    %410 = vector.broadcast %409 : vector<1x32xf32> to vector<16x32xf32>
    %411 = arith.addf %408, %410 : vector<16x32xf32>
    %412 = arith.addf %309, %411 : vector<16x32xf32>
    %c19 = arith.constant 19 : index
    %c0_111 = arith.constant 0 : index
    %413 = vector.load %arg2[%c19, %c0_111] : memref<40x256xf32, #tpu.memory_space<vmem>>, vector<1x32xf32>
    %c20 = arith.constant 20 : index
    %c0_112 = arith.constant 0 : index
    %414 = vector.load %arg2[%c20, %c0_112] : memref<40x256xf32, #tpu.memory_space<vmem>>, vector<1x32xf32>
    %cst_113 = arith.constant dense<0.000000e+00> : vector<16xf32>
    %415 = vector.multi_reduction <add>, %412, %cst_113 [1] : vector<16x32xf32> to vector<16xf32>
    %416 = vector.shape_cast %415 : vector<16xf32> to vector<16x1xf32>
    %cst_114 = arith.constant 3.200000e+01 : f32
    %417 = vector.broadcast %cst_114 : f32 to vector<16x1xf32>
    %418 = arith.divf %416, %417 : vector<16x1xf32>
    %419 = vector.broadcast %418 : vector<16x1xf32> to vector<16x32xf32>
    %420 = arith.subf %412, %419 : vector<16x32xf32>
    %421 = vector.broadcast %418 : vector<16x1xf32> to vector<16x32xf32>
    %422 = arith.subf %412, %421 : vector<16x32xf32>
    %423 = arith.mulf %420, %422 : vector<16x32xf32>
    %cst_115 = arith.constant dense<0.000000e+00> : vector<16xf32>
    %424 = vector.multi_reduction <add>, %423, %cst_115 [1] : vector<16x32xf32> to vector<16xf32>
    %425 = vector.shape_cast %424 : vector<16xf32> to vector<16x1xf32>
    %cst_116 = arith.constant 3.200000e+01 : f32
    %426 = vector.broadcast %cst_116 : f32 to vector<16x1xf32>
    %427 = arith.divf %425, %426 : vector<16x1xf32>
    %428 = vector.broadcast %418 : vector<16x1xf32> to vector<16x32xf32>
    %429 = arith.subf %412, %428 : vector<16x32xf32>
    %cst_117 = arith.constant 9.99999974E-6 : f32
    %430 = vector.broadcast %cst_117 : f32 to vector<16x1xf32>
    %431 = arith.addf %427, %430 : vector<16x1xf32>
    %432 = math.rsqrt %431 : vector<16x1xf32>
    %433 = vector.broadcast %432 : vector<16x1xf32> to vector<16x32xf32>
    %434 = arith.mulf %429, %433 : vector<16x32xf32>
    %435 = vector.broadcast %413 : vector<1x32xf32> to vector<16x32xf32>
    %436 = arith.mulf %434, %435 : vector<16x32xf32>
    %437 = vector.broadcast %414 : vector<1x32xf32> to vector<16x32xf32>
    %438 = arith.addf %436, %437 : vector<16x32xf32>
    %439 = arith.truncf %438 : vector<16x32xf32> to vector<16x32xbf16>
    %c320 = arith.constant 320 : index
    %c0_118 = arith.constant 0 : index
    %440 = vector.load %arg1[%c320, %c0_118] : memref<608x256xbf16, #tpu.memory_space<vmem>>, vector<32x64xbf16>
    %cst_119 = arith.constant dense<0.000000e+00> : vector<16x64xf32>
    %441 = tpu.matmul %439, %440, %cst_119 {dimension_numbers = #tpu.dot_dimension_numbers<[1], [0], [0], [1], [0, 0, 1, 1], [], []>} : vector<16x32xbf16>, vector<32x64xbf16>, vector<16x64xf32> -> vector<16x64xf32>
    %c21 = arith.constant 21 : index
    %c0_120 = arith.constant 0 : index
    %442 = vector.load %arg2[%c21, %c0_120] : memref<40x256xf32, #tpu.memory_space<vmem>>, vector<1x64xf32>
    %443 = vector.broadcast %442 : vector<1x64xf32> to vector<16x64xf32>
    %444 = arith.addf %441, %443 : vector<16x64xf32>
    %cst_121 = arith.constant 0.000000e+00 : f32
    %445 = vector.broadcast %cst_121 : f32 to vector<16x64xf32>
    %446 = arith.maximumf %444, %445 : vector<16x64xf32>
    %447 = arith.truncf %446 : vector<16x64xf32> to vector<16x64xbf16>
    %c352 = arith.constant 352 : index
    %c0_122 = arith.constant 0 : index
    %448 = vector.load %arg1[%c352, %c0_122] : memref<608x256xbf16, #tpu.memory_space<vmem>>, vector<64x32xbf16>
    %cst_123 = arith.constant dense<0.000000e+00> : vector<16x32xf32>
    %449 = tpu.matmul %447, %448, %cst_123 {dimension_numbers = #tpu.dot_dimension_numbers<[1], [0], [0], [1], [0, 0, 1, 1], [], []>} : vector<16x64xbf16>, vector<64x32xbf16>, vector<16x32xf32> -> vector<16x32xf32>
    %c22 = arith.constant 22 : index
    %c0_124 = arith.constant 0 : index
    %450 = vector.load %arg2[%c22, %c0_124] : memref<40x256xf32, #tpu.memory_space<vmem>>, vector<1x32xf32>
    %451 = vector.broadcast %450 : vector<1x32xf32> to vector<16x32xf32>
    %452 = arith.addf %449, %451 : vector<16x32xf32>
    %453 = arith.addf %438, %452 : vector<16x32xf32>
    %c23 = arith.constant 23 : index
    %c0_125 = arith.constant 0 : index
    %454 = vector.load %arg2[%c23, %c0_125] : memref<40x256xf32, #tpu.memory_space<vmem>>, vector<1x32xf32>
    %c24 = arith.constant 24 : index
    %c0_126 = arith.constant 0 : index
    %455 = vector.load %arg2[%c24, %c0_126] : memref<40x256xf32, #tpu.memory_space<vmem>>, vector<1x32xf32>
    %cst_127 = arith.constant dense<0.000000e+00> : vector<16xf32>
    %456 = vector.multi_reduction <add>, %453, %cst_127 [1] : vector<16x32xf32> to vector<16xf32>
    %457 = vector.shape_cast %456 : vector<16xf32> to vector<16x1xf32>
    %cst_128 = arith.constant 3.200000e+01 : f32
    %458 = vector.broadcast %cst_128 : f32 to vector<16x1xf32>
    %459 = arith.divf %457, %458 : vector<16x1xf32>
    %460 = vector.broadcast %459 : vector<16x1xf32> to vector<16x32xf32>
    %461 = arith.subf %453, %460 : vector<16x32xf32>
    %462 = vector.broadcast %459 : vector<16x1xf32> to vector<16x32xf32>
    %463 = arith.subf %453, %462 : vector<16x32xf32>
    %464 = arith.mulf %461, %463 : vector<16x32xf32>
    %cst_129 = arith.constant dense<0.000000e+00> : vector<16xf32>
    %465 = vector.multi_reduction <add>, %464, %cst_129 [1] : vector<16x32xf32> to vector<16xf32>
    %466 = vector.shape_cast %465 : vector<16xf32> to vector<16x1xf32>
    %cst_130 = arith.constant 3.200000e+01 : f32
    %467 = vector.broadcast %cst_130 : f32 to vector<16x1xf32>
    %468 = arith.divf %466, %467 : vector<16x1xf32>
    %469 = vector.broadcast %459 : vector<16x1xf32> to vector<16x32xf32>
    %470 = arith.subf %453, %469 : vector<16x32xf32>
    %cst_131 = arith.constant 9.99999974E-6 : f32
    %471 = vector.broadcast %cst_131 : f32 to vector<16x1xf32>
    %472 = arith.addf %468, %471 : vector<16x1xf32>
    %473 = math.rsqrt %472 : vector<16x1xf32>
    %474 = vector.broadcast %473 : vector<16x1xf32> to vector<16x32xf32>
    %475 = arith.mulf %470, %474 : vector<16x32xf32>
    %476 = vector.broadcast %454 : vector<1x32xf32> to vector<16x32xf32>
    %477 = arith.mulf %475, %476 : vector<16x32xf32>
    %478 = vector.broadcast %455 : vector<1x32xf32> to vector<16x32xf32>
    %479 = arith.addf %477, %478 : vector<16x32xf32>
    %480 = arith.truncf %479 : vector<16x32xf32> to vector<16x32xbf16>
    %c416 = arith.constant 416 : index
    %c0_132 = arith.constant 0 : index
    %481 = vector.load %arg1[%c416, %c0_132] : memref<608x256xbf16, #tpu.memory_space<vmem>>, vector<32x32xbf16>
    %cst_133 = arith.constant dense<0.000000e+00> : vector<16x32xf32>
    %482 = tpu.matmul %480, %481, %cst_133 {dimension_numbers = #tpu.dot_dimension_numbers<[1], [0], [0], [1], [0, 0, 1, 1], [], []>} : vector<16x32xbf16>, vector<32x32xbf16>, vector<16x32xf32> -> vector<16x32xf32>
    %c25 = arith.constant 25 : index
    %c0_134 = arith.constant 0 : index
    %483 = vector.load %arg2[%c25, %c0_134] : memref<40x256xf32, #tpu.memory_space<vmem>>, vector<1x32xf32>
    %484 = vector.broadcast %483 : vector<1x32xf32> to vector<16x32xf32>
    %485 = arith.addf %482, %484 : vector<16x32xf32>
    %486 = arith.truncf %485 : vector<16x32xf32> to vector<16x32xbf16>
    %487 = vector.shape_cast %486 : vector<16x32xbf16> to vector<2x8x32xbf16>
    %488 = vector.extract_strided_slice %487 {offsets = [0, 0, 0], sizes = [2, 8, 8], strides = [1, 1, 1]} : vector<2x8x32xbf16> to vector<2x8x8xbf16>
    %489 = vector.extract_strided_slice %332 {offsets = [0, 0, 0], sizes = [2, 8, 8], strides = [1, 1, 1]} : vector<2x8x32xbf16> to vector<2x8x8xbf16>
    %cst_135 = arith.constant dense<0.000000e+00> : vector<2x8x8xf32>
    %490 = tpu.matmul %488, %489, %cst_135 {dimension_numbers = #tpu.dot_dimension_numbers<[2], [2], [1], [1], [0, 0, 0, 1, 1, 1], [0], [0]>} : vector<2x8x8xbf16>, vector<2x8x8xbf16>, vector<2x8x8xf32> -> vector<2x8x8xf32>
    %cst_136 = arith.constant dense<0xFF800000> : vector<2x8xf32>
    %491 = vector.multi_reduction <maximumf>, %490, %cst_136 [2] : vector<2x8x8xf32> to vector<2x8xf32>
    %492 = vector.shape_cast %491 : vector<2x8xf32> to vector<2x8x1xf32>
    %493 = vector.broadcast %492 : vector<2x8x1xf32> to vector<2x8x8xf32>
    %494 = arith.subf %490, %493 : vector<2x8x8xf32>
    %495 = math.exp %494 : vector<2x8x8xf32>
    %cst_137 = arith.constant dense<0.000000e+00> : vector<2x8xf32>
    %496 = vector.multi_reduction <add>, %495, %cst_137 [2] : vector<2x8x8xf32> to vector<2x8xf32>
    %497 = vector.shape_cast %496 : vector<2x8xf32> to vector<2x8x1xf32>
    %498 = tpu.reciprocal %497 {approx = true} : vector<2x8x1xf32> -> vector<2x8x1xf32>
    %499 = vector.broadcast %498 : vector<2x8x1xf32> to vector<2x8x8xf32>
    %500 = arith.mulf %495, %499 : vector<2x8x8xf32>
    %501 = vector.extract_strided_slice %329 {offsets = [0, 0, 0], sizes = [2, 8, 32], strides = [1, 1, 1]} : vector<2x8x128xbf16> to vector<2x8x32xbf16>
    %502 = arith.truncf %500 : vector<2x8x8xf32> to vector<2x8x8xbf16>
    %cst_138 = arith.constant dense<0.000000e+00> : vector<2x8x32xf32>
    %503 = tpu.matmul %502, %501, %cst_138 {dimension_numbers = #tpu.dot_dimension_numbers<[2], [1], [1], [2], [0, 0, 0, 1, 1, 2], [0], [0]>} : vector<2x8x8xbf16>, vector<2x8x32xbf16>, vector<2x8x32xf32> -> vector<2x8x32xf32>
    %504 = vector.extract_strided_slice %487 {offsets = [0, 0, 8], sizes = [2, 8, 8], strides = [1, 1, 1]} : vector<2x8x32xbf16> to vector<2x8x8xbf16>
    %505 = vector.extract_strided_slice %332 {offsets = [0, 0, 8], sizes = [2, 8, 8], strides = [1, 1, 1]} : vector<2x8x32xbf16> to vector<2x8x8xbf16>
    %cst_139 = arith.constant dense<0.000000e+00> : vector<2x8x8xf32>
    %506 = tpu.matmul %504, %505, %cst_139 {dimension_numbers = #tpu.dot_dimension_numbers<[2], [2], [1], [1], [0, 0, 0, 1, 1, 1], [0], [0]>} : vector<2x8x8xbf16>, vector<2x8x8xbf16>, vector<2x8x8xf32> -> vector<2x8x8xf32>
    %cst_140 = arith.constant dense<0xFF800000> : vector<2x8xf32>
    %507 = vector.multi_reduction <maximumf>, %506, %cst_140 [2] : vector<2x8x8xf32> to vector<2x8xf32>
    %508 = vector.shape_cast %507 : vector<2x8xf32> to vector<2x8x1xf32>
    %509 = vector.broadcast %508 : vector<2x8x1xf32> to vector<2x8x8xf32>
    %510 = arith.subf %506, %509 : vector<2x8x8xf32>
    %511 = math.exp %510 : vector<2x8x8xf32>
    %cst_141 = arith.constant dense<0.000000e+00> : vector<2x8xf32>
    %512 = vector.multi_reduction <add>, %511, %cst_141 [2] : vector<2x8x8xf32> to vector<2x8xf32>
    %513 = vector.shape_cast %512 : vector<2x8xf32> to vector<2x8x1xf32>
    %514 = tpu.reciprocal %513 {approx = true} : vector<2x8x1xf32> -> vector<2x8x1xf32>
    %515 = vector.broadcast %514 : vector<2x8x1xf32> to vector<2x8x8xf32>
    %516 = arith.mulf %511, %515 : vector<2x8x8xf32>
    %517 = vector.extract_strided_slice %329 {offsets = [0, 0, 32], sizes = [2, 8, 32], strides = [1, 1, 1]} : vector<2x8x128xbf16> to vector<2x8x32xbf16>
    %518 = arith.truncf %516 : vector<2x8x8xf32> to vector<2x8x8xbf16>
    %cst_142 = arith.constant dense<0.000000e+00> : vector<2x8x32xf32>
    %519 = tpu.matmul %518, %517, %cst_142 {dimension_numbers = #tpu.dot_dimension_numbers<[2], [1], [1], [2], [0, 0, 0, 1, 1, 2], [0], [0]>} : vector<2x8x8xbf16>, vector<2x8x32xbf16>, vector<2x8x32xf32> -> vector<2x8x32xf32>
    %520 = arith.addf %503, %519 : vector<2x8x32xf32>
    %521 = vector.extract_strided_slice %487 {offsets = [0, 0, 16], sizes = [2, 8, 8], strides = [1, 1, 1]} : vector<2x8x32xbf16> to vector<2x8x8xbf16>
    %522 = vector.extract_strided_slice %332 {offsets = [0, 0, 16], sizes = [2, 8, 8], strides = [1, 1, 1]} : vector<2x8x32xbf16> to vector<2x8x8xbf16>
    %cst_143 = arith.constant dense<0.000000e+00> : vector<2x8x8xf32>
    %523 = tpu.matmul %521, %522, %cst_143 {dimension_numbers = #tpu.dot_dimension_numbers<[2], [2], [1], [1], [0, 0, 0, 1, 1, 1], [0], [0]>} : vector<2x8x8xbf16>, vector<2x8x8xbf16>, vector<2x8x8xf32> -> vector<2x8x8xf32>
    %cst_144 = arith.constant dense<0xFF800000> : vector<2x8xf32>
    %524 = vector.multi_reduction <maximumf>, %523, %cst_144 [2] : vector<2x8x8xf32> to vector<2x8xf32>
    %525 = vector.shape_cast %524 : vector<2x8xf32> to vector<2x8x1xf32>
    %526 = vector.broadcast %525 : vector<2x8x1xf32> to vector<2x8x8xf32>
    %527 = arith.subf %523, %526 : vector<2x8x8xf32>
    %528 = math.exp %527 : vector<2x8x8xf32>
    %cst_145 = arith.constant dense<0.000000e+00> : vector<2x8xf32>
    %529 = vector.multi_reduction <add>, %528, %cst_145 [2] : vector<2x8x8xf32> to vector<2x8xf32>
    %530 = vector.shape_cast %529 : vector<2x8xf32> to vector<2x8x1xf32>
    %531 = tpu.reciprocal %530 {approx = true} : vector<2x8x1xf32> -> vector<2x8x1xf32>
    %532 = vector.broadcast %531 : vector<2x8x1xf32> to vector<2x8x8xf32>
    %533 = arith.mulf %528, %532 : vector<2x8x8xf32>
    %534 = vector.extract_strided_slice %329 {offsets = [0, 0, 64], sizes = [2, 8, 32], strides = [1, 1, 1]} : vector<2x8x128xbf16> to vector<2x8x32xbf16>
    %535 = arith.truncf %533 : vector<2x8x8xf32> to vector<2x8x8xbf16>
    %cst_146 = arith.constant dense<0.000000e+00> : vector<2x8x32xf32>
    %536 = tpu.matmul %535, %534, %cst_146 {dimension_numbers = #tpu.dot_dimension_numbers<[2], [1], [1], [2], [0, 0, 0, 1, 1, 2], [0], [0]>} : vector<2x8x8xbf16>, vector<2x8x32xbf16>, vector<2x8x32xf32> -> vector<2x8x32xf32>
    %537 = arith.addf %520, %536 : vector<2x8x32xf32>
    %538 = vector.extract_strided_slice %487 {offsets = [0, 0, 24], sizes = [2, 8, 8], strides = [1, 1, 1]} : vector<2x8x32xbf16> to vector<2x8x8xbf16>
    %539 = vector.extract_strided_slice %332 {offsets = [0, 0, 24], sizes = [2, 8, 8], strides = [1, 1, 1]} : vector<2x8x32xbf16> to vector<2x8x8xbf16>
    %cst_147 = arith.constant dense<0.000000e+00> : vector<2x8x8xf32>
    %540 = tpu.matmul %538, %539, %cst_147 {dimension_numbers = #tpu.dot_dimension_numbers<[2], [2], [1], [1], [0, 0, 0, 1, 1, 1], [0], [0]>} : vector<2x8x8xbf16>, vector<2x8x8xbf16>, vector<2x8x8xf32> -> vector<2x8x8xf32>
    %cst_148 = arith.constant dense<0xFF800000> : vector<2x8xf32>
    %541 = vector.multi_reduction <maximumf>, %540, %cst_148 [2] : vector<2x8x8xf32> to vector<2x8xf32>
    %542 = vector.shape_cast %541 : vector<2x8xf32> to vector<2x8x1xf32>
    %543 = vector.broadcast %542 : vector<2x8x1xf32> to vector<2x8x8xf32>
    %544 = arith.subf %540, %543 : vector<2x8x8xf32>
    %545 = math.exp %544 : vector<2x8x8xf32>
    %cst_149 = arith.constant dense<0.000000e+00> : vector<2x8xf32>
    %546 = vector.multi_reduction <add>, %545, %cst_149 [2] : vector<2x8x8xf32> to vector<2x8xf32>
    %547 = vector.shape_cast %546 : vector<2x8xf32> to vector<2x8x1xf32>
    %548 = tpu.reciprocal %547 {approx = true} : vector<2x8x1xf32> -> vector<2x8x1xf32>
    %549 = vector.broadcast %548 : vector<2x8x1xf32> to vector<2x8x8xf32>
    %550 = arith.mulf %545, %549 : vector<2x8x8xf32>
    %551 = vector.extract_strided_slice %329 {offsets = [0, 0, 96], sizes = [2, 8, 32], strides = [1, 1, 1]} : vector<2x8x128xbf16> to vector<2x8x32xbf16>
    %552 = arith.truncf %550 : vector<2x8x8xf32> to vector<2x8x8xbf16>
    %cst_150 = arith.constant dense<0.000000e+00> : vector<2x8x32xf32>
    %553 = tpu.matmul %552, %551, %cst_150 {dimension_numbers = #tpu.dot_dimension_numbers<[2], [1], [1], [2], [0, 0, 0, 1, 1, 2], [0], [0]>} : vector<2x8x8xbf16>, vector<2x8x32xbf16>, vector<2x8x32xf32> -> vector<2x8x32xf32>
    %554 = arith.addf %537, %553 : vector<2x8x32xf32>
    %555 = vector.shape_cast %554 : vector<2x8x32xf32> to vector<16x32xf32>
    %c27 = arith.constant 27 : index
    %c0_151 = arith.constant 0 : index
    %556 = vector.load %arg2[%c27, %c0_151] : memref<40x256xf32, #tpu.memory_space<vmem>>, vector<1x32xf32>
    %557 = vector.broadcast %556 : vector<1x32xf32> to vector<16x32xf32>
    %558 = arith.addf %555, %557 : vector<16x32xf32>
    %559 = arith.addf %479, %558 : vector<16x32xf32>
    %c28 = arith.constant 28 : index
    %c0_152 = arith.constant 0 : index
    %560 = vector.load %arg2[%c28, %c0_152] : memref<40x256xf32, #tpu.memory_space<vmem>>, vector<1x32xf32>
    %c29 = arith.constant 29 : index
    %c0_153 = arith.constant 0 : index
    %561 = vector.load %arg2[%c29, %c0_153] : memref<40x256xf32, #tpu.memory_space<vmem>>, vector<1x32xf32>
    %cst_154 = arith.constant dense<0.000000e+00> : vector<16xf32>
    %562 = vector.multi_reduction <add>, %559, %cst_154 [1] : vector<16x32xf32> to vector<16xf32>
    %563 = vector.shape_cast %562 : vector<16xf32> to vector<16x1xf32>
    %cst_155 = arith.constant 3.200000e+01 : f32
    %564 = vector.broadcast %cst_155 : f32 to vector<16x1xf32>
    %565 = arith.divf %563, %564 : vector<16x1xf32>
    %566 = vector.broadcast %565 : vector<16x1xf32> to vector<16x32xf32>
    %567 = arith.subf %559, %566 : vector<16x32xf32>
    %568 = vector.broadcast %565 : vector<16x1xf32> to vector<16x32xf32>
    %569 = arith.subf %559, %568 : vector<16x32xf32>
    %570 = arith.mulf %567, %569 : vector<16x32xf32>
    %cst_156 = arith.constant dense<0.000000e+00> : vector<16xf32>
    %571 = vector.multi_reduction <add>, %570, %cst_156 [1] : vector<16x32xf32> to vector<16xf32>
    %572 = vector.shape_cast %571 : vector<16xf32> to vector<16x1xf32>
    %cst_157 = arith.constant 3.200000e+01 : f32
    %573 = vector.broadcast %cst_157 : f32 to vector<16x1xf32>
    %574 = arith.divf %572, %573 : vector<16x1xf32>
    %575 = vector.broadcast %565 : vector<16x1xf32> to vector<16x32xf32>
    %576 = arith.subf %559, %575 : vector<16x32xf32>
    %cst_158 = arith.constant 9.99999974E-6 : f32
    %577 = vector.broadcast %cst_158 : f32 to vector<16x1xf32>
    %578 = arith.addf %574, %577 : vector<16x1xf32>
    %579 = math.rsqrt %578 : vector<16x1xf32>
    %580 = vector.broadcast %579 : vector<16x1xf32> to vector<16x32xf32>
    %581 = arith.mulf %576, %580 : vector<16x32xf32>
    %582 = vector.broadcast %560 : vector<1x32xf32> to vector<16x32xf32>
    %583 = arith.mulf %581, %582 : vector<16x32xf32>
    %584 = vector.broadcast %561 : vector<1x32xf32> to vector<16x32xf32>
    %585 = arith.addf %583, %584 : vector<16x32xf32>
    %586 = arith.truncf %585 : vector<16x32xf32> to vector<16x32xbf16>
    %c480 = arith.constant 480 : index
    %c0_159 = arith.constant 0 : index
    %587 = vector.load %arg1[%c480, %c0_159] : memref<608x256xbf16, #tpu.memory_space<vmem>>, vector<32x64xbf16>
    %cst_160 = arith.constant dense<0.000000e+00> : vector<16x64xf32>
    %588 = tpu.matmul %586, %587, %cst_160 {dimension_numbers = #tpu.dot_dimension_numbers<[1], [0], [0], [1], [0, 0, 1, 1], [], []>} : vector<16x32xbf16>, vector<32x64xbf16>, vector<16x64xf32> -> vector<16x64xf32>
    %c30 = arith.constant 30 : index
    %c0_161 = arith.constant 0 : index
    %589 = vector.load %arg2[%c30, %c0_161] : memref<40x256xf32, #tpu.memory_space<vmem>>, vector<1x64xf32>
    %590 = vector.broadcast %589 : vector<1x64xf32> to vector<16x64xf32>
    %591 = arith.addf %588, %590 : vector<16x64xf32>
    %cst_162 = arith.constant 0.000000e+00 : f32
    %592 = vector.broadcast %cst_162 : f32 to vector<16x64xf32>
    %593 = arith.maximumf %591, %592 : vector<16x64xf32>
    %594 = arith.truncf %593 : vector<16x64xf32> to vector<16x64xbf16>
    %c512 = arith.constant 512 : index
    %c0_163 = arith.constant 0 : index
    %595 = vector.load %arg1[%c512, %c0_163] : memref<608x256xbf16, #tpu.memory_space<vmem>>, vector<64x32xbf16>
    %cst_164 = arith.constant dense<0.000000e+00> : vector<16x32xf32>
    %596 = tpu.matmul %594, %595, %cst_164 {dimension_numbers = #tpu.dot_dimension_numbers<[1], [0], [0], [1], [0, 0, 1, 1], [], []>} : vector<16x64xbf16>, vector<64x32xbf16>, vector<16x32xf32> -> vector<16x32xf32>
    %c31 = arith.constant 31 : index
    %c0_165 = arith.constant 0 : index
    %597 = vector.load %arg2[%c31, %c0_165] : memref<40x256xf32, #tpu.memory_space<vmem>>, vector<1x32xf32>
    %598 = vector.broadcast %597 : vector<1x32xf32> to vector<16x32xf32>
    %599 = arith.addf %596, %598 : vector<16x32xf32>
    %600 = arith.addf %585, %599 : vector<16x32xf32>
    %c32_166 = arith.constant 32 : index
    %c0_167 = arith.constant 0 : index
    %601 = vector.load %arg2[%c32_166, %c0_167] : memref<40x256xf32, #tpu.memory_space<vmem>>, vector<1x32xf32>
    %c33 = arith.constant 33 : index
    %c0_168 = arith.constant 0 : index
    %602 = vector.load %arg2[%c33, %c0_168] : memref<40x256xf32, #tpu.memory_space<vmem>>, vector<1x32xf32>
    %cst_169 = arith.constant dense<0.000000e+00> : vector<16xf32>
    %603 = vector.multi_reduction <add>, %600, %cst_169 [1] : vector<16x32xf32> to vector<16xf32>
    %604 = vector.shape_cast %603 : vector<16xf32> to vector<16x1xf32>
    %cst_170 = arith.constant 3.200000e+01 : f32
    %605 = vector.broadcast %cst_170 : f32 to vector<16x1xf32>
    %606 = arith.divf %604, %605 : vector<16x1xf32>
    %607 = vector.broadcast %606 : vector<16x1xf32> to vector<16x32xf32>
    %608 = arith.subf %600, %607 : vector<16x32xf32>
    %609 = vector.broadcast %606 : vector<16x1xf32> to vector<16x32xf32>
    %610 = arith.subf %600, %609 : vector<16x32xf32>
    %611 = arith.mulf %608, %610 : vector<16x32xf32>
    %cst_171 = arith.constant dense<0.000000e+00> : vector<16xf32>
    %612 = vector.multi_reduction <add>, %611, %cst_171 [1] : vector<16x32xf32> to vector<16xf32>
    %613 = vector.shape_cast %612 : vector<16xf32> to vector<16x1xf32>
    %cst_172 = arith.constant 3.200000e+01 : f32
    %614 = vector.broadcast %cst_172 : f32 to vector<16x1xf32>
    %615 = arith.divf %613, %614 : vector<16x1xf32>
    %616 = vector.broadcast %606 : vector<16x1xf32> to vector<16x32xf32>
    %617 = arith.subf %600, %616 : vector<16x32xf32>
    %cst_173 = arith.constant 9.99999974E-6 : f32
    %618 = vector.broadcast %cst_173 : f32 to vector<16x1xf32>
    %619 = arith.addf %615, %618 : vector<16x1xf32>
    %620 = math.rsqrt %619 : vector<16x1xf32>
    %621 = vector.broadcast %620 : vector<16x1xf32> to vector<16x32xf32>
    %622 = arith.mulf %617, %621 : vector<16x32xf32>
    %623 = vector.broadcast %601 : vector<1x32xf32> to vector<16x32xf32>
    %624 = arith.mulf %622, %623 : vector<16x32xf32>
    %625 = vector.broadcast %602 : vector<1x32xf32> to vector<16x32xf32>
    %626 = arith.addf %624, %625 : vector<16x32xf32>
    %627 = arith.truncf %626 : vector<16x32xf32> to vector<16x32xbf16>
    %c576 = arith.constant 576 : index
    %c0_174 = arith.constant 0 : index
    %628 = vector.load %arg1[%c576, %c0_174] : memref<608x256xbf16, #tpu.memory_space<vmem>>, vector<32x32xbf16>
    %cst_175 = arith.constant dense<0.000000e+00> : vector<16x32xf32>
    %629 = tpu.matmul %627, %628, %cst_175 {dimension_numbers = #tpu.dot_dimension_numbers<[1], [0], [0], [1], [0, 0, 1, 1], [], []>} : vector<16x32xbf16>, vector<32x32xbf16>, vector<16x32xf32> -> vector<16x32xf32>
    %c34 = arith.constant 34 : index
    %c0_176 = arith.constant 0 : index
    %630 = vector.load %arg2[%c34, %c0_176] : memref<40x256xf32, #tpu.memory_space<vmem>>, vector<1x32xf32>
    %631 = vector.broadcast %630 : vector<1x32xf32> to vector<16x32xf32>
    %632 = arith.addf %629, %631 : vector<16x32xf32>
    %633 = vector.shape_cast %632 : vector<16x32xf32> to vector<2x8x32xf32>
    %cst_177 = arith.constant dense<0xFF800000> : vector<8x32xf32>
    %634 = vector.multi_reduction <maximumf>, %633, %cst_177 [0] : vector<2x8x32xf32> to vector<8x32xf32>
    %635 = vector.shape_cast %634 : vector<8x32xf32> to vector<1x8x32xf32>
    %636 = vector.broadcast %635 : vector<1x8x32xf32> to vector<2x8x32xf32>
    %637 = arith.subf %633, %636 : vector<2x8x32xf32>
    %638 = math.exp %637 : vector<2x8x32xf32>
    %cst_178 = arith.constant dense<0.000000e+00> : vector<8x32xf32>
    %639 = vector.multi_reduction <add>, %638, %cst_178 [0] : vector<2x8x32xf32> to vector<8x32xf32>
    %640 = math.log %639 : vector<8x32xf32>
    %641 = arith.addf %634, %640 : vector<8x32xf32>
    %642 = vector.shape_cast %641 : vector<8x32xf32> to vector<1x8x32xf32>
    %643 = vector.broadcast %642 : vector<1x8x32xf32> to vector<2x8x32xf32>
    %644 = arith.subf %633, %643 : vector<2x8x32xf32>
    %c0_179 = arith.constant 0 : index
    %c0_180 = arith.constant 0 : index
    %c0_181 = arith.constant 0 : index
    %645 = vector.load %arg3[%c0_179, %c0_180, %c0_181] : memref<2x8x32xf32, #tpu.memory_space<vmem>>, vector<2x8x32xf32>
    tpu.vector_store %arg3[%c0_179, %c0_180, %c0_181], %644 {strides = array<i32>} : memref<2x8x32xf32, #tpu.memory_space<vmem>>, vector<2x8x32xf32>,
    return
  }
}

</mosaic_0001>

<bundles_post_ra>
// kernel: tpu_custom_call.1
= control target key start
LH: loop header
LB: loop body
LE: loop exit
PB: predicated region body
PF: predicated region fallthrough
CT: control target
= control target key end

     0   :  { %8 = vsyncpa [#allocation3], 0  ;;  %s7059_s0 = inlined_call_operand.hbm [shape: f32[2,8,32], index: 0, kind: input, shape index: {}]   ;;  %s7060_s1 = inlined_call_operand.hbm [shape: bf16[608,256], index: 1, kind: input, shape index: {}]   ;;  %s7061_s2 = inlined_call_operand.hbm [shape: f32[40,256], index: 2, kind: input, shape index: {}]   ;;  %s7062_s3 = inlined_call_operand.hbm [shape: f32[2,8,32], index: 3, kind: output, shape index: {}]  }
   0x1   :  { %9 = vsyncpa [#allocation6], 0 }
   0x2   :  { %10 = vsyncpa [#allocation4], 0  ;;  %s6170_s12 = smov [#allocation5]   ;;  %s6171_s14 = smov [#allocation2]  }
   0x3   :  { %s28_s13 = sshll.u32 %s6170_s12, 4  ;;  %s16_s15 = sshll.u32 %s6171_s14, 4  ;;  %s29_s13 = int_to_ptr.vmem [resolvable:$true] %s28_s13  ;;  %s17_s15 = int_to_ptr.vmem [resolvable:$true] %s16_s15 }
   0x4   :  { %s6092_s16 = scalar_lea.vmem %s29_s13, 9728  ;;  %p6097_p1 = scmp.lt.s32.totalorder %s29_s13, %s29_s13 }
   0x5   :  { %p6093_p0 = scmp.ne.s32.totalorder %s29_s13, %s6092_s16  ;;  %p6098_p2 = scmp.lt.s32.totalorder %s6092_s16, %s6092_s16 }
   0x7   :  { %p6099_p3 = por %p6098_p2, %p6097_p1 }
   0x9   :  { %p6100_p4 = pnand %p6099_p3, %p6093_p0 }
   0xb   :  { %6103 = shalt.err (!%p6100_p4)
}
   0xc   :  { %s6172_s17 = smov 128   ;;  %s6173_s18 = smov 8  }
   0xd   :  { %34 = dma.hbm_to_vmem [thread:$0]  %s7060_s1, 9728, %s29_s13, [#allocation6], %s6172_s17, %s6172_s17, %s6173_s18  }
   0xe   :  { %s6112_s21 = scalar_lea.vmem %s17_s15, 256  ;;  %p6117_p6 = scmp.lt.s32.totalorder %s17_s15, %s17_s15 }
   0xf   :  { %p6113_p5 = scmp.ne.s32.totalorder %s17_s15, %s6112_s21  ;;  %p6118_p7 = scmp.lt.s32.totalorder %s6112_s21, %s6112_s21 }
  0x11   :  { %p6119_p8 = por %p6118_p7, %p6117_p6 }
  0x13   :  { %p6120_p9 = pnand %p6119_p8, %p6113_p5 }
  0x15   :  { %6123 = shalt.err (!%p6120_p9)
}
  0x16   :  { %22 = dma.hbm_to_vmem [thread:$0]  %s7059_s0, 256, %s17_s15, [#allocation3], %s6172_s17, %s6172_s17, %s6173_s18  }
  0x17   :  { %s6174_s24 = smov [#allocation7]  }
  0x18   :  { %s40_s25 = sshll.u32 %s6174_s24, 4  ;;  %s41_s25 = int_to_ptr.vmem [resolvable:$true] %s40_s25 }
  0x19   :  { %s6132_s26 = scalar_lea.vmem %s41_s25, 1280  ;;  %p6137_p11 = scmp.lt.s32.totalorder %s41_s25, %s41_s25 }
  0x1a   :  { %p6133_p10 = scmp.ne.s32.totalorder %s41_s25, %s6132_s26  ;;  %p6138_p12 = scmp.lt.s32.totalorder %s6132_s26, %s6132_s26 }
  0x1c   :  { %p6139_p13 = por %p6138_p12, %p6137_p11 }
  0x1e   :  { %p6140_p0 = pnand %p6139_p13, %p6133_p10 }
  0x20   :  { %6143 = shalt.err (!%p6140_p0)
}
  0x21   :  { %s6175_s1 = smov 256   ;;  %s6176_s27 = smov 16  }
  0x22   :  { %46 = dma.hbm_to_vmem [thread:$0]  %s7061_s2, 1280, %s41_s25, [#allocation6], %s6175_s1, %s6175_s1, %s6176_s27  }
  0x23   :  { %6164 = dma.done.wait [#allocation3], 256  }
  0x24   :  { %6165 = vsyncadd [#allocation3], 4294967040 }
  0x25   :  { %6166 = dma.done.wait [#allocation6], 11008  }
  0x26   :  { %6167 = vsyncadd [#allocation6], 4294956288  ;;  %v6177_v0 = vmov 0   ;;  %v5864_v1 = vld [vmem:[#allocation5 + $0x14] ss:$8 sps:$4 sm:$0xff]   ;;  %vm96_vm0 = vcmask 261120   ;;  %v66_v8 = vlaneseq }
  0x27   :  { %132 = vmatprep.mubr.bf16.mxu0 %v6177_v0  ;;  %v5866_v2 = vld [vmem:[#allocation5 + $0x10] ss:$8 sps:$4 sm:$0xff]   ;;  %112 = vmatprep.subr.bf16.mxu0 %v5864_v1  ;;  %v5867_v3 = vld [vmem:[#allocation5 + $0x4] ss:$8 sps:$4 sm:$0xff]   ;;  %v5869_v4 = vld [vmem:[#allocation5] ss:$8 sps:$4 sm:$0xff]  }
  0x28   :  { %113 = vmatpush1.bf16.msra.mxu0 %v5866_v2  ;;  %v6226_v5 = vld [vmem:[#allocation2] sm:$0xff]  ;;  %v6228_v6 = vld [vmem:[#allocation2 + $0x8] sm:$0xff]  ;;  %v67_v9 = vshrl.u32 %v66_v8, 7  ;;  %v6178_v10 = vmov 0.0   ;;  %vm6179_vm1 = vmmov 0   ;;  %s6180_s0 = smov 88  }
  0x29   :  { %114 = vmatprep.subr.bf16.mxu0 %v5867_v3  ;;  %v59_v7 = vpack.c.bf16 %v6228_v6, %v6226_v5  ;;  %5356 = vmatprep.subr.bf16.mxu1 %v6178_v10  ;;  %v64_v12 = vld [vmem:[#allocation7] ss:$8 sm:$0x3]  ;;  %s6181_s2 = smov 96   ;;  %s6182_s30 = smov 120   ;;  %vm157_vm2 = vcmask 64512  }
  0x2a   :  { %v6235_v11 = vsub.s32 1, %v67_v9  ;;  %v6237_v13 = vsub.s32 0, %v67_v9  ;;  %5358 = vmatprep.mubr.msk.bf16.mxu1 %vm6179_vm1, %v6178_v10  ;;  %vm405_vm3 = vcmask 1043456   ;;  %s6183_s4 = smov 80   ;;  %s6184_s5 = smov 112   ;;  %vm1169_vm4 = vcmask 523264  }
  0x2b   :  { %s6185_s6 = smov 64   ;;  %s6186_s7 = smov 72  }
  0x2c   :  { %115 = vmatpush1.bf16.msra.mxu0 %v5869_v4  ;;  %v73_v14 = vrot.slane %v64_v12, %v6235_v11  ;;  %v6247_v17 = vrot.slane %v64_v12, %v6237_v13  ;;  %s6187_s8 = smov 104   ;;  %s6188_s9 = smov 32  }
  0x2d   :  { %5362 = vmatprep.subr.bf16.mxu0 %v6178_v10  ;;  %s6189_s10 = smov [#allocation8]  }
  0x2e   :  { %s5009_s11 = sshll.u32 %s6189_s10, 4  ;;  %s5010_s11 = int_to_ptr.vmem [resolvable:$true] %s5009_s11 }
  0x2f   :  { %5026 = vmatmul.mubr.msk.bf16.vlgmr.msra.gmra.mxu0 %vm96_vm0, %v59_v7  ;;  %s6144_s12 = scalar_lea.vmem %s5010_s11, 256  ;;  %p6149_p2 = scmp.lt.s32.totalorder %s5010_s11, %s5010_s11 }
  0x30   :  { %5364 = vmatprep.mubr.msk.bf16.mxu0 %vm6179_vm1, %v6178_v10  ;;  %p6145_p1 = scmp.ne.s32.totalorder %s5010_s11, %s6144_s12  ;;  %p6150_p3 = scmp.lt.s32.totalorder %s6144_s12, %s6144_s12 }
  0x32   :  { %p6151_p4 = por %p6150_p3, %p6149_p2 }
  0x34   :  { %p6152_p5 = pnand %p6151_p4, %p6145_p1 }
  0xef   :  { %v6240_v15 = vpop.f32.mrf.mxu0 }
  0xf0   :  { %v135_v55 = vadd.f32 %v6240_v15, %v6247_v17 }
  0xf1   :  { %v136_v16 = vpop.f32.mrf.mxu0 }
  0xf2   :  { %v137_v18 = vadd.f32 %v136_v16, %v73_v14  ;;  %v6296_v56 = vpack.c.bf16 %v135_v55, %v135_v55 }
  0xf3   :  { %v138_v19 = vpop.f32.mrf.mxu0 }
  0xf4   :  { %v6249_v20 = vpack.c.bf16 %v137_v18, %v137_v18  ;;  %v6252_v21 = vadd.f32 %v138_v19, %v6247_v17 }
  0xf5   :  { %v140_v22 = vpop.f32.mrf.mxu0 }
  0xf6   :  { %v141_v23 = vadd.f32 %v140_v22, %v73_v14  ;;  %278 = vrot.lane.b32.xlu1 %v6249_v20, %s6180_s0  ;;  %155 = vrot.lane.b32.xlu0 %v6249_v20, %s6181_s2 }
  0xf8   :  { %v6258_v24 = vpack.c.bf16 %v141_v23, %v141_v23  ;;  %v6312_v23 = vpack.c.bf16 %v6252_v21, %v6252_v21 }
  0xfa   :  { %328 = vrot.lane.b32.xlu1 %v6258_v24, %s6180_s0  ;;  %204 = vrot.lane.b32.xlu0 %v6258_v24, %s6181_s2 }
  0xfe   :  { %326 = vrot.lane.b32.xlu1 %v6258_v24, %s6182_s30  ;;  %276 = vrot.lane.b32.xlu0 %v6249_v20, %s6182_s30 }
 0x168   :  { %v156_v25 = vpop.permute.xlu0 %155  ;;  %v279_v27 = vpop.permute.xlu1 %278 }
 0x169   :  { %v162_v26 = vsel %vm157_vm2, %v156_v25, 0  ;;  %v284_v30 = vsel %vm157_vm2, %v279_v27, 0 }
 0x16a   :  { %5357 = vmatpush3.bf16.xpose.msra.mxu1 %v162_v26 }
 0x16b   :  { %5368 = vmatprep.subr.bf16.mxu1 %v6178_v10 }
 0x16c   :  { %v205_v28 = vpop.permute.xlu0 %204  ;;  %v329_v31 = vpop.permute.xlu1 %328 }
 0x16d   :  { %v210_v29 = vsel %vm157_vm2, %v205_v28, 0  ;;  %v334_v32 = vsel %vm157_vm2, %v329_v31, 0 }
 0x16e   :  { %5363 = vmatpush3.bf16.xpose.msra.mxu0 %v210_v29 }
 0x16f   :  { %5374 = vmatprep.subr.bf16.mxu0 %v6178_v10 }
 0x170   :  { %v277_v33 = vpop.permute.xlu0 %276  ;;  %v327_v34 = vpop.permute.xlu1 %326 }
 0x171   :  { %5359 = vmatmul.mubr.msk.bf16.vlgmr.msra.gmra.mxu1 %vm157_vm2, %v6249_v20 }
 0x172   :  { %5369 = vmatpush3.bf16.xpose.msra.mxu1 %v284_v30  ;;  %5370 = vmatprep.mubr.msk.bf16.mxu1 %vm6179_vm1, %v6178_v10 }
 0x173   :  { %5380 = vmatprep.subr.bf16.mxu1 %v6178_v10 }
 0x175   :  { %5365 = vmatmul.mubr.msk.bf16.vlgmr.msra.gmra.mxu0 %vm157_vm2, %v6258_v24 }
 0x176   :  { %5375 = vmatpush3.bf16.xpose.msra.mxu0 %v334_v32  ;;  %5376 = vmatprep.mubr.msk.bf16.mxu0 %vm6179_vm1, %v6178_v10 }
 0x177   :  { %5386 = vmatprep.subr.bf16.mxu0 %v6178_v10 }
 0x179   :  { %5371 = vmatmul.mubr.msk.bf16.vlgmr.msra.gmra.mxu1 %vm157_vm2, %v277_v33 }
 0x17a   :  { %5382 = vmatprep.mubr.msk.bf16.mxu1 %vm6179_vm1, %v6178_v10 }
 0x17d   :  { %5377 = vmatmul.mubr.msk.bf16.vlgmr.msra.gmra.mxu0 %vm157_vm2, %v327_v34 }
 0x17e   :  { %5388 = vmatprep.mubr.msk.bf16.mxu0 %vm6179_vm1, %v6178_v10 }
 0x231   :  { %v198_v35 = vpop.f32.mrf.mxu1 }
 0x232   :  { %v252_v49 = vsel %vm157_vm2, %v198_v35, -inf }
 0x233   :  { %v5360_v36 = vpop.f32.mrf.mxu1 }
 0x234   :  { %v501_v36 = vsel %vm405_vm3, %v6296_v56, 0 }
 0x235   :  { %v201_v37 = vpop.f32.mrf.mxu1  ;;  %v246_v38 = vpop.f32.mrf.mxu0 }
 0x236   :  { %v255_v53 = vsel %vm157_vm2, %v246_v38, -inf }
 0x237   :  { %v5361_v39 = vpop.f32.mrf.mxu1  ;;  %v5366_v40 = vpop.f32.mrf.mxu0 }
 0x239   :  { %v249_v41 = vpop.f32.mrf.mxu0  ;;  %v320_v42 = vpop.f32.mrf.mxu1 }
 0x23a   :  { %v376_v43 = vsel %vm157_vm2, %v320_v42, -inf  ;;  %v547_v41 = vsel %vm405_vm3, %v6312_v23, 0 }
 0x23b   :  { %v5367_v44 = vpop.f32.mrf.mxu0  ;;  %377 = vmax.xlane.f32.xlu0 %v376_v43  ;;  %v5372_v45 = vpop.f32.mrf.mxu1 }
 0x23d   :  { %v323_v46 = vpop.f32.mrf.mxu1  ;;  %v370_v47 = vpop.f32.mrf.mxu0 }
 0x23e   :  { %v379_v48 = vsel %vm157_vm2, %v370_v47, -inf }
 0x23f   :  { %380 = vmax.xlane.f32.xlu1 %v379_v48  ;;  %v5378_v50 = vpop.f32.mrf.mxu0  ;;  %253 = vmax.xlane.f32.xlu0 %v252_v49  ;;  %v5373_v51 = vpop.f32.mrf.mxu1 }
 0x241   :  { %v373_v52 = vpop.f32.mrf.mxu0 }
 0x243   :  { %v5379_v54 = vpop.f32.mrf.mxu0  ;;  %256 = vmax.xlane.f32.xlu0 %v255_v53 }
 0x250   :  { %400 = vrot.lane.b32.xlu1 %v6296_v56, %s6181_s2 }
 0x2c4   :  { %v378_v57 = vpop.xlane.xlu0 %377 }
 0x2c5   :  { %v382_v58 = vsub.f32 %v320_v42, %v378_v57 }
 0x2c7   :  { %v384_v1 = vmul.f32 1.442695, %v382_v58 }
 0x2c8   :  { %v381_v59 = vpop.xlane.xlu1 %380  ;;  %v254_v60 = vpop.xlane.xlu0 %253 }
 0x2c9   :  { %v258_v61 = vsub.f32 %v198_v35, %v254_v60  ;;  %v383_v62 = vsub.f32 %v370_v47, %v381_v59 }
 0x2cb   :  { %v260_v63 = vmul.f32 1.442695, %v258_v61  ;;  %v386_v8 = vmul.f32 1.442695, %v383_v62 }
 0x2cc   :  { %v257_v2 = vpop.xlane.xlu0 %256  ;;  %v401_v3 = vpop.permute.xlu1 %400 }
 0x2cd   :  { %v259_v4 = vsub.f32 %v246_v38, %v257_v2  ;;  %v407_v7 = vsel %vm405_vm3, %v401_v3, 0  ;;  %5918 = vpow2.f32 %v260_v63 }
 0x2ce   :  { %5381 = vmatpush3.bf16.msra.mxu1 %v407_v7  ;;  %5920 = vpow2.f32 %v384_v1 }
 0x2cf   :  { %v262_v9 = vmul.f32 1.442695, %v259_v4  ;;  %5392 = vmatprep.subr.bf16.mxu1 %v6178_v10 }
 0x2d1   :  { %5922 = vpow2.f32 %v262_v9 }
 0x2d2   :  { %5924 = vpow2.f32 %v386_v8 }
 0x2da   :  { %v5919_v12 = vpop.eup %5918 }
 0x2db   :  { %v264_v14 = vsel %vm157_vm2, %v5919_v12, 0.0  ;;  %v5921_v15 = vpop.eup %5920 }
 0x2dc   :  { %265 = vadd.xlane.f32.xlu1 %v264_v14  ;;  %v388_v19 = vsel %vm157_vm2, %v5921_v15, 0.0 }
 0x2de   :  { %v5923_v16 = vpop.eup %5922 }
 0x2df   :  { %v267_v17 = vsel %vm157_vm2, %v5923_v16, 0.0  ;;  %v5925_v18 = vpop.eup %5924 }
 0x2e0   :  { %268 = vadd.xlane.f32.xlu0 %v267_v17  ;;  %389 = vadd.xlane.f32.xlu1 %v388_v19  ;;  %v391_v22 = vsel %vm157_vm2, %v5925_v18, 0.0 }
 0x2e4   :  { %392 = vadd.xlane.f32.xlu0 %v391_v22 }
 0x2f1   :  { %591 = vrot.lane.b32.xlu1 %v6249_v20, %s6183_s4 }
 0x2f5   :  { %641 = vrot.lane.b32.xlu1 %v6258_v24, %s6183_s4 }
 0x2f9   :  { %639 = vrot.lane.b32.xlu1 %v6258_v24, %s6184_s5 }
 0x2fa   :  { %449 = vrot.lane.b32.xlu0 %v6312_v23, %s6181_s2 }
 0x2fe   :  { %589 = vrot.lane.b32.xlu0 %v6249_v20, %s6184_s5 }
 0x365   :  { %v266_v25 = vpop.xlane.xlu1 %265 }
 0x369   :  { %v269_v26 = vpop.xlane.xlu0 %268  ;;  %v390_v27 = vpop.xlane.xlu1 %389 }
 0x36a   :  { %5926 = vrcp.f32 %v390_v27 }
 0x36d   :  { %v393_v28 = vpop.xlane.xlu0 %392  ;;  %v592_v39 = vpop.permute.xlu1 %591 }
 0x36e   :  { %5928 = vrcp.f32 %v393_v28  ;;  %v597_v44 = vsel %vm157_vm2, %v592_v39, 0 }
 0x36f   :  { %5930 = vrcp.f32 %v266_v25 }
 0x370   :  { %5932 = vrcp.f32 %v269_v26 }
 0x371   :  { %v450_v29 = vpop.permute.xlu0 %449  ;;  %v642_v45 = vpop.permute.xlu1 %641 }
 0x372   :  { %v455_v21 = vsel %vm405_vm3, %v450_v29, 0  ;;  %v647_v47 = vsel %vm157_vm2, %v642_v45, 0 }
 0x373   :  { %5387 = vmatpush3.bf16.msra.mxu0 %v455_v21 }
 0x374   :  { %5398 = vmatprep.subr.bf16.mxu0 %v6178_v10 }
 0x375   :  { %v590_v48 = vpop.permute.xlu0 %589  ;;  %v640_v49 = vpop.permute.xlu1 %639 }
 0x377   :  { %v5927_v30 = vpop.eup %5926 }
 0x378   :  { %v396_v31 = vmul.f32 %v5927_v30, %v5921_v15 }
 0x37a   :  { %v398_v33 = vpack.c.bf16 %v396_v31, %v396_v31 }
 0x37b   :  { %v5929_v32 = vpop.eup %5928 }
 0x37c   :  { %v5931_v34 = vpop.eup %5930  ;;  %v397_v35 = vmul.f32 %v5929_v32, %v5925_v18  ;;  %5383 = vmatmul.mubr.msk.bf16.vlgmr.msra.gmra.mxu1 %vm157_vm2, %v398_v33 }
 0x37d   :  { %5393 = vmatpush3.bf16.msra.mxu1 %v501_v36  ;;  %5394 = vmatprep.mubr.msk.bf16.mxu1 %vm6179_vm1, %v6178_v10  ;;  %v5933_v38 = vpop.eup %5932  ;;  %v272_v40 = vmul.f32 %v5931_v34, %v5919_v12 }
 0x37e   :  { %v399_v37 = vpack.c.bf16 %v397_v35, %v397_v35  ;;  %5404 = vmatprep.subr.bf16.mxu1 %v6178_v10  ;;  %v273_v42 = vmul.f32 %v5933_v38, %v5923_v16 }
 0x37f   :  { %v274_v43 = vpack.c.bf16 %v272_v40, %v272_v40 }
 0x380   :  { %5389 = vmatmul.mubr.msk.bf16.vlgmr.msra.gmra.mxu0 %vm157_vm2, %v399_v37  ;;  %v275_v46 = vpack.c.bf16 %v273_v42, %v273_v42 }
 0x381   :  { %5399 = vmatpush3.bf16.msra.mxu0 %v547_v41  ;;  %5400 = vmatprep.mubr.msk.bf16.mxu0 %vm6179_vm1, %v6178_v10 }
 0x382   :  { %5410 = vmatprep.subr.bf16.mxu0 %v6178_v10 }
 0x384   :  { %5395 = vmatmul.mubr.msk.bf16.vlgmr.msra.gmra.mxu1 %vm157_vm2, %v274_v43 }
 0x385   :  { %5405 = vmatpush3.bf16.xpose.msra.mxu1 %v597_v44  ;;  %5406 = vmatprep.mubr.msk.bf16.mxu1 %vm6179_vm1, %v6178_v10 }
 0x386   :  { %5416 = vmatprep.subr.bf16.mxu1 %v6178_v10 }
 0x388   :  { %5401 = vmatmul.mubr.msk.bf16.vlgmr.msra.gmra.mxu0 %vm157_vm2, %v275_v46 }
 0x389   :  { %5411 = vmatpush3.bf16.xpose.msra.mxu0 %v647_v47  ;;  %5412 = vmatprep.mubr.msk.bf16.mxu0 %vm6179_vm1, %v6178_v10 }
 0x38a   :  { %5422 = vmatprep.subr.bf16.mxu0 %v6178_v10 }
 0x38c   :  { %5407 = vmatmul.mubr.msk.bf16.vlgmr.msra.gmra.mxu1 %vm157_vm2, %v590_v48 }
 0x38d   :  { %5418 = vmatprep.mubr.msk.bf16.mxu1 %vm6179_vm1, %v6178_v10 }
 0x390   :  { %5413 = vmatmul.mubr.msk.bf16.vlgmr.msra.gmra.mxu0 %vm157_vm2, %v640_v49 }
 0x391   :  { %5424 = vmatprep.mubr.msk.bf16.mxu0 %vm6179_vm1, %v6178_v10 }
 0x43c   :  { %v443_v50 = vpop.f32.mrf.mxu1 }
 0x43e   :  { %v5384_v51 = vpop.f32.mrf.mxu1 }
 0x440   :  { %v491_v52 = vpop.f32.mrf.mxu0  ;;  %v446_v53 = vpop.f32.mrf.mxu1 }
 0x442   :  { %v5390_v54 = vpop.f32.mrf.mxu0  ;;  %v5385_v55 = vpop.f32.mrf.mxu1 }
 0x444   :  { %v494_v57 = vpop.f32.mrf.mxu0  ;;  %v537_v58 = vpop.f32.mrf.mxu1 }
 0x445   :  { %v6350_v59 = vadd.f32 %v537_v58, %v443_v50 }
 0x446   :  { %v5391_v60 = vpop.f32.mrf.mxu0  ;;  %v5396_v61 = vpop.f32.mrf.mxu1 }
 0x448   :  { %v583_v62 = vpop.f32.mrf.mxu0  ;;  %v540_v63 = vpop.f32.mrf.mxu1 }
 0x449   :  { %v6352_v1 = vadd.f32 %v583_v62, %v491_v52 }
 0x44a   :  { %v5402_v2 = vpop.f32.mrf.mxu0  ;;  %v5397_v3 = vpop.f32.mrf.mxu1 }
 0x44c   :  { %v586_v4 = vpop.f32.mrf.mxu0  ;;  %v633_v7 = vpop.f32.mrf.mxu1 }
 0x44d   :  { %v689_v9 = vsel %vm157_vm2, %v633_v7, -inf }
 0x44e   :  { %v5403_v8 = vpop.f32.mrf.mxu0  ;;  %690 = vmax.xlane.f32.xlu0 %v689_v9  ;;  %v5408_v12 = vpop.f32.mrf.mxu1 }
 0x450   :  { %v683_v14 = vpop.f32.mrf.mxu0  ;;  %v636_v15 = vpop.f32.mrf.mxu1 }
 0x451   :  { %v692_v16 = vsel %vm157_vm2, %v683_v14, -inf }
 0x452   :  { %693 = vmax.xlane.f32.xlu1 %v692_v16  ;;  %v5414_v17 = vpop.f32.mrf.mxu0  ;;  %v5409_v18 = vpop.f32.mrf.mxu1 }
 0x454   :  { %v686_v19 = vpop.f32.mrf.mxu0 }
 0x456   :  { %v5415_v22 = vpop.f32.mrf.mxu0 }
 0x463   :  { %713 = vrot.lane.b32.xlu1 %v6296_v56, %s6185_s6 }
 0x467   :  { %813 = vrot.lane.b32.xlu1 %v6249_v20, %s6186_s7 }
 0x46b   :  { %863 = vrot.lane.b32.xlu1 %v6258_v24, %s6186_s7 }
 0x46f   :  { %861 = vrot.lane.b32.xlu1 %v6258_v24, %s6187_s8 }
 0x4d7   :  { %v691_v25 = vpop.xlane.xlu0 %690 }
 0x4d8   :  { %v695_v26 = vsub.f32 %v633_v7, %v691_v25 }
 0x4da   :  { %v697_v27 = vmul.f32 1.442695, %v695_v26 }
 0x4db   :  { %v694_v28 = vpop.xlane.xlu1 %693 }
 0x4dc   :  { %v696_v29 = vsub.f32 %v683_v14, %v694_v28  ;;  %5934 = vpow2.f32 %v697_v27 }
 0x4de   :  { %v699_v21 = vmul.f32 1.442695, %v696_v29 }
 0x4df   :  { %v714_v30 = vpop.permute.xlu1 %713 }
 0x4e0   :  { %5936 = vpow2.f32 %v699_v21  ;;  %v719_v31 = vsel %vm405_vm3, %v714_v30, 0 }
 0x4e1   :  { %5417 = vmatpush3.bf16.msra.mxu1 %v719_v31 }
 0x4e2   :  { %5428 = vmatprep.subr.bf16.mxu1 %v6178_v10 }
 0x4e3   :  { %v814_v40 = vpop.permute.xlu1 %813 }
 0x4e4   :  { %v819_v44 = vsel %vm157_vm2, %v814_v40, 0 }
 0x4e7   :  { %v864_v45 = vpop.permute.xlu1 %863 }
 0x4e8   :  { %v869_v47 = vsel %vm157_vm2, %v864_v45, 0 }
 0x4e9   :  { %v5935_v32 = vpop.eup %5934 }
 0x4ea   :  { %v701_v33 = vsel %vm157_vm2, %v5935_v32, 0.0 }
 0x4eb   :  { %702 = vadd.xlane.f32.xlu0 %v701_v33  ;;  %v862_v49 = vpop.permute.xlu1 %861 }
 0x4ed   :  { %v5937_v34 = vpop.eup %5936 }
 0x4ee   :  { %v704_v24 = vsel %vm157_vm2, %v5937_v34, 0.0 }
 0x4ef   :  { %705 = vadd.xlane.f32.xlu0 %v704_v24 }
 0x505   :  { %761 = vrot.lane.b32.xlu0 %v6312_v23, %s6185_s6 }
 0x509   :  { %811 = vrot.lane.b32.xlu0 %v6249_v20, %s6187_s8 }
 0x574   :  { %v703_v35 = vpop.xlane.xlu0 %702 }
 0x575   :  { %5938 = vrcp.f32 %v703_v35 }
 0x578   :  { %v706_v36 = vpop.xlane.xlu0 %705 }
 0x579   :  { %5940 = vrcp.f32 %v706_v36  ;;  %v1033_v36 = vld [vmem:[#allocation7 + $0x1] ss:$0 sm:$0xff] }
 0x57c   :  { %v762_v37 = vpop.permute.xlu0 %761 }
 0x57d   :  { %v767_v38 = vsel %vm405_vm3, %v762_v37, 0 }
 0x57e   :  { %5423 = vmatpush3.bf16.msra.mxu0 %v767_v38 }
 0x57f   :  { %5434 = vmatprep.subr.bf16.mxu0 %v6178_v10 }
 0x580   :  { %v812_v48 = vpop.permute.xlu0 %811 }
 0x582   :  { %v5939_v39 = vpop.eup %5938 }
 0x583   :  { %v709_v41 = vmul.f32 %v5939_v39, %v5935_v32 }
 0x585   :  { %v711_v42 = vpack.c.bf16 %v709_v41, %v709_v41 }
 0x586   :  { %v5941_v43 = vpop.eup %5940 }
 0x587   :  { %5419 = vmatmul.mubr.msk.bf16.vlgmr.msra.gmra.mxu1 %vm157_vm2, %v711_v42  ;;  %v710_v20 = vmul.f32 %v5941_v43, %v5937_v34 }
 0x588   :  { %5429 = vmatpush3.bf16.xpose.msra.mxu1 %v819_v44  ;;  %5430 = vmatprep.mubr.msk.bf16.mxu1 %vm6179_vm1, %v6178_v10 }
 0x589   :  { %v712_v46 = vpack.c.bf16 %v710_v20, %v710_v20  ;;  %5440 = vmatprep.subr.bf16.mxu1 %v6178_v10 }
 0x58b   :  { %5425 = vmatmul.mubr.msk.bf16.vlgmr.msra.gmra.mxu0 %vm157_vm2, %v712_v46 }
 0x58c   :  { %5435 = vmatpush3.bf16.xpose.msra.mxu0 %v869_v47  ;;  %5436 = vmatprep.mubr.msk.bf16.mxu0 %vm6179_vm1, %v6178_v10 }
 0x58d   :  { %5446 = vmatprep.subr.bf16.mxu0 %v6178_v10 }
 0x58f   :  { %5431 = vmatmul.mubr.msk.bf16.vlgmr.msra.gmra.mxu1 %vm157_vm2, %v812_v48 }
 0x590   :  { %5442 = vmatprep.mubr.msk.bf16.mxu1 %vm6179_vm1, %v6178_v10 }
 0x593   :  { %5437 = vmatmul.mubr.msk.bf16.vlgmr.msra.gmra.mxu0 %vm157_vm2, %v862_v49 }
 0x594   :  { %5448 = vmatprep.mubr.msk.bf16.mxu0 %vm6179_vm1, %v6178_v10 }
 0x647   :  { %v755_v50 = vpop.f32.mrf.mxu1 }
 0x648   :  { %v809_v51 = vadd.f32 %v755_v50, %v6350_v59 }
 0x649   :  { %v5420_v52 = vpop.f32.mrf.mxu1 }
 0x64b   :  { %v758_v53 = vpop.f32.mrf.mxu1  ;;  %v803_v54 = vpop.f32.mrf.mxu0 }
 0x64c   :  { %v6392_v55 = vadd.f32 %v803_v54, %v6352_v1 }
 0x64d   :  { %v5421_v57 = vpop.f32.mrf.mxu1  ;;  %v5426_v58 = vpop.f32.mrf.mxu0 }
 0x64f   :  { %v806_v60 = vpop.f32.mrf.mxu0  ;;  %v855_v61 = vpop.f32.mrf.mxu1 }
 0x650   :  { %v911_v62 = vsel %vm157_vm2, %v855_v61, -inf }
 0x651   :  { %v5427_v63 = vpop.f32.mrf.mxu0  ;;  %912 = vmax.xlane.f32.xlu0 %v911_v62  ;;  %v5432_v2 = vpop.f32.mrf.mxu1  ;;  %v5870_v62 = vld [vmem:[#allocation5 + $0x30] ss:$8 sps:$4 sm:$0xff]  }
 0x652   :  { %v5872_v63 = vld [vmem:[#allocation5 + $0x70] ss:$8 sps:$4 sm:$0xff]  }
 0x653   :  { %v858_v3 = vpop.f32.mrf.mxu1  ;;  %v905_v4 = vpop.f32.mrf.mxu0 }
 0x654   :  { %v914_v7 = vsel %vm157_vm2, %v905_v4, -inf }
 0x655   :  { %915 = vmax.xlane.f32.xlu1 %v914_v7  ;;  %v5433_v59 = vpop.f32.mrf.mxu1  ;;  %v5438_v8 = vpop.f32.mrf.mxu0 }
 0x657   :  { %v908_v9 = vpop.f32.mrf.mxu0 }
 0x659   :  { %v5439_v12 = vpop.f32.mrf.mxu0 }
 0x666   :  { %935 = vrot.lane.b32.xlu1 %v6296_v56, %s6188_s9 }
 0x6da   :  { %v913_v1 = vpop.xlane.xlu0 %912 }
 0x6db   :  { %v917_v14 = vsub.f32 %v855_v61, %v913_v1  ;;  %v1038_v1 = vld [vmem:[#allocation7 + $0x2] ss:$0 sm:$0xff] }
 0x6dd   :  { %v919_v15 = vmul.f32 1.442695, %v917_v14 }
 0x6de   :  { %v916_v16 = vpop.xlane.xlu1 %915 }
 0x6df   :  { %5942 = vpow2.f32 %v919_v15  ;;  %v918_v17 = vsub.f32 %v905_v4, %v916_v16 }
 0x6e1   :  { %v921_v18 = vmul.f32 1.442695, %v918_v17  ;;  %v1039_v17 = vld [vmem:[#allocation7 + $0x3] ss:$0 sm:$0xff] }
 0x6e2   :  { %v936_v19 = vpop.permute.xlu1 %935 }
 0x6e3   :  { %5944 = vpow2.f32 %v921_v18  ;;  %v941_v22 = vsel %vm405_vm3, %v936_v19, 0 }
 0x6e4   :  { %5441 = vmatpush3.bf16.msra.mxu1 %v941_v22 }
 0x6e5   :  { %5452 = vmatprep.subr.bf16.mxu1 %v6178_v10 }
 0x6ec   :  { %v5943_v25 = vpop.eup %5942 }
 0x6ed   :  { %v923_v26 = vsel %vm157_vm2, %v5943_v25, 0.0 }
 0x6ee   :  { %924 = vadd.xlane.f32.xlu0 %v923_v26  ;;  %v5873_v26 = vld [vmem:[#allocation5 + $0x60] ss:$8 sps:$4 sm:$0xff]  }
 0x6f0   :  { %v5945_v27 = vpop.eup %5944 }
 0x6f1   :  { %v926_v56 = vsel %vm157_vm2, %v5945_v27, 0.0 }
 0x6f2   :  { %927 = vadd.xlane.f32.xlu0 %v926_v56  ;;  %v5875_v56 = vld [vmem:[#allocation5 + $0x40] ss:$8 sps:$4 sm:$0xff]  }
 0x708   :  { %983 = vrot.lane.b32.xlu0 %v6312_v23, %s6188_s9 }
 0x777   :  { %v925_v28 = vpop.xlane.xlu0 %924 }
 0x778   :  { %5946 = vrcp.f32 %v925_v28  ;;  %v1076_v28 = vld [vmem:[#allocation7 + $0x4] ss:$0 sm:$0xff] }
 0x77b   :  { %v928_v29 = vpop.xlane.xlu0 %927 }
 0x77c   :  { %5948 = vrcp.f32 %v928_v29 }
 0x77f   :  { %v984_v21 = vpop.permute.xlu0 %983 }
 0x780   :  { %v989_v30 = vsel %vm405_vm3, %v984_v21, 0 }
 0x781   :  { %5447 = vmatpush3.bf16.msra.mxu0 %v989_v30 }
 0x782   :  { %5460 = vmatprep.subr.bf16.mxu0 %v6178_v10 }
 0x785   :  { %v5947_v31 = vpop.eup %5946 }
 0x786   :  { %v931_v32 = vmul.f32 %v5947_v31, %v5943_v25 }
 0x788   :  { %v933_v33 = vpack.c.bf16 %v931_v32, %v931_v32 }
 0x789   :  { %v5949_v34 = vpop.eup %5948 }
 0x78a   :  { %5443 = vmatmul.mubr.msk.bf16.vlgmr.msra.gmra.mxu1 %vm157_vm2, %v933_v33  ;;  %v932_v24 = vmul.f32 %v5949_v34, %v5945_v27  ;;  %v5874_v27 = vld [vmem:[#allocation5 + $0x50] ss:$8 sps:$4 sm:$0xff]  }
 0x78b   :  { %5456 = vmatprep.mubr.msk.bf16.mxu1 %vm6179_vm1, %v6178_v10  ;;  %5453 = vmatpush3.bf16.msra.mxu1 %v5870_v62 }
 0x78c   :  { %v934_v23 = vpack.c.bf16 %v932_v24, %v932_v24  ;;  %5454 = vmatprep.subr.bf16.mxu1 %v6178_v10 }
 0x78e   :  { %5449 = vmatmul.mubr.msk.bf16.vlgmr.msra.gmra.mxu0 %vm157_vm2, %v934_v23 }
 0x78f   :  { %5468 = vmatprep.mubr.msk.bf16.mxu0 %vm6179_vm1, %v6178_v10  ;;  %5461 = vmatpush3.bf16.msra.mxu0 %v5872_v63 }
 0x790   :  { %5462 = vmatprep.subr.bf16.mxu0 %v6178_v10 }
 0x793   :  { %5463 = vmatpush3.bf16.msra.mxu0 %v5873_v26 }
 0x794   :  { %5464 = vmatprep.subr.bf16.mxu0 %v6178_v10 }
 0x797   :  { %5465 = vmatpush3.bf16.msra.mxu0 %v5874_v27 }
 0x798   :  { %5466 = vmatprep.subr.bf16.mxu0 %v6178_v10 }
 0x79b   :  { %5467 = vmatpush3.bf16.msra.mxu0 %v5875_v56 }
 0x79c   :  { %5478 = vmatprep.subr.bf16.mxu0 %v6178_v10 }
 0x84a   :  { %v977_v35 = vpop.f32.mrf.mxu1 }
 0x84b   :  { %v1031_v37 = vadd.f32 %v977_v35, %v809_v51  ;;  %v1144_v35 = vld [vmem:[#allocation7 + $0x5] ss:$0 sm:$0xff] }
 0x84c   :  { %v5444_v38 = vpop.f32.mrf.mxu1 }
 0x84d   :  { %v1034_v39 = vadd.f32 %v1033_v36, %v1031_v37 }
 0x84e   :  { %v980_v40 = vpop.f32.mrf.mxu1  ;;  %v1025_v41 = vpop.f32.mrf.mxu0 }
 0x84f   :  { %v1032_v42 = vadd.f32 %v1025_v41, %v6392_v55  ;;  %v1036_v43 = vadd.f32 %v1034_v39, %v6226_v5 }
 0x850   :  { %v5445_v44 = vpop.f32.mrf.mxu1  ;;  %v5450_v20 = vpop.f32.mrf.mxu0 }
 0x851   :  { %v1035_v45 = vadd.f32 %v1033_v36, %v1032_v42  ;;  %v1040_v46 = vsel %vm96_vm0, %v1036_v43, 0.0 }
 0x852   :  { %v1028_v47 = vpop.f32.mrf.mxu0  ;;  %1041 = vadd.xlane.f32.xlu1 %v1040_v46 }
 0x853   :  { %v1037_v48 = vadd.f32 %v1035_v45, %v6228_v6  ;;  %v5871_v6 = vld [vmem:[#allocation5 + $0x20] ss:$8 sps:$4 sm:$0xff]  }
 0x854   :  { %v5451_v49 = vpop.f32.mrf.mxu0  ;;  %5455 = vmatpush3.bf16.msra.mxu1 %v5871_v6 }
 0x855   :  { %v1043_v50 = vsel %vm96_vm0, %v1037_v48, 0.0 }
 0x856   :  { %1044 = vadd.xlane.f32.xlu0 %v1043_v50 }
 0x8db   :  { %v1042_v51 = vpop.xlane.xlu1 %1041 }
 0x8dc   :  { %v1047_v52 = vmul.f32 0.03125, %v1042_v51 }
 0x8de   :  { %v1049_v53 = vsub.f32 %v1036_v43, %v1047_v52 }
 0x8df   :  { %v1045_v54 = vpop.xlane.xlu0 %1044 }
 0x8e0   :  { %v1048_v55 = vmul.f32 0.03125, %v1045_v54  ;;  %v1051_v57 = vmul.f32 %v1049_v53, %v1049_v53 }
 0x8e2   :  { %v1050_v5 = vsub.f32 %v1037_v48, %v1048_v55  ;;  %v1053_v58 = vsel %vm96_vm0, %v1051_v57, 0.0  ;;  %v5878_v55 = vld [vmem:[#allocation5 + $0x94] ss:$8 sps:$4 sm:$0xff]   ;;  %v5876_v57 = vld [vmem:[#allocation5 + $0x90] ss:$8 sps:$4 sm:$0xff]  }
 0x8e3   :  { %1054 = vadd.xlane.f32.xlu1 %v1053_v58  ;;  %1301 = vmatprep.subr.bf16.mxu1 %v5878_v55  ;;  %v5879_v58 = vld [vmem:[#allocation5 + $0x80] ss:$8 sps:$4 sm:$0xff]  }
 0x8e4   :  { %v1052_v60 = vmul.f32 %v1050_v5, %v1050_v5 }
 0x8e6   :  { %v1056_v61 = vsel %vm96_vm0, %v1052_v60, 0.0 }
 0x8e7   :  { %1057 = vadd.xlane.f32.xlu0 %v1056_v61 }
 0x96c   :  { %v1055_v2 = vpop.xlane.xlu1 %1054 }
 0x96d   :  { %v1059_v3 = vmul.f32 0.03125, %v1055_v2 }
 0x96f   :  { %v1061_v4 = vadd.f32 1e-05, %v1059_v3 }
 0x970   :  { %v1058_v7 = vpop.xlane.xlu0 %1057 }
 0x971   :  { %5950 = vrsqrt.f32 %v1061_v4  ;;  %v1060_v59 = vmul.f32 0.03125, %v1058_v7  ;;  %v1216_v7 = vld [vmem:[#allocation7 + $0x6] ss:$0 sm:$0xff] }
 0x973   :  { %v1062_v8 = vadd.f32 1e-05, %v1060_v59 }
 0x975   :  { %5952 = vrsqrt.f32 %v1062_v8 }
 0x97e   :  { %v5951_v9 = vpop.eup %5950 }
 0x97f   :  { %v1065_v12 = vmul.f32 %v5951_v9, %v1049_v53 }
 0x981   :  { %v1067_v16 = vmul.f32 %v1065_v12, %v1038_v1  ;;  %v1217_v12 = vld [vmem:[#allocation7 + $0x7] ss:$0 sm:$0xff] }
 0x982   :  { %v5953_v14 = vpop.eup %5952 }
 0x983   :  { %v1066_v15 = vmul.f32 %v5953_v14, %v1050_v5  ;;  %v1069_v19 = vadd.f32 %v1067_v16, %v1039_v17  ;;  %v5881_v5 = vld [vmem:[#allocation5 + $0x84] ss:$8 sps:$4 sm:$0xff]  }
 0x985   :  { %v1068_v18 = vmul.f32 %v1066_v15, %v1038_v1 }
 0x987   :  { %v1070_v22 = vadd.f32 %v1068_v18, %v1039_v17  ;;  %v1254_v17 = vld [vmem:[#allocation7 + $0x10] ss:$8 sm:$0x3] }
 0x988   :  { %v1263_v18 = vrot.slane %v1254_v17, %v6235_v11 }
 0x989   :  { %v1071_v25 = vpack.c.bf16 %v1070_v22, %v1069_v19 }
 0x98b   :  { %5457 = vmatmul.mubr.msk.bf16.vlgmr.msra.gmra.mxu1 %vm96_vm0, %v1071_v25  ;;  %v6447_v25 = vrot.slane %v1254_v17, %v6237_v13 }
 0x98c   :  { %1321 = vmatprep.mubr.bf16.mxu1 %v6177_v0  ;;  %1302 = vmatpush1.bf16.msra.mxu1 %v5876_v57 }
 0x98d   :  { %1303 = vmatprep.subr.bf16.mxu1 %v5881_v5 }
 0x990   :  { %1304 = vmatpush1.bf16.msra.mxu1 %v5879_v58 }
 0x991   :  { %5472 = vmatprep.subr.bf16.mxu1 %v6178_v10 }
 0xa4b   :  { %v1126_v29 = vpop.f32.mrf.mxu1 }
 0xa4c   :  { %v1127_v30 = vadd.f32 %v1126_v29, %v1076_v28 }
 0xa4d   :  { %v5458_v21 = vpop.f32.mrf.mxu1 }
 0xa4e   :  { %v1133_v34 = vmax.f32 %v1127_v30, 0.0 }
 0xa4f   :  { %v1129_v31 = vpop.f32.mrf.mxu1 }
 0xa50   :  { %v1130_v32 = vadd.f32 %v1129_v31, %v1076_v28 }
 0xa51   :  { %v5459_v33 = vpop.f32.mrf.mxu1 }
 0xa52   :  { %v1134_v24 = vmax.f32 %v1130_v32, 0.0 }
 0xa54   :  { %v1135_v23 = vpack.c.bf16 %v1134_v24, %v1133_v34 }
 0xa56   :  { %5469 = vmatmul.mubr.msk.bf16.vlgmr.msra.gmra.mxu0 %vm1169_vm4, %v1135_v23 }
 0xa57   :  { %5480 = vmatprep.mubr.msk.bf16.mxu0 %vm6179_vm1, %v6178_v10 }
 0xb16   :  { %v1207_v36 = vpop.f32.mrf.mxu0 }
 0xb17   :  { %v1208_v37 = vadd.f32 %v1207_v36, %v1144_v35 }
 0xb18   :  { %v5470_v38 = vpop.f32.mrf.mxu0 }
 0xb19   :  { %v1214_v39 = vadd.f32 %v1208_v37, %v1069_v19 }
 0xb1a   :  { %v1210_v40 = vpop.f32.mrf.mxu0 }
 0xb1b   :  { %v1211_v41 = vadd.f32 %v1210_v40, %v1144_v35  ;;  %v1218_v42 = vsel %vm96_vm0, %v1214_v39, 0.0 }
 0xb1c   :  { %1219 = vadd.xlane.f32.xlu1 %v1218_v42  ;;  %v5471_v43 = vpop.f32.mrf.mxu0 }
 0xb1d   :  { %v1215_v44 = vadd.f32 %v1211_v41, %v1070_v22 }
 0xb1f   :  { %v1221_v20 = vsel %vm96_vm0, %v1215_v44, 0.0 }
 0xb20   :  { %1222 = vadd.xlane.f32.xlu0 %v1221_v20 }
 0xba5   :  { %v1220_v45 = vpop.xlane.xlu1 %1219 }
 0xba6   :  { %v1224_v46 = vmul.f32 0.03125, %v1220_v45 }
 0xba8   :  { %v1226_v47 = vsub.f32 %v1214_v39, %v1224_v46 }
 0xba9   :  { %v1223_v48 = vpop.xlane.xlu0 %1222 }
 0xbaa   :  { %v1225_v49 = vmul.f32 0.03125, %v1223_v48  ;;  %v1228_v50 = vmul.f32 %v1226_v47, %v1226_v47 }
 0xbac   :  { %v1227_v51 = vsub.f32 %v1215_v44, %v1225_v49  ;;  %v1230_v52 = vsel %vm96_vm0, %v1228_v50, 0.0 }
 0xbad   :  { %1231 = vadd.xlane.f32.xlu1 %v1230_v52 }
 0xbae   :  { %v1229_v53 = vmul.f32 %v1227_v51, %v1227_v51 }
 0xbb0   :  { %v1233_v54 = vsel %vm96_vm0, %v1229_v53, 0.0 }
 0xbb1   :  { %1234 = vadd.xlane.f32.xlu0 %v1233_v54 }
 0xc36   :  { %v1232_v60 = vpop.xlane.xlu1 %1231 }
 0xc37   :  { %v1236_v61 = vmul.f32 0.03125, %v1232_v60 }
 0xc39   :  { %v1238_v62 = vadd.f32 1e-05, %v1236_v61 }
 0xc3a   :  { %v1235_v6 = vpop.xlane.xlu0 %1234 }
 0xc3b   :  { %5954 = vrsqrt.f32 %v1238_v62  ;;  %v1237_v63 = vmul.f32 0.03125, %v1235_v6 }
 0xc3d   :  { %v1239_v2 = vadd.f32 1e-05, %v1237_v63 }
 0xc3f   :  { %5956 = vrsqrt.f32 %v1239_v2 }
 0xc48   :  { %v5955_v3 = vpop.eup %5954 }
 0xc49   :  { %v1242_v4 = vmul.f32 %v5955_v3, %v1226_v47 }
 0xc4b   :  { %v1244_v9 = vmul.f32 %v1242_v4, %v1216_v7 }
 0xc4c   :  { %v5957_v59 = vpop.eup %5956 }
 0xc4d   :  { %v1243_v8 = vmul.f32 %v5957_v59, %v1227_v51  ;;  %v6434_v14 = vadd.f32 %v1244_v9, %v1217_v12 }
 0xc4f   :  { %v1245_v1 = vmul.f32 %v1243_v8, %v1216_v7 }
 0xc51   :  { %v6436_v15 = vadd.f32 %v1245_v1, %v1217_v12 }
 0xc53   :  { %v1248_v16 = vpack.c.bf16 %v6436_v15, %v6434_v14 }
 0xc55   :  { %5059 = vmatmul.mubr.msk.bf16.vlgmr.msra.gmra.mxu1 %vm96_vm0, %v1248_v16 }
 0xc56   :  { %5474 = vmatprep.mubr.msk.bf16.mxu1 %vm6179_vm1, %v6178_v10 }
 0xd15   :  { %v6444_v19 = vpop.f32.mrf.mxu1 }
 0xd16   :  { %v1324_v58 = vadd.f32 %v6444_v19, %v6447_v25 }
 0xd17   :  { %v1325_v22 = vpop.f32.mrf.mxu1 }
 0xd18   :  { %v1326_v26 = vadd.f32 %v1325_v22, %v1263_v18  ;;  %v6496_v60 = vpack.c.bf16 %v1324_v58, %v1324_v58 }
 0xd19   :  { %v1327_v27 = vpop.f32.mrf.mxu1 }
 0xd1a   :  { %v6449_v56 = vpack.c.bf16 %v1326_v26, %v1326_v26  ;;  %v6452_v28 = vadd.f32 %v1327_v27, %v6447_v25 }
 0xd1b   :  { %v1329_v29 = vpop.f32.mrf.mxu1 }
 0xd1c   :  { %v1330_v21 = vadd.f32 %v1329_v29, %v1263_v18  ;;  %1344 = vrot.lane.b32.xlu1 %v6449_v56, %s6181_s2 }
 0xd1e   :  { %v6456_v30 = vpack.c.bf16 %v1330_v21, %v1330_v21  ;;  %v6512_v21 = vpack.c.bf16 %v6452_v28, %v6452_v28 }
 0xd20   :  { %1392 = vrot.lane.b32.xlu0 %v6456_v30, %s6181_s2  ;;  %1466 = vrot.lane.b32.xlu1 %v6449_v56, %s6180_s0 }
 0xd24   :  { %1464 = vrot.lane.b32.xlu0 %v6449_v56, %s6182_s30  ;;  %1516 = vrot.lane.b32.xlu1 %v6456_v30, %s6180_s0 }
 0xd28   :  { %1514 = vrot.lane.b32.xlu1 %v6456_v30, %s6182_s30 }
 0xd8e   :  { %v1345_v31 = vpop.permute.xlu1 %1344 }
 0xd8f   :  { %v1350_v32 = vsel %vm157_vm2, %v1345_v31, 0 }
 0xd90   :  { %5473 = vmatpush3.bf16.xpose.msra.mxu1 %v1350_v32 }
 0xd91   :  { %5484 = vmatprep.subr.bf16.mxu1 %v6178_v10 }
 0xd92   :  { %v1393_v33 = vpop.permute.xlu0 %1392  ;;  %v1467_v34 = vpop.permute.xlu1 %1466 }
 0xd93   :  { %v1398_v24 = vsel %vm157_vm2, %v1393_v33, 0  ;;  %v1472_v23 = vsel %vm157_vm2, %v1467_v34, 0 }
 0xd94   :  { %5479 = vmatpush3.bf16.xpose.msra.mxu0 %v1398_v24 }
 0xd95   :  { %5490 = vmatprep.subr.bf16.mxu0 %v6178_v10 }
 0xd96   :  { %v1517_v35 = vpop.permute.xlu1 %1516  ;;  %v1465_v37 = vpop.permute.xlu0 %1464 }
 0xd97   :  { %5475 = vmatmul.mubr.msk.bf16.vlgmr.msra.gmra.mxu1 %vm157_vm2, %v6449_v56  ;;  %v1522_v36 = vsel %vm157_vm2, %v1517_v35, 0 }
 0xd98   :  { %5485 = vmatpush3.bf16.xpose.msra.mxu1 %v1472_v23  ;;  %5486 = vmatprep.mubr.msk.bf16.mxu1 %vm6179_vm1, %v6178_v10 }
 0xd99   :  { %5496 = vmatprep.subr.bf16.mxu1 %v6178_v10 }
 0xd9a   :  { %v1515_v38 = vpop.permute.xlu1 %1514 }
 0xd9b   :  { %5481 = vmatmul.mubr.msk.bf16.vlgmr.msra.gmra.mxu0 %vm157_vm2, %v6456_v30 }
 0xd9c   :  { %5491 = vmatpush3.bf16.xpose.msra.mxu0 %v1522_v36  ;;  %5492 = vmatprep.mubr.msk.bf16.mxu0 %vm6179_vm1, %v6178_v10 }
 0xd9d   :  { %5502 = vmatprep.subr.bf16.mxu0 %v6178_v10 }
 0xd9f   :  { %5487 = vmatmul.mubr.msk.bf16.vlgmr.msra.gmra.mxu1 %vm157_vm2, %v1465_v37 }
 0xda0   :  { %5498 = vmatprep.mubr.msk.bf16.mxu1 %vm6179_vm1, %v6178_v10 }
 0xda3   :  { %5493 = vmatmul.mubr.msk.bf16.vlgmr.msra.gmra.mxu0 %vm157_vm2, %v1515_v38 }
 0xda4   :  { %5504 = vmatprep.mubr.msk.bf16.mxu0 %vm6179_vm1, %v6178_v10 }
 0xe57   :  { %v1386_v39 = vpop.f32.mrf.mxu1 }
 0xe58   :  { %v1440_v51 = vsel %vm157_vm2, %v1386_v39, -inf }
 0xe59   :  { %v5476_v40 = vpop.f32.mrf.mxu1 }
 0xe5a   :  { %v1688_v40 = vsel %vm405_vm3, %v6496_v60, 0 }
 0xe5b   :  { %v1389_v41 = vpop.f32.mrf.mxu1  ;;  %v1434_v42 = vpop.f32.mrf.mxu0 }
 0xe5c   :  { %v1443_v57 = vsel %vm157_vm2, %v1434_v42, -inf }
 0xe5d   :  { %v5477_v43 = vpop.f32.mrf.mxu1  ;;  %v5482_v44 = vpop.f32.mrf.mxu0 }
 0xe5f   :  { %v1437_v20 = vpop.f32.mrf.mxu0  ;;  %v1508_v45 = vpop.f32.mrf.mxu1 }
 0xe60   :  { %v1564_v46 = vsel %vm157_vm2, %v1508_v45, -inf  ;;  %v1734_v20 = vsel %vm405_vm3, %v6512_v21, 0 }
 0xe61   :  { %v5483_v47 = vpop.f32.mrf.mxu0  ;;  %1565 = vmax.xlane.f32.xlu0 %v1564_v46  ;;  %v5488_v48 = vpop.f32.mrf.mxu1 }
 0xe63   :  { %v1511_v49 = vpop.f32.mrf.mxu1  ;;  %v1558_v50 = vpop.f32.mrf.mxu0 }
 0xe64   :  { %v1567_v52 = vsel %vm157_vm2, %v1558_v50, -inf }
 0xe65   :  { %1441 = vmax.xlane.f32.xlu0 %v1440_v51  ;;  %v5489_v53 = vpop.f32.mrf.mxu1  ;;  %1568 = vmax.xlane.f32.xlu1 %v1567_v52  ;;  %v5494_v54 = vpop.f32.mrf.mxu0 }
 0xe67   :  { %v1561_v55 = vpop.f32.mrf.mxu0 }
 0xe69   :  { %1444 = vmax.xlane.f32.xlu0 %v1443_v57  ;;  %v5495_v5 = vpop.f32.mrf.mxu0 }
 0xe76   :  { %1588 = vrot.lane.b32.xlu1 %v6496_v60, %s6181_s2 }
 0xeea   :  { %v1566_v61 = vpop.xlane.xlu0 %1565 }
 0xeeb   :  { %v1570_v62 = vsub.f32 %v1508_v45, %v1566_v61 }
 0xeed   :  { %v1572_v3 = vmul.f32 1.442695, %v1570_v62 }
 0xeee   :  { %v1442_v6 = vpop.xlane.xlu0 %1441  ;;  %v1569_v63 = vpop.xlane.xlu1 %1568 }
 0xeef   :  { %v1446_v2 = vsub.f32 %v1386_v39, %v1442_v6  ;;  %v1571_v7 = vsub.f32 %v1558_v50, %v1569_v63 }
 0xef1   :  { %v1448_v4 = vmul.f32 1.442695, %v1446_v2  ;;  %v1574_v1 = vmul.f32 1.442695, %v1571_v7 }
 0xef2   :  { %v1445_v59 = vpop.xlane.xlu0 %1444  ;;  %v1589_v8 = vpop.permute.xlu1 %1588 }
 0xef3   :  { %5958 = vpow2.f32 %v1448_v4  ;;  %v1447_v9 = vsub.f32 %v1434_v42, %v1445_v59  ;;  %v1594_v12 = vsel %vm405_vm3, %v1589_v8, 0 }
 0xef4   :  { %5497 = vmatpush3.bf16.msra.mxu1 %v1594_v12  ;;  %5960 = vpow2.f32 %v1572_v3 }
 0xef5   :  { %v1450_v16 = vmul.f32 1.442695, %v1447_v9  ;;  %5508 = vmatprep.subr.bf16.mxu1 %v6178_v10 }
 0xef7   :  { %5962 = vpow2.f32 %v1450_v16 }
 0xef8   :  { %5964 = vpow2.f32 %v1574_v1 }
 0xf00   :  { %v5959_v17 = vpop.eup %5958 }
 0xf01   :  { %v1452_v18 = vsel %vm157_vm2, %v5959_v17, 0.0  ;;  %v5961_v19 = vpop.eup %5960 }
 0xf02   :  { %1453 = vadd.xlane.f32.xlu1 %v1452_v18  ;;  %v1576_v26 = vsel %vm157_vm2, %v5961_v19, 0.0 }
 0xf04   :  { %v5963_v22 = vpop.eup %5962 }
 0xf05   :  { %v1455_v25 = vsel %vm157_vm2, %v5963_v22, 0.0  ;;  %v5965_v27 = vpop.eup %5964 }
 0xf06   :  { %1456 = vadd.xlane.f32.xlu0 %v1455_v25  ;;  %1577 = vadd.xlane.f32.xlu1 %v1576_v26  ;;  %v1579_v29 = vsel %vm157_vm2, %v5965_v27, 0.0 }
 0xf0a   :  { %1580 = vadd.xlane.f32.xlu0 %v1579_v29 }
 0xf17   :  { %1778 = vrot.lane.b32.xlu1 %v6449_v56, %s6183_s4 }
 0xf1b   :  { %1828 = vrot.lane.b32.xlu1 %v6456_v30, %s6183_s4 }
 0xf1f   :  { %1826 = vrot.lane.b32.xlu1 %v6456_v30, %s6184_s5 }
 0xf20   :  { %1636 = vrot.lane.b32.xlu0 %v6512_v21, %s6181_s2 }
 0xf24   :  { %1776 = vrot.lane.b32.xlu0 %v6449_v56, %s6184_s5 }
 0xf8b   :  { %v1454_v31 = vpop.xlane.xlu1 %1453 }
 0xf8f   :  { %v1457_v32 = vpop.xlane.xlu0 %1456  ;;  %v1578_v33 = vpop.xlane.xlu1 %1577 }
 0xf90   :  { %5966 = vrcp.f32 %v1578_v33 }
 0xf93   :  { %v1581_v34 = vpop.xlane.xlu0 %1580  ;;  %v1779_v43 = vpop.permute.xlu1 %1778 }
 0xf94   :  { %5968 = vrcp.f32 %v1581_v34  ;;  %v1784_v47 = vsel %vm157_vm2, %v1779_v43, 0 }
 0xf95   :  { %5970 = vrcp.f32 %v1454_v31 }
 0xf96   :  { %5972 = vrcp.f32 %v1457_v32 }
 0xf97   :  { %v1637_v24 = vpop.permute.xlu0 %1636  ;;  %v1829_v48 = vpop.permute.xlu1 %1828 }
 0xf98   :  { %v1642_v28 = vsel %vm405_vm3, %v1637_v24, 0  ;;  %v1834_v50 = vsel %vm157_vm2, %v1829_v48, 0 }
 0xf99   :  { %5503 = vmatpush3.bf16.msra.mxu0 %v1642_v28 }
 0xf9a   :  { %5514 = vmatprep.subr.bf16.mxu0 %v6178_v10 }
 0xf9b   :  { %v1777_v51 = vpop.permute.xlu0 %1776  ;;  %v1827_v52 = vpop.permute.xlu1 %1826 }
 0xf9d   :  { %v5967_v23 = vpop.eup %5966 }
 0xf9e   :  { %v1584_v35 = vmul.f32 %v5967_v23, %v5961_v19 }
 0xfa0   :  { %v1586_v37 = vpack.c.bf16 %v1584_v35, %v1584_v35 }
 0xfa1   :  { %v5969_v36 = vpop.eup %5968 }
 0xfa2   :  { %v5971_v38 = vpop.eup %5970  ;;  %v1585_v39 = vmul.f32 %v5969_v36, %v5965_v27  ;;  %5499 = vmatmul.mubr.msk.bf16.vlgmr.msra.gmra.mxu1 %vm157_vm2, %v1586_v37 }
 0xfa3   :  { %5509 = vmatpush3.bf16.msra.mxu1 %v1688_v40  ;;  %5510 = vmatprep.mubr.msk.bf16.mxu1 %vm6179_vm1, %v6178_v10  ;;  %v5973_v42 = vpop.eup %5972  ;;  %v1460_v44 = vmul.f32 %v5971_v38, %v5959_v17 }
 0xfa4   :  { %v1587_v41 = vpack.c.bf16 %v1585_v39, %v1585_v39  ;;  %5520 = vmatprep.subr.bf16.mxu1 %v6178_v10  ;;  %v1461_v45 = vmul.f32 %v5973_v42, %v5963_v22 }
 0xfa5   :  { %v1462_v46 = vpack.c.bf16 %v1460_v44, %v1460_v44 }
 0xfa6   :  { %5505 = vmatmul.mubr.msk.bf16.vlgmr.msra.gmra.mxu0 %vm157_vm2, %v1587_v41  ;;  %v1463_v49 = vpack.c.bf16 %v1461_v45, %v1461_v45 }
 0xfa7   :  { %5515 = vmatpush3.bf16.msra.mxu0 %v1734_v20  ;;  %5516 = vmatprep.mubr.msk.bf16.mxu0 %vm6179_vm1, %v6178_v10 }
 0xfa8   :  { %5526 = vmatprep.subr.bf16.mxu0 %v6178_v10 }
 0xfaa   :  { %5511 = vmatmul.mubr.msk.bf16.vlgmr.msra.gmra.mxu1 %vm157_vm2, %v1462_v46 }
 0xfab   :  { %5521 = vmatpush3.bf16.xpose.msra.mxu1 %v1784_v47  ;;  %5522 = vmatprep.mubr.msk.bf16.mxu1 %vm6179_vm1, %v6178_v10 }
 0xfac   :  { %5532 = vmatprep.subr.bf16.mxu1 %v6178_v10 }
 0xfae   :  { %5517 = vmatmul.mubr.msk.bf16.vlgmr.msra.gmra.mxu0 %vm157_vm2, %v1463_v49 }
 0xfaf   :  { %5527 = vmatpush3.bf16.xpose.msra.mxu0 %v1834_v50  ;;  %5528 = vmatprep.mubr.msk.bf16.mxu0 %vm6179_vm1, %v6178_v10 }
 0xfb0   :  { %5538 = vmatprep.subr.bf16.mxu0 %v6178_v10 }
 0xfb2   :  { %5523 = vmatmul.mubr.msk.bf16.vlgmr.msra.gmra.mxu1 %vm157_vm2, %v1777_v51 }
 0xfb3   :  { %5534 = vmatprep.mubr.msk.bf16.mxu1 %vm6179_vm1, %v6178_v10 }
 0xfb6   :  { %5529 = vmatmul.mubr.msk.bf16.vlgmr.msra.gmra.mxu0 %vm157_vm2, %v1827_v52 }
 0xfb7   :  { %5540 = vmatprep.mubr.msk.bf16.mxu0 %vm6179_vm1, %v6178_v10 }
0x1062   :  { %v1630_v53 = vpop.f32.mrf.mxu1 }
0x1064   :  { %v5500_v54 = vpop.f32.mrf.mxu1 }
0x1066   :  { %v1678_v55 = vpop.f32.mrf.mxu0  ;;  %v1633_v57 = vpop.f32.mrf.mxu1 }
0x1068   :  { %v5506_v5 = vpop.f32.mrf.mxu0  ;;  %v5501_v58 = vpop.f32.mrf.mxu1 }
0x106a   :  { %v1681_v61 = vpop.f32.mrf.mxu0  ;;  %v1724_v62 = vpop.f32.mrf.mxu1 }
0x106b   :  { %v6550_v6 = vadd.f32 %v1724_v62, %v1630_v53 }
0x106c   :  { %v5507_v63 = vpop.f32.mrf.mxu0  ;;  %v5512_v2 = vpop.f32.mrf.mxu1 }
0x106e   :  { %v1770_v3 = vpop.f32.mrf.mxu0  ;;  %v1727_v4 = vpop.f32.mrf.mxu1 }
0x106f   :  { %v6552_v7 = vadd.f32 %v1770_v3, %v1678_v55 }
0x1070   :  { %v5518_v59 = vpop.f32.mrf.mxu0  ;;  %v5513_v8 = vpop.f32.mrf.mxu1 }
0x1072   :  { %v1773_v9 = vpop.f32.mrf.mxu0  ;;  %v1820_v12 = vpop.f32.mrf.mxu1 }
0x1073   :  { %v1876_v16 = vsel %vm157_vm2, %v1820_v12, -inf }
0x1074   :  { %v5519_v1 = vpop.f32.mrf.mxu0  ;;  %1877 = vmax.xlane.f32.xlu0 %v1876_v16  ;;  %v5524_v17 = vpop.f32.mrf.mxu1 }
0x1076   :  { %v1870_v18 = vpop.f32.mrf.mxu0  ;;  %v1823_v19 = vpop.f32.mrf.mxu1 }
0x1077   :  { %v1879_v22 = vsel %vm157_vm2, %v1870_v18, -inf }
0x1078   :  { %1880 = vmax.xlane.f32.xlu1 %v1879_v22  ;;  %v5530_v25 = vpop.f32.mrf.mxu0  ;;  %v5525_v26 = vpop.f32.mrf.mxu1 }
0x107a   :  { %v1873_v27 = vpop.f32.mrf.mxu0 }
0x107c   :  { %v5531_v29 = vpop.f32.mrf.mxu0 }
0x1089   :  { %1900 = vrot.lane.b32.xlu1 %v6496_v60, %s6185_s6 }
0x108d   :  { %2000 = vrot.lane.b32.xlu1 %v6449_v56, %s6186_s7 }
0x1091   :  { %2050 = vrot.lane.b32.xlu1 %v6456_v30, %s6186_s7 }
0x1095   :  { %2048 = vrot.lane.b32.xlu1 %v6456_v30, %s6187_s8 }
0x10fd   :  { %v1878_v31 = vpop.xlane.xlu0 %1877 }
0x10fe   :  { %v1882_v32 = vsub.f32 %v1820_v12, %v1878_v31 }
0x1100   :  { %v1884_v33 = vmul.f32 1.442695, %v1882_v32 }
0x1101   :  { %v1881_v34 = vpop.xlane.xlu1 %1880 }
0x1102   :  { %v1883_v24 = vsub.f32 %v1870_v18, %v1881_v34  ;;  %5974 = vpow2.f32 %v1884_v33 }
0x1104   :  { %v1886_v28 = vmul.f32 1.442695, %v1883_v24 }
0x1105   :  { %v1901_v23 = vpop.permute.xlu1 %1900 }
0x1106   :  { %5976 = vpow2.f32 %v1886_v28  ;;  %v1906_v35 = vsel %vm405_vm3, %v1901_v23, 0 }
0x1107   :  { %5533 = vmatpush3.bf16.msra.mxu1 %v1906_v35 }
0x1108   :  { %5544 = vmatprep.subr.bf16.mxu1 %v6178_v10 }
0x1109   :  { %v2001_v44 = vpop.permute.xlu1 %2000 }
0x110a   :  { %v2006_v47 = vsel %vm157_vm2, %v2001_v44, 0 }
0x110d   :  { %v2051_v48 = vpop.permute.xlu1 %2050 }
0x110e   :  { %v2056_v50 = vsel %vm157_vm2, %v2051_v48, 0 }
0x110f   :  { %v5975_v36 = vpop.eup %5974 }
0x1110   :  { %v1888_v37 = vsel %vm157_vm2, %v5975_v36, 0.0 }
0x1111   :  { %1889 = vadd.xlane.f32.xlu0 %v1888_v37  ;;  %v2049_v52 = vpop.permute.xlu1 %2048 }
0x1113   :  { %v5977_v38 = vpop.eup %5976 }
0x1114   :  { %v1891_v30 = vsel %vm157_vm2, %v5977_v38, 0.0 }
0x1115   :  { %1892 = vadd.xlane.f32.xlu0 %v1891_v30 }
0x112b   :  { %1948 = vrot.lane.b32.xlu0 %v6512_v21, %s6185_s6 }
0x112f   :  { %1998 = vrot.lane.b32.xlu0 %v6449_v56, %s6187_s8 }
0x119a   :  { %v1890_v39 = vpop.xlane.xlu0 %1889 }
0x119b   :  { %5978 = vrcp.f32 %v1890_v39 }
0x119e   :  { %v1893_v40 = vpop.xlane.xlu0 %1892 }
0x119f   :  { %5980 = vrcp.f32 %v1893_v40  ;;  %v2220_v40 = vld [vmem:[#allocation7 + $0x11] ss:$0 sm:$0xff] }
0x11a2   :  { %v1949_v41 = vpop.permute.xlu0 %1948 }
0x11a3   :  { %v1954_v42 = vsel %vm405_vm3, %v1949_v41, 0 }
0x11a4   :  { %5539 = vmatpush3.bf16.msra.mxu0 %v1954_v42 }
0x11a5   :  { %5550 = vmatprep.subr.bf16.mxu0 %v6178_v10 }
0x11a6   :  { %v1999_v51 = vpop.permute.xlu0 %1998 }
0x11a8   :  { %v5979_v43 = vpop.eup %5978 }
0x11a9   :  { %v1896_v20 = vmul.f32 %v5979_v43, %v5975_v36 }
0x11ab   :  { %v1898_v45 = vpack.c.bf16 %v1896_v20, %v1896_v20 }
0x11ac   :  { %v5981_v46 = vpop.eup %5980 }
0x11ad   :  { %5535 = vmatmul.mubr.msk.bf16.vlgmr.msra.gmra.mxu1 %vm157_vm2, %v1898_v45  ;;  %v1897_v56 = vmul.f32 %v5981_v46, %v5977_v38 }
0x11ae   :  { %5545 = vmatpush3.bf16.xpose.msra.mxu1 %v2006_v47  ;;  %5546 = vmatprep.mubr.msk.bf16.mxu1 %vm6179_vm1, %v6178_v10 }
0x11af   :  { %v1899_v49 = vpack.c.bf16 %v1897_v56, %v1897_v56  ;;  %5556 = vmatprep.subr.bf16.mxu1 %v6178_v10 }
0x11b1   :  { %5541 = vmatmul.mubr.msk.bf16.vlgmr.msra.gmra.mxu0 %vm157_vm2, %v1899_v49 }
0x11b2   :  { %5551 = vmatpush3.bf16.xpose.msra.mxu0 %v2056_v50  ;;  %5552 = vmatprep.mubr.msk.bf16.mxu0 %vm6179_vm1, %v6178_v10 }
0x11b3   :  { %5562 = vmatprep.subr.bf16.mxu0 %v6178_v10 }
0x11b5   :  { %5547 = vmatmul.mubr.msk.bf16.vlgmr.msra.gmra.mxu1 %vm157_vm2, %v1999_v51 }
0x11b6   :  { %5558 = vmatprep.mubr.msk.bf16.mxu1 %vm6179_vm1, %v6178_v10 }
0x11b9   :  { %5553 = vmatmul.mubr.msk.bf16.vlgmr.msra.gmra.mxu0 %vm157_vm2, %v2049_v52 }
0x11ba   :  { %5564 = vmatprep.mubr.msk.bf16.mxu0 %vm6179_vm1, %v6178_v10 }
0x126d   :  { %v1942_v53 = vpop.f32.mrf.mxu1 }
0x126e   :  { %v1996_v54 = vadd.f32 %v1942_v53, %v6550_v6 }
0x126f   :  { %v5536_v55 = vpop.f32.mrf.mxu1 }
0x1271   :  { %v1945_v57 = vpop.f32.mrf.mxu1  ;;  %v1990_v5 = vpop.f32.mrf.mxu0 }
0x1272   :  { %v1997_v58 = vadd.f32 %v1990_v5, %v6552_v7 }
0x1273   :  { %v5537_v61 = vpop.f32.mrf.mxu1  ;;  %v5542_v62 = vpop.f32.mrf.mxu0 }
0x1275   :  { %v1993_v63 = vpop.f32.mrf.mxu0  ;;  %v2042_v2 = vpop.f32.mrf.mxu1 }
0x1276   :  { %v2098_v3 = vsel %vm157_vm2, %v2042_v2, -inf }
0x1277   :  { %v5543_v4 = vpop.f32.mrf.mxu0  ;;  %2099 = vmax.xlane.f32.xlu0 %v2098_v3  ;;  %v5548_v59 = vpop.f32.mrf.mxu1  ;;  %v5882_v3 = vld [vmem:[#allocation5 + $0xb0] ss:$8 sps:$4 sm:$0xff]  }
0x1278   :  { %v5884_v4 = vld [vmem:[#allocation5 + $0xf0] ss:$8 sps:$4 sm:$0xff]  }
0x1279   :  { %v2045_v8 = vpop.f32.mrf.mxu1  ;;  %v2092_v9 = vpop.f32.mrf.mxu0 }
0x127a   :  { %v2101_v12 = vsel %vm157_vm2, %v2092_v9, -inf }
0x127b   :  { %2102 = vmax.xlane.f32.xlu1 %v2101_v12  ;;  %v5549_v6 = vpop.f32.mrf.mxu1  ;;  %v5554_v1 = vpop.f32.mrf.mxu0 }
0x127d   :  { %v2095_v16 = vpop.f32.mrf.mxu0 }
0x127f   :  { %v5555_v17 = vpop.f32.mrf.mxu0 }
0x128c   :  { %2122 = vrot.lane.b32.xlu1 %v6496_v60, %s6188_s9 }
0x1300   :  { %v2100_v7 = vpop.xlane.xlu0 %2099 }
0x1301   :  { %v2104_v18 = vsub.f32 %v2042_v2, %v2100_v7  ;;  %v2225_v7 = vld [vmem:[#allocation7 + $0x12] ss:$0 sm:$0xff] }
0x1303   :  { %v2106_v19 = vmul.f32 1.442695, %v2104_v18 }
0x1304   :  { %v2103_v22 = vpop.xlane.xlu1 %2102 }
0x1305   :  { %5982 = vpow2.f32 %v2106_v19  ;;  %v2105_v25 = vsub.f32 %v2092_v9, %v2103_v22 }
0x1307   :  { %v2108_v26 = vmul.f32 1.442695, %v2105_v25  ;;  %v2226_v25 = vld [vmem:[#allocation7 + $0x13] ss:$0 sm:$0xff] }
0x1308   :  { %v2123_v27 = vpop.permute.xlu1 %2122 }
0x1309   :  { %5984 = vpow2.f32 %v2108_v26  ;;  %v2128_v29 = vsel %vm405_vm3, %v2123_v27, 0 }
0x130a   :  { %5557 = vmatpush3.bf16.msra.mxu1 %v2128_v29 }
0x130b   :  { %5568 = vmatprep.subr.bf16.mxu1 %v6178_v10 }
0x1312   :  { %v5983_v31 = vpop.eup %5982 }
0x1313   :  { %v2110_v32 = vsel %vm157_vm2, %v5983_v31, 0.0 }
0x1314   :  { %2111 = vadd.xlane.f32.xlu0 %v2110_v32  ;;  %v5885_v32 = vld [vmem:[#allocation5 + $0xe0] ss:$8 sps:$4 sm:$0xff]  }
0x1316   :  { %v5985_v33 = vpop.eup %5984 }
0x1317   :  { %v2113_v60 = vsel %vm157_vm2, %v5985_v33, 0.0 }
0x1318   :  { %2114 = vadd.xlane.f32.xlu0 %v2113_v60  ;;  %v5887_v60 = vld [vmem:[#allocation5 + $0xc0] ss:$8 sps:$4 sm:$0xff]  }
0x132e   :  { %2170 = vrot.lane.b32.xlu0 %v6512_v21, %s6188_s9 }
0x139d   :  { %v2112_v34 = vpop.xlane.xlu0 %2111 }
0x139e   :  { %5986 = vrcp.f32 %v2112_v34  ;;  %v2262_v34 = vld [vmem:[#allocation7 + $0x14] ss:$0 sm:$0xff] }
0x13a1   :  { %v2115_v24 = vpop.xlane.xlu0 %2114 }
0x13a2   :  { %5988 = vrcp.f32 %v2115_v24 }
0x13a5   :  { %v2171_v28 = vpop.permute.xlu0 %2170 }
0x13a6   :  { %v2176_v23 = vsel %vm405_vm3, %v2171_v28, 0 }
0x13a7   :  { %5563 = vmatpush3.bf16.msra.mxu0 %v2176_v23 }
0x13a8   :  { %5576 = vmatprep.subr.bf16.mxu0 %v6178_v10 }
0x13ab   :  { %v5987_v35 = vpop.eup %5986 }
0x13ac   :  { %v2118_v36 = vmul.f32 %v5987_v35, %v5983_v31 }
0x13ae   :  { %v2120_v37 = vpack.c.bf16 %v2118_v36, %v2118_v36 }
0x13af   :  { %v5989_v38 = vpop.eup %5988 }
0x13b0   :  { %5559 = vmatmul.mubr.msk.bf16.vlgmr.msra.gmra.mxu1 %vm157_vm2, %v2120_v37  ;;  %v2119_v30 = vmul.f32 %v5989_v38, %v5985_v33  ;;  %v5886_v33 = vld [vmem:[#allocation5 + $0xd0] ss:$8 sps:$4 sm:$0xff]  }
0x13b1   :  { %5572 = vmatprep.mubr.msk.bf16.mxu1 %vm6179_vm1, %v6178_v10  ;;  %5569 = vmatpush3.bf16.msra.mxu1 %v5882_v3  ;;  %v5898_v3 = vld [vmem:[#allocation5 + $0x1d4] ss:$8 sps:$4 sm:$0xff]  }
0x13b2   :  { %v2121_v21 = vpack.c.bf16 %v2119_v30, %v2119_v30  ;;  %5570 = vmatprep.subr.bf16.mxu1 %v6178_v10 }
0x13b4   :  { %5565 = vmatmul.mubr.msk.bf16.vlgmr.msra.gmra.mxu0 %vm157_vm2, %v2121_v21 }
0x13b5   :  { %5584 = vmatprep.mubr.msk.bf16.mxu0 %vm6179_vm1, %v6178_v10  ;;  %5577 = vmatpush3.bf16.msra.mxu0 %v5884_v4 }
0x13b6   :  { %5578 = vmatprep.subr.bf16.mxu0 %v6178_v10 }
0x13b9   :  { %5579 = vmatpush3.bf16.msra.mxu0 %v5885_v32  ;;  %v5899_v32 = vld [vmem:[#allocation5 + $0x1c0] ss:$8 sps:$4 sm:$0xff]  }
0x13ba   :  { %5580 = vmatprep.subr.bf16.mxu0 %v6178_v10 }
0x13bd   :  { %5581 = vmatpush3.bf16.msra.mxu0 %v5886_v33  ;;  %v2439_v33 = vld [vmem:[#allocation7 + $0x21] ss:$8 sm:$0x3] }
0x13be   :  { %5582 = vmatprep.subr.bf16.mxu0 %v6178_v10 }
0x13c1   :  { %5583 = vmatpush3.bf16.msra.mxu0 %v5887_v60  ;;  %v2448_v60 = vrot.slane %v2439_v33, %v6235_v11 }
0x13c2   :  { %5588 = vmatprep.subr.bf16.mxu0 %v6178_v10 }
0x1470   :  { %v2164_v39 = vpop.f32.mrf.mxu1 }
0x1471   :  { %v2218_v41 = vadd.f32 %v2164_v39, %v1996_v54  ;;  %v2330_v39 = vld [vmem:[#allocation7 + $0x15] ss:$0 sm:$0xff] }
0x1472   :  { %v5560_v42 = vpop.f32.mrf.mxu1 }
0x1473   :  { %v2221_v43 = vadd.f32 %v2220_v40, %v2218_v41 }
0x1474   :  { %v2167_v44 = vpop.f32.mrf.mxu1  ;;  %v2212_v20 = vpop.f32.mrf.mxu0 }
0x1475   :  { %v2219_v45 = vadd.f32 %v2212_v20, %v1997_v58  ;;  %v2223_v46 = vadd.f32 %v2221_v43, %v6434_v14 }
0x1476   :  { %v5561_v47 = vpop.f32.mrf.mxu1  ;;  %v5566_v56 = vpop.f32.mrf.mxu0 }
0x1477   :  { %v2222_v48 = vadd.f32 %v2220_v40, %v2219_v45  ;;  %v2227_v49 = vsel %vm96_vm0, %v2223_v46, 0.0 }
0x1478   :  { %v2215_v50 = vpop.f32.mrf.mxu0  ;;  %2228 = vadd.xlane.f32.xlu1 %v2227_v49 }
0x1479   :  { %v2224_v51 = vadd.f32 %v2222_v48, %v6436_v15  ;;  %v5883_v15 = vld [vmem:[#allocation5 + $0xa0] ss:$8 sps:$4 sm:$0xff]  }
0x147a   :  { %v5567_v52 = vpop.f32.mrf.mxu0  ;;  %5571 = vmatpush3.bf16.msra.mxu1 %v5883_v15 }
0x147b   :  { %v2230_v53 = vsel %vm96_vm0, %v2224_v51, 0.0 }
0x147c   :  { %2231 = vadd.xlane.f32.xlu0 %v2230_v53 }
0x1501   :  { %v2229_v54 = vpop.xlane.xlu1 %2228 }
0x1502   :  { %v2233_v55 = vmul.f32 0.03125, %v2229_v54 }
0x1504   :  { %v2235_v57 = vsub.f32 %v2223_v46, %v2233_v55 }
0x1505   :  { %v2232_v5 = vpop.xlane.xlu0 %2231 }
0x1506   :  { %v2234_v58 = vmul.f32 0.03125, %v2232_v5  ;;  %v2237_v61 = vmul.f32 %v2235_v57, %v2235_v57 }
0x1508   :  { %v2236_v14 = vsub.f32 %v2224_v51, %v2234_v58  ;;  %v2239_v62 = vsel %vm96_vm0, %v2237_v61, 0.0  ;;  %v5890_v58 = vld [vmem:[#allocation5 + $0x134] ss:$8 sps:$4 sm:$0xff]   ;;  %v5888_v61 = vld [vmem:[#allocation5 + $0x130] ss:$8 sps:$4 sm:$0xff]  }
0x1509   :  { %2240 = vadd.xlane.f32.xlu1 %v2239_v62  ;;  %2486 = vmatprep.subr.bf16.mxu1 %v5890_v58  ;;  %v5894_v62 = vld [vmem:[#allocation5 + $0x124] ss:$8 sps:$4 sm:$0xff]  }
0x150a   :  { %v2238_v63 = vmul.f32 %v2236_v14, %v2236_v14 }
0x150c   :  { %v2242_v2 = vsel %vm96_vm0, %v2238_v63, 0.0  ;;  %v5892_v63 = vld [vmem:[#allocation5 + $0x120] ss:$8 sps:$4 sm:$0xff]  }
0x150d   :  { %2243 = vadd.xlane.f32.xlu0 %v2242_v2  ;;  %v5895_v2 = vld [vmem:[#allocation5 + $0x100] ss:$8 sps:$4 sm:$0xff]  }
0x1592   :  { %v2241_v59 = vpop.xlane.xlu1 %2240 }
0x1593   :  { %v2245_v8 = vmul.f32 0.03125, %v2241_v59 }
0x1595   :  { %v2247_v9 = vadd.f32 1e-05, %v2245_v8 }
0x1596   :  { %v2244_v12 = vpop.xlane.xlu0 %2243 }
0x1597   :  { %5990 = vrsqrt.f32 %v2247_v9  ;;  %v2246_v6 = vmul.f32 0.03125, %v2244_v12 }
0x1599   :  { %v2248_v1 = vadd.f32 1e-05, %v2246_v6 }
0x159b   :  { %5992 = vrsqrt.f32 %v2248_v1 }
0x15a4   :  { %v5991_v16 = vpop.eup %5990 }
0x15a5   :  { %v2251_v17 = vmul.f32 %v5991_v16, %v2235_v57  ;;  %v2401_v16 = vld [vmem:[#allocation7 + $0x16] ss:$0 sm:$0xff] }
0x15a7   :  { %v2253_v22 = vmul.f32 %v2251_v17, %v2225_v7 }
0x15a8   :  { %v5993_v18 = vpop.eup %5992 }
0x15a9   :  { %v2252_v19 = vmul.f32 %v5993_v18, %v2236_v14  ;;  %v2255_v27 = vadd.f32 %v2253_v22, %v2226_v25  ;;  %v5891_v14 = vld [vmem:[#allocation5 + $0x110] ss:$8 sps:$4 sm:$0xff]  }
0x15ab   :  { %v2254_v26 = vmul.f32 %v2252_v19, %v2225_v7  ;;  %v2402_v19 = vld [vmem:[#allocation7 + $0x17] ss:$0 sm:$0xff] }
0x15ad   :  { %v2256_v29 = vadd.f32 %v2254_v26, %v2226_v25 }
0x15af   :  { %v2257_v31 = vpack.c.bf16 %v2256_v29, %v2255_v27 }
0x15b1   :  { %5573 = vmatmul.mubr.msk.bf16.vlgmr.msra.gmra.mxu1 %vm96_vm0, %v2257_v31  ;;  %v5901_v31 = vld [vmem:[#allocation5 + $0x1c4] ss:$8 sps:$4 sm:$0xff]  }
0x15b2   :  { %2506 = vmatprep.mubr.bf16.mxu1 %v6177_v0  ;;  %2487 = vmatpush1.bf16.msra.mxu1 %v5888_v61 }
0x15b3   :  { %2488 = vmatprep.subr.bf16.mxu1 %v5894_v62 }
0x15b6   :  { %2489 = vmatpush1.bf16.msra.mxu1 %v5892_v63 }
0x15b7   :  { %2578 = vmatprep.subr.bf16.mxu1 %v5898_v3 }
0x1671   :  { %v2312_v24 = vpop.f32.mrf.mxu1 }
0x1672   :  { %v2313_v23 = vadd.f32 %v2312_v24, %v2262_v34 }
0x1673   :  { %v5574_v28 = vpop.f32.mrf.mxu1 }
0x1674   :  { %v2319_v38 = vmax.f32 %v2313_v23, 0.0  ;;  %v2625_v28 = vld [vmem:[#allocation7 + $0x20] ss:$0 sm:$0xff] }
0x1675   :  { %v2315_v35 = vpop.f32.mrf.mxu1 }
0x1676   :  { %v2316_v36 = vadd.f32 %v2315_v35, %v2262_v34  ;;  %v2534_v35 = vld [vmem:[#allocation7 + $0x32] ss:$8 sm:$0x3] }
0x1677   :  { %v5575_v37 = vpop.f32.mrf.mxu1 }
0x1678   :  { %v2320_v30 = vmax.f32 %v2316_v36, 0.0  ;;  %v6651_v36 = vrot.slane %v2439_v33, %v6237_v13 }
0x167a   :  { %v2321_v21 = vpack.c.bf16 %v2320_v30, %v2319_v38 }
0x167c   :  { %5585 = vmatmul.mubr.msk.bf16.vlgmr.msra.gmra.mxu0 %vm1169_vm4, %v2321_v21 }
0x167d   :  { %5592 = vmatprep.mubr.msk.bf16.mxu0 %vm6179_vm1, %v6178_v10  ;;  %5589 = vmatpush3.bf16.msra.mxu0 %v5891_v14 }
0x167e   :  { %5590 = vmatprep.subr.bf16.mxu0 %v6178_v10 }
0x1681   :  { %5591 = vmatpush3.bf16.msra.mxu0 %v5895_v2 }
0x1682   :  { %5602 = vmatprep.subr.bf16.mxu0 %v6178_v10 }
0x173c   :  { %v2392_v40 = vpop.f32.mrf.mxu0 }
0x173d   :  { %v2393_v41 = vadd.f32 %v2392_v40, %v2330_v39 }
0x173e   :  { %v5586_v42 = vpop.f32.mrf.mxu0 }
0x173f   :  { %v2399_v43 = vadd.f32 %v2393_v41, %v2255_v27  ;;  %v5896_v27 = vld [vmem:[#allocation5 + $0x1d0] ss:$8 sps:$4 sm:$0xff]   ;;  %v2539_v41 = vrot.slane %v2534_v35, %v6237_v13 }
0x1740   :  { %v2395_v44 = vpop.f32.mrf.mxu0 }
0x1741   :  { %v2396_v20 = vadd.f32 %v2395_v44, %v2330_v39  ;;  %v2403_v45 = vsel %vm96_vm0, %v2399_v43, 0.0 }
0x1742   :  { %2404 = vadd.xlane.f32.xlu1 %v2403_v45  ;;  %v5587_v46 = vpop.f32.mrf.mxu0  ;;  %v6664_v45 = vrot.slane %v2534_v35, %v6235_v11 }
0x1743   :  { %v2400_v47 = vadd.f32 %v2396_v20, %v2256_v29 }
0x1745   :  { %v2406_v56 = vsel %vm96_vm0, %v2400_v47, 0.0 }
0x1746   :  { %2407 = vadd.xlane.f32.xlu0 %v2406_v56 }
0x17cb   :  { %v2405_v48 = vpop.xlane.xlu1 %2404 }
0x17cc   :  { %v2409_v49 = vmul.f32 0.03125, %v2405_v48 }
0x17ce   :  { %v2411_v50 = vsub.f32 %v2399_v43, %v2409_v49 }
0x17cf   :  { %v2408_v51 = vpop.xlane.xlu0 %2407 }
0x17d0   :  { %v2410_v52 = vmul.f32 0.03125, %v2408_v51  ;;  %v2413_v53 = vmul.f32 %v2411_v50, %v2411_v50 }
0x17d2   :  { %v2412_v54 = vsub.f32 %v2400_v47, %v2410_v52  ;;  %v2415_v55 = vsel %vm96_vm0, %v2413_v53, 0.0 }
0x17d3   :  { %2416 = vadd.xlane.f32.xlu1 %v2415_v55 }
0x17d4   :  { %v2414_v57 = vmul.f32 %v2412_v54, %v2412_v54 }
0x17d6   :  { %v2418_v5 = vsel %vm96_vm0, %v2414_v57, 0.0 }
0x17d7   :  { %2419 = vadd.xlane.f32.xlu0 %v2418_v5 }
0x185c   :  { %v2417_v15 = vpop.xlane.xlu1 %2416 }
0x185d   :  { %v2421_v4 = vmul.f32 0.03125, %v2417_v15 }
0x185f   :  { %v2423_v59 = vadd.f32 1e-05, %v2421_v4 }
0x1860   :  { %v2420_v8 = vpop.xlane.xlu0 %2419 }
0x1861   :  { %5994 = vrsqrt.f32 %v2423_v59  ;;  %v2422_v9 = vmul.f32 0.03125, %v2420_v8 }
0x1863   :  { %v2424_v12 = vadd.f32 1e-05, %v2422_v9 }
0x1865   :  { %5996 = vrsqrt.f32 %v2424_v12 }
0x186e   :  { %v5995_v6 = vpop.eup %5994 }
0x186f   :  { %v2427_v1 = vmul.f32 %v5995_v6, %v2411_v50 }
0x1871   :  { %v2429_v18 = vmul.f32 %v2427_v1, %v2401_v16 }
0x1872   :  { %v5997_v17 = vpop.eup %5996 }
0x1873   :  { %v2428_v7 = vmul.f32 %v5997_v17, %v2412_v54  ;;  %v6632_v25 = vadd.f32 %v2429_v18, %v2402_v19 }
0x1875   :  { %v2430_v22 = vmul.f32 %v2428_v7, %v2401_v16 }
0x1877   :  { %v6634_v26 = vadd.f32 %v2430_v22, %v2402_v19 }
0x1879   :  { %v2433_v29 = vpack.c.bf16 %v6634_v26, %v6632_v25 }
0x187b   :  { %5092 = vmatmul.mubr.msk.bf16.vlgmr.msra.gmra.mxu1 %vm96_vm0, %v2433_v29  ;;  %5593 = vmatmul.mubr.msk.bf16.vlgmr.msra.gmra.mxu0 %vm96_vm0, %v2433_v29 }
0x187c   :  { %2579 = vmatpush1.bf16.msra.mxu1 %v5896_v27  ;;  %2598 = vmatprep.mubr.bf16.mxu1 %v6177_v0 }
0x187d   :  { %2580 = vmatprep.subr.bf16.mxu1 %v5901_v31  ;;  %5604 = vmatprep.mubr.msk.bf16.mxu0 %vm6179_vm1, %v6178_v10 }
0x1880   :  { %2581 = vmatpush1.bf16.msra.mxu1 %v5899_v32 }
0x1881   :  { %5596 = vmatprep.subr.bf16.mxu1 %v6178_v10 }
0x1883   :  { %5101 = vmatmul.mubr.msk.bf16.vlgmr.msra.gmra.mxu1 %vm96_vm0, %v2433_v29 }
0x1884   :  { %5598 = vmatprep.mubr.msk.bf16.mxu1 %vm6179_vm1, %v6178_v10 }
0x193b   :  { %v6648_v34 = vpop.f32.mrf.mxu1  ;;  %v2672_v24 = vpop.f32.mrf.mxu0 }
0x193c   :  { %v2673_v21 = vadd.f32 %v2672_v24, %v2625_v28  ;;  %v2509_v31 = vadd.f32 %v6648_v34, %v6651_v36 }
0x193d   :  { %v2510_v0 = vpop.f32.mrf.mxu1  ;;  %v5594_v23 = vpop.f32.mrf.mxu0 }
0x193e   :  { %v2511_v37 = vadd.f32 %v2510_v0, %v2448_v60  ;;  %v6666_v47 = vpack.c.bf16 %v2673_v21, %v2673_v21  ;;  %v6715_v32 = vpack.c.bf16 %v2509_v31, %v2509_v31 }
0x193f   :  { %v2512_v38 = vpop.f32.mrf.mxu1  ;;  %v2675_v30 = vpop.f32.mrf.mxu0 }
0x1940   :  { %v6653_v39 = vpack.c.bf16 %v2511_v37, %v2511_v37  ;;  %v6656_v40 = vadd.f32 %v2512_v38, %v6651_v36  ;;  %v2676_v56 = vadd.f32 %v2675_v30, %v2625_v28 }
0x1941   :  { %v2514_v42 = vpop.f32.mrf.mxu1  ;;  %v5595_v43 = vpop.f32.mrf.mxu0 }
0x1942   :  { %v2515_v44 = vadd.f32 %v2514_v42, %v2448_v60  ;;  %2803 = vrot.lane.b32.xlu1 %v6653_v39, %s6182_s30  ;;  %v2689_v20 = vsel %vm157_vm2, %v6653_v39, 0  ;;  %v6682_v52 = vpack.c.bf16 %v2676_v56, %v2676_v56 }
0x1943   :  { %v2600_v46 = vpop.f32.mrf.mxu1  ;;  %5597 = vmatpush3.bf16.xpose.msra.mxu1 %v2689_v20 }
0x1944   :  { %v6668_v48 = vpack.c.bf16 %v2515_v44, %v2515_v44  ;;  %v6670_v13 = vadd.f32 %v2600_v46, %v2539_v41  ;;  %5608 = vmatprep.subr.bf16.mxu1 %v6178_v10 }
0x1945   :  { %v2602_v49 = vpop.f32.mrf.mxu1 }
0x1946   :  { %v6674_v50 = vadd.f32 %v2602_v49, %v6664_v45  ;;  %2853 = vrot.lane.b32.xlu0 %v6668_v48, %s6182_s30  ;;  %2801 = vrot.lane.b32.xlu1 %v6666_v47, %s6182_s30  ;;  %v2735_v11 = vsel %vm157_vm2, %v6668_v48, 0 }
0x1947   :  { %v2604_v51 = vpop.f32.mrf.mxu1  ;;  %5603 = vmatpush3.bf16.xpose.msra.mxu0 %v2735_v11 }
0x1948   :  { %v6684_v53 = vadd.f32 %v2604_v51, %v2539_v41  ;;  %5614 = vmatprep.subr.bf16.mxu0 %v6178_v10  ;;  %v6731_v51 = vpack.c.bf16 %v6656_v40, %v6656_v40 }
0x1949   :  { %v6707_v14 = vpop.f32.mrf.mxu1 }
0x194a   :  { %2851 = vrot.lane.b32.xlu1 %v6682_v52, %s6182_s30  ;;  %5599 = vmatmul.mubr.msk.bf16.vlgmr.msra.gmra.mxu1 %vm157_vm2, %v6666_v47 }
0x194b   :  { %5610 = vmatprep.mubr.msk.bf16.mxu1 %vm6179_vm1, %v6178_v10 }
0x194e   :  { %5605 = vmatmul.mubr.msk.bf16.vlgmr.msra.gmra.mxu0 %vm157_vm2, %v6682_v52 }
0x194f   :  { %5616 = vmatprep.mubr.msk.bf16.mxu0 %vm6179_vm1, %v6178_v10 }
0x19b4   :  { %v2804_v54 = vpop.permute.xlu1 %2803 }
0x19b5   :  { %v2809_v55 = vsel %vm157_vm2, %v2804_v54, 0 }
0x19b6   :  { %5609 = vmatpush3.bf16.xpose.msra.mxu1 %v2809_v55 }
0x19b7   :  { %5620 = vmatprep.subr.bf16.mxu1 %v6178_v10 }
0x19b8   :  { %v2854_v57 = vpop.permute.xlu0 %2853  ;;  %v2802_v58 = vpop.permute.xlu1 %2801 }
0x19b9   :  { %v2859_v5 = vsel %vm157_vm2, %v2854_v57, 0 }
0x19ba   :  { %5615 = vmatpush3.bf16.xpose.msra.mxu0 %v2859_v5 }
0x19bb   :  { %5626 = vmatprep.subr.bf16.mxu0 %v6178_v10 }
0x19bc   :  { %v2852_v61 = vpop.permute.xlu1 %2851 }
0x19bd   :  { %5611 = vmatmul.mubr.msk.bf16.vlgmr.msra.gmra.mxu1 %vm157_vm2, %v2802_v58 }
0x19be   :  { %5622 = vmatprep.mubr.msk.bf16.mxu1 %vm6179_vm1, %v6178_v10 }
0x19c1   :  { %5617 = vmatmul.mubr.msk.bf16.vlgmr.msra.gmra.mxu0 %vm157_vm2, %v2852_v61 }
0x19c2   :  { %5628 = vmatprep.mubr.msk.bf16.mxu0 %vm6179_vm1, %v6178_v10 }
0x1a0a   :  { %v2725_v62 = vpop.f32.mrf.mxu1 }
0x1a0b   :  { %v2777_v7 = vsel %vm157_vm2, %v2725_v62, -inf }
0x1a0c   :  { %v5600_v63 = vpop.f32.mrf.mxu1 }
0x1a0e   :  { %v2728_v2 = vpop.f32.mrf.mxu1  ;;  %v2771_v3 = vpop.f32.mrf.mxu0 }
0x1a0f   :  { %v2780_v27 = vsel %vm157_vm2, %v2771_v3, -inf }
0x1a10   :  { %v5601_v15 = vpop.f32.mrf.mxu1  ;;  %v5606_v4 = vpop.f32.mrf.mxu0 }
0x1a11   :  { %v3025_v4 = vsel %vm405_vm3, %v6715_v32, 0 }
0x1a12   :  { %v2774_v59 = vpop.f32.mrf.mxu0 }
0x1a14   :  { %v5607_v8 = vpop.f32.mrf.mxu0 }
0x1a7d   :  { %v2845_v9 = vpop.f32.mrf.mxu1 }
0x1a7e   :  { %v2901_v12 = vsel %vm157_vm2, %v2845_v9, -inf }
0x1a7f   :  { %2902 = vmax.xlane.f32.xlu0 %v2901_v12  ;;  %v5612_v6 = vpop.f32.mrf.mxu1 }
0x1a80   :  { %v3071_v6 = vsel %vm405_vm3, %v6731_v51, 0 }
0x1a81   :  { %v2848_v1 = vpop.f32.mrf.mxu1  ;;  %v2895_v16 = vpop.f32.mrf.mxu0 }
0x1a82   :  { %v2904_v17 = vsel %vm157_vm2, %v2895_v16, -inf }
0x1a83   :  { %2905 = vmax.xlane.f32.xlu1 %v2904_v17  ;;  %v5618_v18 = vpop.f32.mrf.mxu0  ;;  %2778 = vmax.xlane.f32.xlu0 %v2777_v7  ;;  %v5613_v19 = vpop.f32.mrf.mxu1 }
0x1a85   :  { %v2898_v22 = vpop.f32.mrf.mxu0 }
0x1a87   :  { %v5619_v29 = vpop.f32.mrf.mxu0  ;;  %2781 = vmax.xlane.f32.xlu0 %v2780_v27 }
0x1a94   :  { %2925 = vrot.lane.b32.xlu1 %v6715_v32, %s6181_s2 }
0x1b08   :  { %v2903_v33 = vpop.xlane.xlu0 %2902 }
0x1b09   :  { %v2907_v60 = vsub.f32 %v2845_v9, %v2903_v33 }
0x1b0b   :  { %v2909_v37 = vmul.f32 1.442695, %v2907_v60 }
0x1b0c   :  { %v2906_v24 = vpop.xlane.xlu1 %2905  ;;  %v2779_v28 = vpop.xlane.xlu0 %2778 }
0x1b0d   :  { %v2783_v0 = vsub.f32 %v2725_v62, %v2779_v28  ;;  %v2908_v23 = vsub.f32 %v2895_v16, %v2906_v24 }
0x1b0f   :  { %v2785_v35 = vmul.f32 1.442695, %v2783_v0  ;;  %v2911_v34 = vmul.f32 1.442695, %v2908_v23 }
0x1b10   :  { %v2782_v38 = vpop.xlane.xlu0 %2781  ;;  %v2926_v30 = vpop.permute.xlu1 %2925 }
0x1b11   :  { %v2784_v21 = vsub.f32 %v2771_v3, %v2782_v38  ;;  %v2931_v41 = vsel %vm405_vm3, %v2926_v30, 0  ;;  %5998 = vpow2.f32 %v2785_v35 }
0x1b12   :  { %5621 = vmatpush3.bf16.msra.mxu1 %v2931_v41  ;;  %6000 = vpow2.f32 %v2909_v37 }
0x1b13   :  { %v2787_v36 = vmul.f32 1.442695, %v2784_v21  ;;  %5632 = vmatprep.subr.bf16.mxu1 %v6178_v10 }
0x1b15   :  { %6002 = vpow2.f32 %v2787_v36 }
0x1b16   :  { %6004 = vpow2.f32 %v2911_v34 }
0x1b1e   :  { %v5999_v42 = vpop.eup %5998 }
0x1b1f   :  { %v2789_v43 = vsel %vm157_vm2, %v5999_v42, 0.0  ;;  %v6001_v44 = vpop.eup %6000 }
0x1b20   :  { %2790 = vadd.xlane.f32.xlu1 %v2789_v43  ;;  %v2913_v49 = vsel %vm157_vm2, %v6001_v44, 0.0 }
0x1b22   :  { %v6003_v20 = vpop.eup %6002 }
0x1b23   :  { %v2792_v46 = vsel %vm157_vm2, %v6003_v20, 0.0  ;;  %v6005_v56 = vpop.eup %6004 }
0x1b24   :  { %2793 = vadd.xlane.f32.xlu0 %v2792_v46  ;;  %2914 = vadd.xlane.f32.xlu1 %v2913_v49  ;;  %v2916_v11 = vsel %vm157_vm2, %v6005_v56, 0.0 }
0x1b28   :  { %2917 = vadd.xlane.f32.xlu0 %v2916_v11 }
0x1b35   :  { %3115 = vrot.lane.b32.xlu1 %v6653_v39, %s6184_s5 }
0x1b39   :  { %3165 = vrot.lane.b32.xlu1 %v6668_v48, %s6184_s5 }
0x1b3d   :  { %3163 = vrot.lane.b32.xlu1 %v6682_v52, %s6184_s5 }
0x1b3e   :  { %2973 = vrot.lane.b32.xlu0 %v6731_v51, %s6181_s2 }
0x1b42   :  { %3113 = vrot.lane.b32.xlu0 %v6666_v47, %s6184_s5 }
0x1ba9   :  { %v2791_v54 = vpop.xlane.xlu1 %2790 }
0x1bad   :  { %v2794_v55 = vpop.xlane.xlu0 %2793  ;;  %v2915_v57 = vpop.xlane.xlu1 %2914 }
0x1bae   :  { %6006 = vrcp.f32 %v2915_v57 }
0x1bb1   :  { %v2918_v5 = vpop.xlane.xlu0 %2917  ;;  %v3116_v9 = vpop.permute.xlu1 %3115 }
0x1bb2   :  { %6008 = vrcp.f32 %v2918_v5  ;;  %v3121_v17 = vsel %vm157_vm2, %v3116_v9, 0 }
0x1bb3   :  { %6010 = vrcp.f32 %v2791_v54 }
0x1bb4   :  { %6012 = vrcp.f32 %v2794_v55 }
0x1bb5   :  { %v2974_v58 = vpop.permute.xlu0 %2973  ;;  %v3166_v7 = vpop.permute.xlu1 %3165 }
0x1bb6   :  { %v2979_v40 = vsel %vm405_vm3, %v2974_v58, 0  ;;  %v3171_v19 = vsel %vm157_vm2, %v3166_v7, 0 }
0x1bb7   :  { %5627 = vmatpush3.bf16.msra.mxu0 %v2979_v40 }
0x1bb8   :  { %5638 = vmatprep.subr.bf16.mxu0 %v6178_v10 }
0x1bb9   :  { %v3114_v22 = vpop.permute.xlu0 %3113  ;;  %v3164_v27 = vpop.permute.xlu1 %3163 }
0x1bbb   :  { %v6007_v61 = vpop.eup %6006 }
0x1bbc   :  { %v2921_v62 = vmul.f32 %v6007_v61, %v6001_v44 }
0x1bbe   :  { %v2923_v2 = vpack.c.bf16 %v2921_v62, %v2921_v62 }
0x1bbf   :  { %v6009_v63 = vpop.eup %6008 }
0x1bc0   :  { %v6011_v3 = vpop.eup %6010  ;;  %v2922_v15 = vmul.f32 %v6009_v63, %v6005_v56  ;;  %5623 = vmatmul.mubr.msk.bf16.vlgmr.msra.gmra.mxu1 %vm157_vm2, %v2923_v2 }
0x1bc1   :  { %5633 = vmatpush3.bf16.msra.mxu1 %v3025_v4  ;;  %5634 = vmatprep.mubr.msk.bf16.mxu1 %vm6179_vm1, %v6178_v10  ;;  %v6013_v8 = vpop.eup %6012  ;;  %v2797_v12 = vmul.f32 %v6011_v3, %v5999_v42 }
0x1bc2   :  { %v2924_v59 = vpack.c.bf16 %v2922_v15, %v2922_v15  ;;  %5644 = vmatprep.subr.bf16.mxu1 %v6178_v10  ;;  %v2798_v1 = vmul.f32 %v6013_v8, %v6003_v20 }
0x1bc3   :  { %v2799_v16 = vpack.c.bf16 %v2797_v12, %v2797_v12 }
0x1bc4   :  { %5629 = vmatmul.mubr.msk.bf16.vlgmr.msra.gmra.mxu0 %vm157_vm2, %v2924_v59  ;;  %v2800_v18 = vpack.c.bf16 %v2798_v1, %v2798_v1 }
0x1bc5   :  { %5639 = vmatpush3.bf16.msra.mxu0 %v3071_v6  ;;  %5640 = vmatprep.mubr.msk.bf16.mxu0 %vm6179_vm1, %v6178_v10 }
0x1bc6   :  { %5650 = vmatprep.subr.bf16.mxu0 %v6178_v10 }
0x1bc8   :  { %5635 = vmatmul.mubr.msk.bf16.vlgmr.msra.gmra.mxu1 %vm157_vm2, %v2799_v16 }
0x1bc9   :  { %5645 = vmatpush3.bf16.xpose.msra.mxu1 %v3121_v17  ;;  %5646 = vmatprep.mubr.msk.bf16.mxu1 %vm6179_vm1, %v6178_v10 }
0x1bca   :  { %5656 = vmatprep.subr.bf16.mxu1 %v6178_v10 }
0x1bcc   :  { %5641 = vmatmul.mubr.msk.bf16.vlgmr.msra.gmra.mxu0 %vm157_vm2, %v2800_v18 }
0x1bcd   :  { %5651 = vmatpush3.bf16.xpose.msra.mxu0 %v3171_v19  ;;  %5652 = vmatprep.mubr.msk.bf16.mxu0 %vm6179_vm1, %v6178_v10 }
0x1bce   :  { %5662 = vmatprep.subr.bf16.mxu0 %v6178_v10 }
0x1bd0   :  { %5647 = vmatmul.mubr.msk.bf16.vlgmr.msra.gmra.mxu1 %vm157_vm2, %v3114_v22 }
0x1bd1   :  { %5658 = vmatprep.mubr.msk.bf16.mxu1 %vm6179_vm1, %v6178_v10 }
0x1bd4   :  { %5653 = vmatmul.mubr.msk.bf16.vlgmr.msra.gmra.mxu0 %vm157_vm2, %v3164_v27 }
0x1bd5   :  { %5664 = vmatprep.mubr.msk.bf16.mxu0 %vm6179_vm1, %v6178_v10 }
0x1c80   :  { %v2967_v29 = vpop.f32.mrf.mxu1 }
0x1c82   :  { %v5624_v31 = vpop.f32.mrf.mxu1 }
0x1c84   :  { %v3015_v33 = vpop.f32.mrf.mxu0  ;;  %v2970_v60 = vpop.f32.mrf.mxu1 }
0x1c86   :  { %v5630_v24 = vpop.f32.mrf.mxu0  ;;  %v5625_v28 = vpop.f32.mrf.mxu1 }
0x1c88   :  { %v3018_v0 = vpop.f32.mrf.mxu0  ;;  %v3061_v23 = vpop.f32.mrf.mxu1 }
0x1c89   :  { %v6769_v35 = vadd.f32 %v3061_v23, %v2967_v29 }
0x1c8a   :  { %v5631_v37 = vpop.f32.mrf.mxu0  ;;  %v5636_v38 = vpop.f32.mrf.mxu1 }
0x1c8c   :  { %v3107_v30 = vpop.f32.mrf.mxu0  ;;  %v3064_v21 = vpop.f32.mrf.mxu1 }
0x1c8d   :  { %v6771_v41 = vadd.f32 %v3107_v30, %v3015_v33 }
0x1c8e   :  { %v5642_v34 = vpop.f32.mrf.mxu0  ;;  %v5637_v36 = vpop.f32.mrf.mxu1 }
0x1c90   :  { %v3110_v42 = vpop.f32.mrf.mxu0  ;;  %v3157_v43 = vpop.f32.mrf.mxu1 }
0x1c91   :  { %v3213_v20 = vsel %vm157_vm2, %v3157_v43, -inf }
0x1c92   :  { %v5643_v44 = vpop.f32.mrf.mxu0  ;;  %3214 = vmax.xlane.f32.xlu0 %v3213_v20  ;;  %v5648_v46 = vpop.f32.mrf.mxu1 }
0x1c94   :  { %v3207_v56 = vpop.f32.mrf.mxu0  ;;  %v3160_v49 = vpop.f32.mrf.mxu1 }
0x1c95   :  { %v3216_v11 = vsel %vm157_vm2, %v3207_v56, -inf }
0x1c96   :  { %3217 = vmax.xlane.f32.xlu1 %v3216_v11  ;;  %v5654_v54 = vpop.f32.mrf.mxu0  ;;  %v5649_v55 = vpop.f32.mrf.mxu1 }
0x1c98   :  { %v3210_v57 = vpop.f32.mrf.mxu0 }
0x1c9a   :  { %v5655_v5 = vpop.f32.mrf.mxu0 }
0x1ca7   :  { %3237 = vrot.lane.b32.xlu1 %v6715_v32, %s6185_s6 }
0x1cab   :  { %3337 = vrot.lane.b32.xlu1 %v6653_v39, %s6187_s8 }
0x1caf   :  { %3387 = vrot.lane.b32.xlu1 %v6668_v48, %s6187_s8 }
0x1cb3   :  { %3385 = vrot.lane.b32.xlu1 %v6682_v52, %s6187_s8 }
0x1d1b   :  { %v3215_v58 = vpop.xlane.xlu0 %3214 }
0x1d1c   :  { %v3219_v40 = vsub.f32 %v3157_v43, %v3215_v58 }
0x1d1e   :  { %v3221_v61 = vmul.f32 1.442695, %v3219_v40 }
0x1d1f   :  { %v3218_v62 = vpop.xlane.xlu1 %3217 }
0x1d20   :  { %v3220_v63 = vsub.f32 %v3207_v56, %v3218_v62  ;;  %6014 = vpow2.f32 %v3221_v61 }
0x1d22   :  { %v3223_v2 = vmul.f32 1.442695, %v3220_v63 }
0x1d23   :  { %v3238_v3 = vpop.permute.xlu1 %3237 }
0x1d24   :  { %6016 = vpow2.f32 %v3223_v2  ;;  %v3243_v15 = vsel %vm405_vm3, %v3238_v3, 0 }
0x1d25   :  { %5657 = vmatpush3.bf16.msra.mxu1 %v3243_v15 }
0x1d26   :  { %5668 = vmatprep.subr.bf16.mxu1 %v6178_v10 }
0x1d27   :  { %v3338_v1 = vpop.permute.xlu1 %3337 }
0x1d28   :  { %v3343_v18 = vsel %vm157_vm2, %v3338_v1, 0 }
0x1d2b   :  { %v3388_v19 = vpop.permute.xlu1 %3387 }
0x1d2c   :  { %v3393_v27 = vsel %vm157_vm2, %v3388_v19, 0 }
0x1d2d   :  { %v6015_v39 = vpop.eup %6014 }
0x1d2e   :  { %v3225_v48 = vsel %vm157_vm2, %v6015_v39, 0.0 }
0x1d2f   :  { %3226 = vadd.xlane.f32.xlu0 %v3225_v48  ;;  %v3386_v31 = vpop.permute.xlu1 %3385 }
0x1d31   :  { %v6017_v4 = vpop.eup %6016 }
0x1d32   :  { %v3228_v52 = vsel %vm157_vm2, %v6017_v4, 0.0 }
0x1d33   :  { %3229 = vadd.xlane.f32.xlu0 %v3228_v52 }
0x1d49   :  { %3285 = vrot.lane.b32.xlu0 %v6731_v51, %s6185_s6 }
0x1d4d   :  { %3335 = vrot.lane.b32.xlu0 %v6666_v47, %s6187_s8 }
0x1db8   :  { %v3227_v59 = vpop.xlane.xlu0 %3226 }
0x1db9   :  { %6018 = vrcp.f32 %v3227_v59 }
0x1dbc   :  { %v3230_v8 = vpop.xlane.xlu0 %3229 }
0x1dbd   :  { %6020 = vrcp.f32 %v3230_v8 }
0x1dc0   :  { %v3286_v9 = vpop.permute.xlu0 %3285 }
0x1dc1   :  { %v3291_v12 = vsel %vm405_vm3, %v3286_v9, 0 }
0x1dc2   :  { %5663 = vmatpush3.bf16.msra.mxu0 %v3291_v12  ;;  %v3557_v12 = vld [vmem:[#allocation7 + $0x22] ss:$0 sm:$0xff] }
0x1dc3   :  { %5674 = vmatprep.subr.bf16.mxu0 %v6178_v10 }
0x1dc4   :  { %v3336_v29 = vpop.permute.xlu0 %3335 }
0x1dc6   :  { %v6019_v6 = vpop.eup %6018 }
0x1dc7   :  { %v3233_v16 = vmul.f32 %v6019_v6, %v6015_v39 }
0x1dc9   :  { %v3235_v17 = vpack.c.bf16 %v3233_v16, %v3233_v16 }
0x1dca   :  { %v6021_v7 = vpop.eup %6020 }
0x1dcb   :  { %5659 = vmatmul.mubr.msk.bf16.vlgmr.msra.gmra.mxu1 %vm157_vm2, %v3235_v17  ;;  %v3234_v47 = vmul.f32 %v6021_v7, %v6017_v4 }
0x1dcc   :  { %5669 = vmatpush3.bf16.xpose.msra.mxu1 %v3343_v18  ;;  %5670 = vmatprep.mubr.msk.bf16.mxu1 %vm6179_vm1, %v6178_v10 }
0x1dcd   :  { %v3236_v22 = vpack.c.bf16 %v3234_v47, %v3234_v47  ;;  %5680 = vmatprep.subr.bf16.mxu1 %v6178_v10 }
0x1dcf   :  { %5665 = vmatmul.mubr.msk.bf16.vlgmr.msra.gmra.mxu0 %vm157_vm2, %v3236_v22 }
0x1dd0   :  { %5675 = vmatpush3.bf16.xpose.msra.mxu0 %v3393_v27  ;;  %5676 = vmatprep.mubr.msk.bf16.mxu0 %vm6179_vm1, %v6178_v10 }
0x1dd1   :  { %5686 = vmatprep.subr.bf16.mxu0 %v6178_v10 }
0x1dd3   :  { %5671 = vmatmul.mubr.msk.bf16.vlgmr.msra.gmra.mxu1 %vm157_vm2, %v3336_v29 }
0x1dd4   :  { %5682 = vmatprep.mubr.msk.bf16.mxu1 %vm6179_vm1, %v6178_v10 }
0x1dd7   :  { %5677 = vmatmul.mubr.msk.bf16.vlgmr.msra.gmra.mxu0 %vm157_vm2, %v3386_v31 }
0x1dd8   :  { %5688 = vmatprep.mubr.msk.bf16.mxu0 %vm6179_vm1, %v6178_v10 }
0x1e8b   :  { %v3279_v33 = vpop.f32.mrf.mxu1 }
0x1e8c   :  { %v3333_v60 = vadd.f32 %v3279_v33, %v6769_v35 }
0x1e8d   :  { %v5660_v24 = vpop.f32.mrf.mxu1 }
0x1e8f   :  { %v3282_v28 = vpop.f32.mrf.mxu1  ;;  %v3327_v0 = vpop.f32.mrf.mxu0 }
0x1e90   :  { %v3334_v23 = vadd.f32 %v3327_v0, %v6771_v41 }
0x1e91   :  { %v5661_v37 = vpop.f32.mrf.mxu1  ;;  %v5666_v38 = vpop.f32.mrf.mxu0 }
0x1e93   :  { %v3330_v30 = vpop.f32.mrf.mxu0  ;;  %v3379_v21 = vpop.f32.mrf.mxu1 }
0x1e94   :  { %v3435_v34 = vsel %vm157_vm2, %v3379_v21, -inf }
0x1e95   :  { %v5667_v36 = vpop.f32.mrf.mxu0  ;;  %3436 = vmax.xlane.f32.xlu0 %v3435_v34  ;;  %v5672_v42 = vpop.f32.mrf.mxu1 }
0x1e96   :  { %v5902_v42 = vld [vmem:[#allocation5 + $0x150] ss:$8 sps:$4 sm:$0xff]  }
0x1e97   :  { %v3382_v43 = vpop.f32.mrf.mxu1  ;;  %v3429_v44 = vpop.f32.mrf.mxu0 }
0x1e98   :  { %v3438_v20 = vsel %vm157_vm2, %v3429_v44, -inf  ;;  %v5904_v43 = vld [vmem:[#allocation5 + $0x190] ss:$8 sps:$4 sm:$0xff]  }
0x1e99   :  { %3439 = vmax.xlane.f32.xlu1 %v3438_v20  ;;  %v5673_v35 = vpop.f32.mrf.mxu1  ;;  %v5678_v46 = vpop.f32.mrf.mxu0 }
0x1e9b   :  { %v3432_v56 = vpop.f32.mrf.mxu0 }
0x1e9d   :  { %v5679_v49 = vpop.f32.mrf.mxu0 }
0x1eaa   :  { %3459 = vrot.lane.b32.xlu1 %v6715_v32, %s6188_s9 }
0x1f1e   :  { %v3437_v41 = vpop.xlane.xlu0 %3436 }
0x1f1f   :  { %v3441_v11 = vsub.f32 %v3379_v21, %v3437_v41 }
0x1f21   :  { %v3443_v54 = vmul.f32 1.442695, %v3441_v11 }
0x1f22   :  { %v3440_v55 = vpop.xlane.xlu1 %3439 }
0x1f23   :  { %6022 = vpow2.f32 %v3443_v54  ;;  %v3442_v57 = vsub.f32 %v3429_v44, %v3440_v55  ;;  %v5905_v44 = vld [vmem:[#allocation5 + $0x180] ss:$8 sps:$4 sm:$0xff]  }
0x1f24   :  { %v3562_v55 = vld [vmem:[#allocation7 + $0x23] ss:$0 sm:$0xff] }
0x1f25   :  { %v3445_v5 = vmul.f32 1.442695, %v3442_v57 }
0x1f26   :  { %v3460_v58 = vpop.permute.xlu1 %3459 }
0x1f27   :  { %6024 = vpow2.f32 %v3445_v5  ;;  %v3465_v40 = vsel %vm405_vm3, %v3460_v58, 0 }
0x1f28   :  { %5681 = vmatpush3.bf16.msra.mxu1 %v3465_v40  ;;  %v3563_v40 = vld [vmem:[#allocation7 + $0x24] ss:$0 sm:$0xff] }
0x1f29   :  { %5692 = vmatprep.subr.bf16.mxu1 %v6178_v10 }
0x1f30   :  { %v6023_v61 = vpop.eup %6022 }
0x1f31   :  { %v3447_v62 = vsel %vm157_vm2, %v6023_v61, 0.0 }
0x1f32   :  { %3448 = vadd.xlane.f32.xlu0 %v3447_v62 }
0x1f34   :  { %v6025_v63 = vpop.eup %6024 }
0x1f35   :  { %v3450_v32 = vsel %vm157_vm2, %v6025_v63, 0.0 }
0x1f36   :  { %3451 = vadd.xlane.f32.xlu0 %v3450_v32 }
0x1f4c   :  { %3507 = vrot.lane.b32.xlu0 %v6731_v51, %s6188_s9 }
0x1fbb   :  { %v3449_v2 = vpop.xlane.xlu0 %3448 }
0x1fbc   :  { %6026 = vrcp.f32 %v3449_v2  ;;  %v5906_v2 = vld [vmem:[#allocation5 + $0x170] ss:$8 sps:$4 sm:$0xff]  }
0x1fbf   :  { %v3452_v3 = vpop.xlane.xlu0 %3451 }
0x1fc0   :  { %6028 = vrcp.f32 %v3452_v3  ;;  %v5907_v3 = vld [vmem:[#allocation5 + $0x160] ss:$8 sps:$4 sm:$0xff]  }
0x1fc3   :  { %v3508_v15 = vpop.permute.xlu0 %3507 }
0x1fc4   :  { %v3513_v39 = vsel %vm405_vm3, %v3508_v15, 0  ;;  %v3599_v15 = vld [vmem:[#allocation7 + $0x25] ss:$0 sm:$0xff] }
0x1fc5   :  { %5687 = vmatpush3.bf16.msra.mxu0 %v3513_v39 }
0x1fc6   :  { %5700 = vmatprep.subr.bf16.mxu0 %v6178_v10 }
0x1fc9   :  { %v6027_v48 = vpop.eup %6026 }
0x1fca   :  { %v3455_v4 = vmul.f32 %v6027_v48, %v6023_v61 }
0x1fcc   :  { %v3457_v52 = vpack.c.bf16 %v3455_v4, %v3455_v4  ;;  %v2607_v4 = vadd.f32 %v6707_v14, %v6664_v45  ;;  %v3667_v45 = vld [vmem:[#allocation7 + $0x26] ss:$0 sm:$0xff] }
0x1fcd   :  { %v6029_v59 = vpop.eup %6028 }
0x1fce   :  { %5683 = vmatmul.mubr.msk.bf16.vlgmr.msra.gmra.mxu1 %vm157_vm2, %v3457_v52  ;;  %v3456_v8 = vmul.f32 %v6029_v59, %v6025_v63 }
0x1fcf   :  { %5696 = vmatprep.mubr.msk.bf16.mxu1 %vm6179_vm1, %v6178_v10  ;;  %5693 = vmatpush3.bf16.msra.mxu1 %v5902_v42 }
0x1fd0   :  { %v3458_v51 = vpack.c.bf16 %v3456_v8, %v3456_v8  ;;  %5694 = vmatprep.subr.bf16.mxu1 %v6178_v10 }
0x1fd2   :  { %5689 = vmatmul.mubr.msk.bf16.vlgmr.msra.gmra.mxu0 %vm157_vm2, %v3458_v51 }
0x1fd3   :  { %5708 = vmatprep.mubr.msk.bf16.mxu0 %vm6179_vm1, %v6178_v10  ;;  %5701 = vmatpush3.bf16.msra.mxu0 %v5904_v43 }
0x1fd4   :  { %5702 = vmatprep.subr.bf16.mxu0 %v6178_v10 }
0x1fd7   :  { %5703 = vmatpush3.bf16.msra.mxu0 %v5905_v44 }
0x1fd8   :  { %5704 = vmatprep.subr.bf16.mxu0 %v6178_v10 }
0x1fdb   :  { %5705 = vmatpush3.bf16.msra.mxu0 %v5906_v2 }
0x1fdc   :  { %5706 = vmatprep.subr.bf16.mxu0 %v6178_v10 }
0x1fdf   :  { %5707 = vmatpush3.bf16.msra.mxu0 %v5907_v3 }
0x1fe0   :  { %5726 = vmatprep.subr.bf16.mxu0 %v6178_v10 }
0x208e   :  { %v3501_v9 = vpop.f32.mrf.mxu1 }
0x208f   :  { %v3555_v6 = vadd.f32 %v3501_v9, %v3333_v60  ;;  %v6846_v9 = vpack.c.bf16 %v2607_v4, %v2607_v4 }
0x2090   :  { %v5684_v1 = vpop.f32.mrf.mxu1 }
0x2091   :  { %v3558_v16 = vadd.f32 %v3557_v12, %v3555_v6 }
0x2092   :  { %v3504_v17 = vpop.f32.mrf.mxu1  ;;  %v3549_v7 = vpop.f32.mrf.mxu0 }
0x2093   :  { %v3556_v18 = vadd.f32 %v3549_v7, %v3334_v23  ;;  %v3560_v47 = vadd.f32 %v3558_v16, %v6632_v25  ;;  %v3888_v16 = vsel %vm157_vm2, %v6846_v9, 0 }
0x2094   :  { %v5685_v19 = vpop.f32.mrf.mxu1  ;;  %v5690_v22 = vpop.f32.mrf.mxu0 }
0x2095   :  { %v3559_v27 = vadd.f32 %v3557_v12, %v3556_v18  ;;  %v3564_v29 = vsel %vm96_vm0, %v3560_v47, 0.0 }
0x2096   :  { %v3552_v31 = vpop.f32.mrf.mxu0  ;;  %3565 = vadd.xlane.f32.xlu1 %v3564_v29 }
0x2097   :  { %v3561_v33 = vadd.f32 %v3559_v27, %v6634_v26  ;;  %v5903_v26 = vld [vmem:[#allocation5 + $0x140] ss:$8 sps:$4 sm:$0xff]  }
0x2098   :  { %v5691_v24 = vpop.f32.mrf.mxu0  ;;  %5695 = vmatpush3.bf16.msra.mxu1 %v5903_v26 }
0x2099   :  { %v3567_v28 = vsel %vm96_vm0, %v3561_v33, 0.0  ;;  %5712 = vmatprep.subr.bf16.mxu1 %v6178_v10 }
0x209a   :  { %3568 = vadd.xlane.f32.xlu0 %v3567_v28 }
0x211f   :  { %v3566_v60 = vpop.xlane.xlu1 %3565 }
0x2120   :  { %v3570_v0 = vmul.f32 0.03125, %v3566_v60 }
0x2122   :  { %v3572_v37 = vsub.f32 %v3560_v47, %v3570_v0 }
0x2123   :  { %v3569_v38 = vpop.xlane.xlu0 %3568 }
0x2124   :  { %v3571_v23 = vmul.f32 0.03125, %v3569_v38  ;;  %v3574_v30 = vmul.f32 %v3572_v37, %v3572_v37 }
0x2126   :  { %v3573_v25 = vsub.f32 %v3561_v33, %v3571_v23  ;;  %v3576_v21 = vsel %vm96_vm0, %v3574_v30, 0.0 }
0x2127   :  { %3577 = vadd.xlane.f32.xlu1 %v3576_v21  ;;  %v6860_v21 = vpack.c.bf16 %v6674_v50, %v6674_v50 }
0x2128   :  { %v3575_v34 = vmul.f32 %v3573_v25, %v3573_v25 }
0x212a   :  { %v3579_v36 = vsel %vm96_vm0, %v3575_v34, 0.0  ;;  %v5908_v34 = vld [vmem:[#allocation5 + $0x1b0] ss:$8 sps:$4 sm:$0xff]  }
0x212b   :  { %3580 = vadd.xlane.f32.xlu0 %v3579_v36  ;;  %v5909_v36 = vld [vmem:[#allocation5 + $0x1a0] ss:$8 sps:$4 sm:$0xff]  }
0x21b0   :  { %v3578_v20 = vpop.xlane.xlu1 %3577 }
0x21b1   :  { %v3582_v35 = vmul.f32 0.03125, %v3578_v20 }
0x21b3   :  { %v3584_v46 = vadd.f32 1e-05, %v3582_v35 }
0x21b4   :  { %v3581_v56 = vpop.xlane.xlu0 %3580 }
0x21b5   :  { %6030 = vrsqrt.f32 %v3584_v46  ;;  %v3583_v49 = vmul.f32 0.03125, %v3581_v56  ;;  %v3738_v56 = vld [vmem:[#allocation7 + $0x27] ss:$0 sm:$0xff] }
0x21b7   :  { %v3585_v41 = vadd.f32 1e-05, %v3583_v49 }
0x21b9   :  { %6032 = vrsqrt.f32 %v3585_v41 }
0x21c2   :  { %v6031_v11 = vpop.eup %6030 }
0x21c3   :  { %v3588_v54 = vmul.f32 %v6031_v11, %v3572_v37 }
0x21c5   :  { %v3590_v5 = vmul.f32 %v3588_v54, %v3562_v55  ;;  %v3739_v54 = vld [vmem:[#allocation7 + $0x30] ss:$0 sm:$0xff] }
0x21c6   :  { %v6033_v57 = vpop.eup %6032 }
0x21c7   :  { %v3589_v58 = vmul.f32 %v6033_v57, %v3573_v25  ;;  %v3592_v62 = vadd.f32 %v3590_v5, %v3563_v40 }
0x21c9   :  { %v3591_v61 = vmul.f32 %v3589_v58, %v3562_v55 }
0x21cb   :  { %v3593_v63 = vadd.f32 %v3591_v61, %v3563_v40  ;;  %v3842_v40 = vsel %vm157_vm2, %v6860_v21, 0  ;;  %v3775_v61 = vld [vmem:[#allocation7 + $0x31] ss:$0 sm:$0xff] }
0x21cd   :  { %v3594_v32 = vpack.c.bf16 %v3593_v63, %v3592_v62 }
0x21cf   :  { %5697 = vmatmul.mubr.msk.bf16.vlgmr.msra.gmra.mxu1 %vm96_vm0, %v3594_v32 }
0x21d0   :  { %5716 = vmatprep.mubr.msk.bf16.mxu1 %vm6179_vm1, %v6178_v10  ;;  %5713 = vmatpush3.bf16.msra.mxu1 %v5908_v34 }
0x21d1   :  { %5714 = vmatprep.subr.bf16.mxu1 %v6178_v10 }
0x21d4   :  { %5715 = vmatpush3.bf16.msra.mxu1 %v5909_v36 }
0x21d5   :  { %5720 = vmatprep.subr.bf16.mxu1 %v6178_v10 }
0x228f   :  { %v3649_v39 = vpop.f32.mrf.mxu1 }
0x2290   :  { %v3650_v52 = vadd.f32 %v3649_v39, %v3599_v15 }
0x2291   :  { %v5698_v48 = vpop.f32.mrf.mxu1 }
0x2292   :  { %v3656_v12 = vmax.f32 %v3650_v52, 0.0 }
0x2293   :  { %v3652_v59 = vpop.f32.mrf.mxu1 }
0x2294   :  { %v3653_v8 = vadd.f32 %v3652_v59, %v3599_v15 }
0x2295   :  { %v5699_v51 = vpop.f32.mrf.mxu1 }
0x2296   :  { %v3657_v6 = vmax.f32 %v3653_v8, 0.0 }
0x2298   :  { %v3658_v1 = vpack.c.bf16 %v3657_v6, %v3656_v12 }
0x229a   :  { %5709 = vmatmul.mubr.msk.bf16.vlgmr.msra.gmra.mxu0 %vm1169_vm4, %v3658_v1 }
0x229b   :  { %5727 = vmatpush3.bf16.xpose.msra.mxu0 %v3888_v16  ;;  %5728 = vmatprep.mubr.msk.bf16.mxu0 %vm6179_vm1, %v6178_v10 }
0x229c   :  { %5738 = vmatprep.subr.bf16.mxu0 %v6178_v10 }
0x235a   :  { %v3729_v14 = vpop.f32.mrf.mxu0 }
0x235b   :  { %v3730_v17 = vadd.f32 %v3729_v14, %v3667_v45 }
0x235c   :  { %v5710_v7 = vpop.f32.mrf.mxu0 }
0x235d   :  { %v3736_v18 = vadd.f32 %v3730_v17, %v3592_v62 }
0x235e   :  { %v3732_v47 = vpop.f32.mrf.mxu0 }
0x235f   :  { %v3733_v19 = vadd.f32 %v3732_v47, %v3667_v45  ;;  %v3740_v22 = vsel %vm96_vm0, %v3736_v18, 0.0 }
0x2360   :  { %3741 = vadd.xlane.f32.xlu1 %v3740_v22  ;;  %v5711_v27 = vpop.f32.mrf.mxu0 }
0x2361   :  { %v3737_v29 = vadd.f32 %v3733_v19, %v3593_v63 }
0x2363   :  { %v3743_v31 = vsel %vm96_vm0, %v3737_v29, 0.0 }
0x2364   :  { %3744 = vadd.xlane.f32.xlu0 %v3743_v31 }
0x23e9   :  { %v3742_v33 = vpop.xlane.xlu1 %3741 }
0x23ea   :  { %v3746_v24 = vmul.f32 0.03125, %v3742_v33 }
0x23ec   :  { %v3748_v28 = vsub.f32 %v3736_v18, %v3746_v24 }
0x23ed   :  { %v3745_v60 = vpop.xlane.xlu0 %3744 }
0x23ee   :  { %v3747_v0 = vmul.f32 0.03125, %v3745_v60  ;;  %v3750_v37 = vmul.f32 %v3748_v28, %v3748_v28 }
0x23f0   :  { %v3749_v38 = vsub.f32 %v3737_v29, %v3747_v0  ;;  %v3752_v23 = vsel %vm96_vm0, %v3750_v37, 0.0 }
0x23f1   :  { %3753 = vadd.xlane.f32.xlu1 %v3752_v23 }
0x23f2   :  { %v3751_v30 = vmul.f32 %v3749_v38, %v3749_v38 }
0x23f4   :  { %v3755_v25 = vsel %vm96_vm0, %v3751_v30, 0.0 }
0x23f5   :  { %3756 = vadd.xlane.f32.xlu0 %v3755_v25 }
0x2402   :  { %3956 = vrot.lane.b32.xlu1 %v6860_v21, %s6182_s30 }
0x240b   :  { %4006 = vrot.lane.b32.xlu0 %v6846_v9, %s6182_s30 }
0x247a   :  { %v3754_v42 = vpop.xlane.xlu1 %3753 }
0x247b   :  { %v3758_v26 = vmul.f32 0.03125, %v3754_v42 }
0x247d   :  { %v3760_v43 = vadd.f32 1e-05, %v3758_v26 }
0x247e   :  { %v3757_v44 = vpop.xlane.xlu0 %3756  ;;  %v3957_v32 = vpop.permute.xlu1 %3956 }
0x247f   :  { %6034 = vrsqrt.f32 %v3760_v43  ;;  %v3759_v50 = vmul.f32 0.03125, %v3757_v44  ;;  %v3962_v39 = vsel %vm157_vm2, %v3957_v32, 0 }
0x2481   :  { %v3761_v20 = vadd.f32 1e-05, %v3759_v50 }
0x2482   :  { %v4007_v4 = vpop.permute.xlu0 %4006 }
0x2483   :  { %6036 = vrsqrt.f32 %v3761_v20  ;;  %v4012_v8 = vsel %vm157_vm2, %v4007_v4, 0 }
0x248c   :  { %v6035_v35 = vpop.eup %6034 }
0x248d   :  { %v3764_v46 = vmul.f32 %v6035_v35, %v3748_v28 }
0x248f   :  { %v3766_v41 = vmul.f32 %v3764_v46, %v3738_v56 }
0x2490   :  { %v6037_v49 = vpop.eup %6036 }
0x2491   :  { %v3765_v11 = vmul.f32 %v6037_v49, %v3749_v38  ;;  %v6868_v57 = vadd.f32 %v3766_v41, %v3739_v54  ;;  %v6912_v38 = vpack.c.bf16 %v6670_v13, %v6670_v13 }
0x2493   :  { %v3767_v55 = vmul.f32 %v3765_v11, %v3738_v56 }
0x2495   :  { %v6870_v5 = vadd.f32 %v3767_v55, %v3739_v54 }
0x2497   :  { %v3770_v58 = vpack.c.bf16 %v6870_v5, %v6868_v57 }
0x2499   :  { %5717 = vmatmul.mubr.msk.bf16.vlgmr.msra.gmra.mxu1 %vm96_vm0, %v3770_v58 }
0x249a   :  { %5721 = vmatpush3.bf16.xpose.msra.mxu1 %v3842_v40  ;;  %5722 = vmatprep.mubr.msk.bf16.mxu1 %vm6179_vm1, %v6178_v10 }
0x249b   :  { %5732 = vmatprep.subr.bf16.mxu1 %v6178_v10 }
0x2559   :  { %v3825_v62 = vpop.f32.mrf.mxu1 }
0x255a   :  { %v3826_v63 = vadd.f32 %v3825_v62, %v3775_v61 }
0x255b   :  { %v5718_v2 = vpop.f32.mrf.mxu1 }
0x255c   :  { %v6880_v3 = vpack.c.bf16 %v3826_v63, %v3826_v63 }
0x255d   :  { %v3828_v15 = vpop.f32.mrf.mxu1 }
0x255e   :  { %v3829_v48 = vadd.f32 %v3828_v15, %v3775_v61  ;;  %3954 = vrot.lane.b32.xlu1 %v6880_v3, %s6182_s30  ;;  %5723 = vmatmul.mubr.msk.bf16.vlgmr.msra.gmra.mxu1 %vm157_vm2, %v6880_v3  ;;  %v6928_v61 = vpack.c.bf16 %v6684_v53, %v6684_v53 }
0x255f   :  { %5733 = vmatpush3.bf16.xpose.msra.mxu1 %v3962_v39  ;;  %v5719_v52 = vpop.f32.mrf.mxu1  ;;  %5734 = vmatprep.mubr.msk.bf16.mxu1 %vm6179_vm1, %v6178_v10 }
0x2560   :  { %v6889_v59 = vpack.c.bf16 %v3829_v48, %v3829_v48  ;;  %5744 = vmatprep.subr.bf16.mxu1 %v6178_v10 }
0x2562   :  { %4004 = vrot.lane.b32.xlu1 %v6889_v59, %s6182_s30  ;;  %5729 = vmatmul.mubr.msk.bf16.vlgmr.msra.gmra.mxu0 %vm157_vm2, %v6889_v59 }
0x2563   :  { %5739 = vmatpush3.bf16.xpose.msra.mxu0 %v4012_v8  ;;  %5740 = vmatprep.mubr.msk.bf16.mxu0 %vm6179_vm1, %v6178_v10 }
0x2564   :  { %5750 = vmatprep.subr.bf16.mxu0 %v6178_v10 }
0x25d0   :  { %v3955_v51 = vpop.permute.xlu1 %3954 }
0x25d1   :  { %5735 = vmatmul.mubr.msk.bf16.vlgmr.msra.gmra.mxu1 %vm157_vm2, %v3955_v51 }
0x25d2   :  { %5746 = vmatprep.mubr.msk.bf16.mxu1 %vm6179_vm1, %v6178_v10 }
0x25d4   :  { %v4005_v12 = vpop.permute.xlu1 %4004 }
0x25d5   :  { %5741 = vmatmul.mubr.msk.bf16.vlgmr.msra.gmra.mxu0 %vm157_vm2, %v4005_v12  ;;  %v4178_v12 = vsel %vm405_vm3, %v6912_v38, 0 }
0x25d6   :  { %5752 = vmatprep.mubr.msk.bf16.mxu0 %vm6179_vm1, %v6178_v10 }
0x261e   :  { %v3878_v6 = vpop.f32.mrf.mxu1 }
0x261f   :  { %v3930_v33 = vsel %vm157_vm2, %v3878_v6, -inf }
0x2620   :  { %v5724_v1 = vpop.f32.mrf.mxu1 }
0x2622   :  { %v3881_v16 = vpop.f32.mrf.mxu1  ;;  %v3924_v45 = vpop.f32.mrf.mxu0 }
0x2623   :  { %v3933_v0 = vsel %vm157_vm2, %v3924_v45, -inf }
0x2624   :  { %v5725_v14 = vpop.f32.mrf.mxu1  ;;  %v5730_v17 = vpop.f32.mrf.mxu0 }
0x2625   :  { %v4224_v14 = vsel %vm405_vm3, %v6928_v61, 0 }
0x2626   :  { %v3927_v7 = vpop.f32.mrf.mxu0 }
0x2628   :  { %v5731_v18 = vpop.f32.mrf.mxu0 }
0x2691   :  { %v3998_v47 = vpop.f32.mrf.mxu1 }
0x2692   :  { %v4054_v19 = vsel %vm157_vm2, %v3998_v47, -inf }
0x2693   :  { %4055 = vmax.xlane.f32.xlu0 %v4054_v19  ;;  %v5736_v22 = vpop.f32.mrf.mxu1 }
0x2695   :  { %v4001_v27 = vpop.f32.mrf.mxu1  ;;  %v4048_v29 = vpop.f32.mrf.mxu0 }
0x2696   :  { %v4057_v31 = vsel %vm157_vm2, %v4048_v29, -inf }
0x2697   :  { %4058 = vmax.xlane.f32.xlu1 %v4057_v31  ;;  %v5742_v24 = vpop.f32.mrf.mxu0  ;;  %3931 = vmax.xlane.f32.xlu0 %v3930_v33  ;;  %v5737_v28 = vpop.f32.mrf.mxu1 }
0x2699   :  { %v4051_v60 = vpop.f32.mrf.mxu0 }
0x269b   :  { %v5743_v37 = vpop.f32.mrf.mxu0  ;;  %3934 = vmax.xlane.f32.xlu0 %v3933_v0 }
0x26a8   :  { %4078 = vrot.lane.b32.xlu1 %v6912_v38, %s6181_s2 }
0x271c   :  { %v4056_v23 = vpop.xlane.xlu0 %4055 }
0x271d   :  { %v4060_v30 = vsub.f32 %v3998_v47, %v4056_v23 }
0x271f   :  { %v4062_v43 = vmul.f32 1.442695, %v4060_v30 }
0x2720   :  { %v4059_v25 = vpop.xlane.xlu1 %4058  ;;  %v3932_v34 = vpop.xlane.xlu0 %3931 }
0x2721   :  { %v3936_v36 = vsub.f32 %v3878_v6, %v3932_v34  ;;  %v4061_v42 = vsub.f32 %v4048_v29, %v4059_v25 }
0x2723   :  { %v3938_v26 = vmul.f32 1.442695, %v3936_v36  ;;  %v4064_v13 = vmul.f32 1.442695, %v4061_v42 }
0x2724   :  { %v4079_v44 = vpop.permute.xlu1 %4078  ;;  %v3935_v50 = vpop.xlane.xlu0 %3934 }
0x2725   :  { %v4084_v20 = vsel %vm405_vm3, %v4079_v44, 0  ;;  %v3937_v35 = vsub.f32 %v3924_v45, %v3935_v50  ;;  %6038 = vpow2.f32 %v3938_v26 }
0x2726   :  { %5745 = vmatpush3.bf16.msra.mxu1 %v4084_v20  ;;  %6040 = vpow2.f32 %v4062_v43 }
0x2727   :  { %v3940_v46 = vmul.f32 1.442695, %v3937_v35  ;;  %5756 = vmatprep.subr.bf16.mxu1 %v6178_v10 }
0x2729   :  { %6042 = vpow2.f32 %v3940_v46 }
0x272a   :  { %6044 = vpow2.f32 %v4064_v13 }
0x2732   :  { %v6039_v56 = vpop.eup %6038 }
0x2733   :  { %v3942_v49 = vsel %vm157_vm2, %v6039_v56, 0.0  ;;  %v6041_v41 = vpop.eup %6040 }
0x2734   :  { %3943 = vadd.xlane.f32.xlu1 %v3942_v49  ;;  %v4066_v58 = vsel %vm157_vm2, %v6041_v41, 0.0 }
0x2736   :  { %v6043_v11 = vpop.eup %6042 }
0x2737   :  { %v3945_v54 = vsel %vm157_vm2, %v6043_v11, 0.0  ;;  %v6045_v55 = vpop.eup %6044 }
0x2738   :  { %3946 = vadd.xlane.f32.xlu0 %v3945_v54  ;;  %4067 = vadd.xlane.f32.xlu1 %v4066_v58  ;;  %v4069_v40 = vsel %vm157_vm2, %v6045_v55, 0.0 }
0x273c   :  { %4070 = vadd.xlane.f32.xlu0 %v4069_v40 }
0x2749   :  { %4268 = vrot.lane.b32.xlu1 %v6860_v21, %s6184_s5 }
0x274d   :  { %4318 = vrot.lane.b32.xlu1 %v6846_v9, %s6184_s5 }
0x2751   :  { %4316 = vrot.lane.b32.xlu1 %v6889_v59, %s6184_s5 }
0x2752   :  { %4126 = vrot.lane.b32.xlu0 %v6928_v61, %s6181_s2 }
0x2756   :  { %4266 = vrot.lane.b32.xlu0 %v6880_v3, %s6184_s5 }
0x27bd   :  { %v3944_v62 = vpop.xlane.xlu1 %3943 }
0x27c1   :  { %v3947_v63 = vpop.xlane.xlu0 %3946  ;;  %v4068_v32 = vpop.xlane.xlu1 %4067 }
0x27c2   :  { %6046 = vrcp.f32 %v4068_v32 }
0x27c5   :  { %v4071_v2 = vpop.xlane.xlu0 %4070  ;;  %v4269_v45 = vpop.permute.xlu1 %4268 }
0x27c6   :  { %6048 = vrcp.f32 %v4071_v2  ;;  %v4274_v18 = vsel %vm157_vm2, %v4269_v45, 0 }
0x27c7   :  { %6050 = vrcp.f32 %v3944_v62 }
0x27c8   :  { %6052 = vrcp.f32 %v3947_v63 }
0x27c9   :  { %v4127_v15 = vpop.permute.xlu0 %4126  ;;  %v4319_v47 = vpop.permute.xlu1 %4318 }
0x27ca   :  { %v4132_v53 = vsel %vm405_vm3, %v4127_v15, 0  ;;  %v4324_v22 = vsel %vm157_vm2, %v4319_v47, 0 }
0x27cb   :  { %5751 = vmatpush3.bf16.msra.mxu0 %v4132_v53 }
0x27cc   :  { %5762 = vmatprep.subr.bf16.mxu0 %v6178_v10 }
0x27cd   :  { %v4267_v27 = vpop.permute.xlu0 %4266  ;;  %v4317_v29 = vpop.permute.xlu1 %4316 }
0x27cf   :  { %v6047_v39 = vpop.eup %6046 }
0x27d0   :  { %v4074_v48 = vmul.f32 %v6047_v39, %v6041_v41 }
0x27d2   :  { %v4076_v52 = vpack.c.bf16 %v4074_v48, %v4074_v48 }
0x27d3   :  { %v6049_v4 = vpop.eup %6048 }
0x27d4   :  { %v6051_v8 = vpop.eup %6050  ;;  %v4075_v51 = vmul.f32 %v6049_v4, %v6045_v55  ;;  %5747 = vmatmul.mubr.msk.bf16.vlgmr.msra.gmra.mxu1 %vm157_vm2, %v4076_v52 }
0x27d5   :  { %5757 = vmatpush3.bf16.msra.mxu1 %v4178_v12  ;;  %5758 = vmatprep.mubr.msk.bf16.mxu1 %vm6179_vm1, %v6178_v10  ;;  %v6053_v1 = vpop.eup %6052  ;;  %v3950_v16 = vmul.f32 %v6051_v8, %v6039_v56 }
0x27d6   :  { %v4077_v6 = vpack.c.bf16 %v4075_v51, %v4075_v51  ;;  %5768 = vmatprep.subr.bf16.mxu1 %v6178_v10  ;;  %v3951_v17 = vmul.f32 %v6053_v1, %v6043_v11 }
0x27d7   :  { %v3952_v7 = vpack.c.bf16 %v3950_v16, %v3950_v16 }
0x27d8   :  { %5753 = vmatmul.mubr.msk.bf16.vlgmr.msra.gmra.mxu0 %vm157_vm2, %v4077_v6  ;;  %v3953_v19 = vpack.c.bf16 %v3951_v17, %v3951_v17 }
0x27d9   :  { %5763 = vmatpush3.bf16.msra.mxu0 %v4224_v14  ;;  %5764 = vmatprep.mubr.msk.bf16.mxu0 %vm6179_vm1, %v6178_v10 }
0x27da   :  { %5774 = vmatprep.subr.bf16.mxu0 %v6178_v10 }
0x27dc   :  { %5759 = vmatmul.mubr.msk.bf16.vlgmr.msra.gmra.mxu1 %vm157_vm2, %v3952_v7 }
0x27dd   :  { %5769 = vmatpush3.bf16.xpose.msra.mxu1 %v4274_v18  ;;  %5770 = vmatprep.mubr.msk.bf16.mxu1 %vm6179_vm1, %v6178_v10 }
0x27de   :  { %5780 = vmatprep.subr.bf16.mxu1 %v6178_v10 }
0x27e0   :  { %5765 = vmatmul.mubr.msk.bf16.vlgmr.msra.gmra.mxu0 %vm157_vm2, %v3953_v19 }
0x27e1   :  { %5775 = vmatpush3.bf16.xpose.msra.mxu0 %v4324_v22  ;;  %5776 = vmatprep.mubr.msk.bf16.mxu0 %vm6179_vm1, %v6178_v10 }
0x27e2   :  { %5786 = vmatprep.subr.bf16.mxu0 %v6178_v10 }
0x27e4   :  { %5771 = vmatmul.mubr.msk.bf16.vlgmr.msra.gmra.mxu1 %vm157_vm2, %v4267_v27 }
0x27e5   :  { %5782 = vmatprep.mubr.msk.bf16.mxu1 %vm6179_vm1, %v6178_v10 }
0x27e8   :  { %5777 = vmatmul.mubr.msk.bf16.vlgmr.msra.gmra.mxu0 %vm157_vm2, %v4317_v29 }
0x27e9   :  { %5788 = vmatprep.mubr.msk.bf16.mxu0 %vm6179_vm1, %v6178_v10 }
0x2894   :  { %v4120_v31 = vpop.f32.mrf.mxu1 }
0x2896   :  { %v5748_v33 = vpop.f32.mrf.mxu1 }
0x2898   :  { %v4168_v24 = vpop.f32.mrf.mxu0  ;;  %v4123_v28 = vpop.f32.mrf.mxu1 }
0x289a   :  { %v5754_v60 = vpop.f32.mrf.mxu0  ;;  %v5749_v0 = vpop.f32.mrf.mxu1 }
0x289c   :  { %v4171_v37 = vpop.f32.mrf.mxu0  ;;  %v4214_v23 = vpop.f32.mrf.mxu1 }
0x289d   :  { %v6966_v30 = vadd.f32 %v4214_v23, %v4120_v31 }
0x289e   :  { %v5755_v25 = vpop.f32.mrf.mxu0  ;;  %v5760_v34 = vpop.f32.mrf.mxu1 }
0x28a0   :  { %v4260_v36 = vpop.f32.mrf.mxu0  ;;  %v4217_v42 = vpop.f32.mrf.mxu1 }
0x28a1   :  { %v6968_v26 = vadd.f32 %v4260_v36, %v4168_v24 }
0x28a2   :  { %v5766_v43 = vpop.f32.mrf.mxu0  ;;  %v5761_v44 = vpop.f32.mrf.mxu1 }
0x28a4   :  { %v4263_v50 = vpop.f32.mrf.mxu0  ;;  %v4310_v20 = vpop.f32.mrf.mxu1 }
0x28a5   :  { %v4366_v13 = vsel %vm157_vm2, %v4310_v20, -inf }
0x28a6   :  { %v5767_v35 = vpop.f32.mrf.mxu0  ;;  %4367 = vmax.xlane.f32.xlu0 %v4366_v13  ;;  %v5772_v46 = vpop.f32.mrf.mxu1 }
0x28a8   :  { %v4360_v56 = vpop.f32.mrf.mxu0  ;;  %v4313_v49 = vpop.f32.mrf.mxu1 }
0x28a9   :  { %v4369_v41 = vsel %vm157_vm2, %v4360_v56, -inf }
0x28aa   :  { %4370 = vmax.xlane.f32.xlu1 %v4369_v41  ;;  %v5778_v11 = vpop.f32.mrf.mxu0  ;;  %v5773_v54 = vpop.f32.mrf.mxu1 }
0x28ac   :  { %v4363_v55 = vpop.f32.mrf.mxu0 }
0x28ae   :  { %v5779_v58 = vpop.f32.mrf.mxu0 }
0x28bb   :  { %4390 = vrot.lane.b32.xlu1 %v6912_v38, %s6185_s6 }
0x28bf   :  { %4490 = vrot.lane.b32.xlu1 %v6860_v21, %s6187_s8 }
0x28c3   :  { %4540 = vrot.lane.b32.xlu1 %v6846_v9, %s6187_s8 }
0x28c7   :  { %4538 = vrot.lane.b32.xlu1 %v6889_v59, %s6187_s8 }
0x292f   :  { %v4368_v40 = vpop.xlane.xlu0 %4367 }
0x2930   :  { %v4372_v62 = vsub.f32 %v4310_v20, %v4368_v40 }
0x2932   :  { %v4374_v63 = vmul.f32 1.442695, %v4372_v62 }
0x2933   :  { %v4371_v32 = vpop.xlane.xlu1 %4370 }
0x2934   :  { %v4373_v2 = vsub.f32 %v4360_v56, %v4371_v32  ;;  %6054 = vpow2.f32 %v4374_v63 }
0x2936   :  { %v4376_v15 = vmul.f32 1.442695, %v4373_v2 }
0x2937   :  { %v4391_v53 = vpop.permute.xlu1 %4390 }
0x2938   :  { %6056 = vpow2.f32 %v4376_v15  ;;  %v4396_v39 = vsel %vm405_vm3, %v4391_v53, 0 }
0x2939   :  { %5781 = vmatpush3.bf16.msra.mxu1 %v4396_v39 }
0x293a   :  { %5792 = vmatprep.subr.bf16.mxu1 %v6178_v10 }
0x293b   :  { %v4491_v6 = vpop.permute.xlu1 %4490 }
0x293c   :  { %v4496_v14 = vsel %vm157_vm2, %v4491_v6, 0 }
0x2941   :  { %v6055_v21 = vpop.eup %6054 }
0x2942   :  { %v4378_v9 = vsel %vm157_vm2, %v6055_v21, 0.0 }
0x2943   :  { %4379 = vadd.xlane.f32.xlu0 %v4378_v9 }
0x2945   :  { %v6057_v48 = vpop.eup %6056 }
0x2946   :  { %v4381_v59 = vsel %vm157_vm2, %v6057_v48, 0.0 }
0x2947   :  { %4382 = vadd.xlane.f32.xlu0 %v4381_v59 }
0x295d   :  { %4438 = vrot.lane.b32.xlu0 %v6928_v61, %s6185_s6 }
0x2961   :  { %4488 = vrot.lane.b32.xlu0 %v6880_v3, %s6187_s8  ;;  %v4541_v3 = vpop.permute.xlu1 %4540 }
0x2962   :  { %v4546_v18 = vsel %vm157_vm2, %v4541_v3, 0 }
0x2965   :  { %v4539_v19 = vpop.permute.xlu1 %4538 }
0x29cc   :  { %v4380_v4 = vpop.xlane.xlu0 %4379 }
0x29cd   :  { %6058 = vrcp.f32 %v4380_v4 }
0x29d0   :  { %v4383_v52 = vpop.xlane.xlu0 %4382 }
0x29d1   :  { %6060 = vrcp.f32 %v4383_v52 }
0x29d4   :  { %v4439_v8 = vpop.permute.xlu0 %4438 }
0x29d5   :  { %v4444_v51 = vsel %vm405_vm3, %v4439_v8, 0 }
0x29d6   :  { %5787 = vmatpush3.bf16.msra.mxu0 %v4444_v51 }
0x29d7   :  { %5798 = vmatprep.subr.bf16.mxu0 %v6178_v10 }
0x29d8   :  { %v4489_v47 = vpop.permute.xlu0 %4488 }
0x29da   :  { %v6059_v12 = vpop.eup %6058 }
0x29db   :  { %v4386_v1 = vmul.f32 %v6059_v12, %v6055_v21 }
0x29dd   :  { %v4388_v16 = vpack.c.bf16 %v4386_v1, %v4386_v1 }
0x29de   :  { %v6061_v45 = vpop.eup %6060 }
0x29df   :  { %v4387_v17 = vmul.f32 %v6061_v45, %v6057_v48  ;;  %5783 = vmatmul.mubr.msk.bf16.vlgmr.msra.gmra.mxu1 %vm157_vm2, %v4388_v16  ;;  %v4710_v48 = vld [vmem:[#allocation7 + $0x33] ss:$0 sm:$0xff] }
0x29e0   :  { %5793 = vmatpush3.bf16.xpose.msra.mxu1 %v4496_v14  ;;  %5794 = vmatprep.mubr.msk.bf16.mxu1 %vm6179_vm1, %v6178_v10 }
0x29e1   :  { %v4389_v7 = vpack.c.bf16 %v4387_v17, %v4387_v17  ;;  %5804 = vmatprep.subr.bf16.mxu1 %v6178_v10 }
0x29e3   :  { %5789 = vmatmul.mubr.msk.bf16.vlgmr.msra.gmra.mxu0 %vm157_vm2, %v4389_v7 }
0x29e4   :  { %5799 = vmatpush3.bf16.xpose.msra.mxu0 %v4546_v18  ;;  %5800 = vmatprep.mubr.msk.bf16.mxu0 %vm6179_vm1, %v6178_v10 }
0x29e5   :  { %5810 = vmatprep.subr.bf16.mxu0 %v6178_v10 }
0x29e7   :  { %5795 = vmatmul.mubr.msk.bf16.vlgmr.msra.gmra.mxu1 %vm157_vm2, %v4489_v47 }
0x29e8   :  { %5806 = vmatprep.mubr.msk.bf16.mxu1 %vm6179_vm1, %v6178_v10 }
0x29eb   :  { %5801 = vmatmul.mubr.msk.bf16.vlgmr.msra.gmra.mxu0 %vm157_vm2, %v4539_v19 }
0x29ec   :  { %5812 = vmatprep.mubr.msk.bf16.mxu0 %vm6179_vm1, %v6178_v10 }
0x2a9f   :  { %v4432_v22 = vpop.f32.mrf.mxu1 }
0x2aa0   :  { %v4486_v27 = vadd.f32 %v4432_v22, %v6966_v30 }
0x2aa1   :  { %v5784_v29 = vpop.f32.mrf.mxu1 }
0x2aa3   :  { %v4435_v31 = vpop.f32.mrf.mxu1  ;;  %v4480_v33 = vpop.f32.mrf.mxu0 }
0x2aa4   :  { %v4487_v24 = vadd.f32 %v4480_v33, %v6968_v26 }
0x2aa5   :  { %v5785_v28 = vpop.f32.mrf.mxu1  ;;  %v5790_v60 = vpop.f32.mrf.mxu0 }
0x2aa6   :  { %v5910_v60 = vld [vmem:[#allocation5 + $0x1f0] ss:$8 sps:$4 sm:$0xff]  }
0x2aa7   :  { %v4483_v0 = vpop.f32.mrf.mxu0  ;;  %v4532_v37 = vpop.f32.mrf.mxu1 }
0x2aa8   :  { %v4588_v23 = vsel %vm157_vm2, %v4532_v37, -inf  ;;  %v5912_v0 = vld [vmem:[#allocation5 + $0x230] ss:$8 sps:$4 sm:$0xff]  }
0x2aa9   :  { %v5791_v25 = vpop.f32.mrf.mxu0  ;;  %4589 = vmax.xlane.f32.xlu0 %v4588_v23  ;;  %v5796_v34 = vpop.f32.mrf.mxu1 }
0x2aab   :  { %v4535_v36 = vpop.f32.mrf.mxu1  ;;  %v4582_v42 = vpop.f32.mrf.mxu0 }
0x2aac   :  { %v4591_v43 = vsel %vm157_vm2, %v4582_v42, -inf }
0x2aad   :  { %4592 = vmax.xlane.f32.xlu1 %v4591_v43  ;;  %v5797_v30 = vpop.f32.mrf.mxu1  ;;  %v5802_v44 = vpop.f32.mrf.mxu0 }
0x2aae   :  { %v4715_v44 = vld [vmem:[#allocation7 + $0x34] ss:$0 sm:$0xff] }
0x2aaf   :  { %v4585_v50 = vpop.f32.mrf.mxu0 }
0x2ab1   :  { %v5803_v20 = vpop.f32.mrf.mxu0 }
0x2abe   :  { %4612 = vrot.lane.b32.xlu1 %v6912_v38, %s6188_s9 }
0x2b32   :  { %v4590_v26 = vpop.xlane.xlu0 %4589 }
0x2b33   :  { %v4594_v35 = vsub.f32 %v4532_v37, %v4590_v26 }
0x2b35   :  { %v4596_v13 = vmul.f32 1.442695, %v4594_v35  ;;  %v4716_v35 = vld [vmem:[#allocation7 + $0x35] ss:$0 sm:$0xff] }
0x2b36   :  { %v4593_v46 = vpop.xlane.xlu1 %4592 }
0x2b37   :  { %6062 = vpow2.f32 %v4596_v13  ;;  %v4595_v56 = vsub.f32 %v4582_v42, %v4593_v46 }
0x2b39   :  { %v4598_v49 = vmul.f32 1.442695, %v4595_v56 }
0x2b3a   :  { %v4613_v41 = vpop.permute.xlu1 %4612 }
0x2b3b   :  { %6064 = vpow2.f32 %v4598_v49  ;;  %v4618_v11 = vsel %vm405_vm3, %v4613_v41, 0  ;;  %v5913_v41 = vld [vmem:[#allocation5 + $0x220] ss:$8 sps:$4 sm:$0xff]  }
0x2b3c   :  { %5805 = vmatpush3.bf16.msra.mxu1 %v4618_v11  ;;  %v5914_v11 = vld [vmem:[#allocation5 + $0x210] ss:$8 sps:$4 sm:$0xff]  }
0x2b3d   :  { %5816 = vmatprep.subr.bf16.mxu1 %v6178_v10 }
0x2b44   :  { %v6063_v54 = vpop.eup %6062 }
0x2b45   :  { %v4600_v55 = vsel %vm157_vm2, %v6063_v54, 0.0 }
0x2b46   :  { %4601 = vadd.xlane.f32.xlu0 %v4600_v55  ;;  %v4752_v55 = vld [vmem:[#allocation7 + $0x36] ss:$0 sm:$0xff] }
0x2b48   :  { %v6065_v58 = vpop.eup %6064 }
0x2b49   :  { %v4603_v38 = vsel %vm157_vm2, %v6065_v58, 0.0 }
0x2b4a   :  { %4604 = vadd.xlane.f32.xlu0 %v4603_v38 }
0x2b60   :  { %4660 = vrot.lane.b32.xlu0 %v6928_v61, %s6188_s9 }
0x2bcf   :  { %v4602_v40 = vpop.xlane.xlu0 %4601 }
0x2bd0   :  { %6066 = vrcp.f32 %v4602_v40 }
0x2bd3   :  { %v4605_v62 = vpop.xlane.xlu0 %4604 }
0x2bd4   :  { %6068 = vrcp.f32 %v4605_v62 }
0x2bd7   :  { %v4661_v63 = vpop.permute.xlu0 %4660 }
0x2bd8   :  { %v4666_v32 = vsel %vm405_vm3, %v4661_v63, 0 }
0x2bd9   :  { %5811 = vmatpush3.bf16.msra.mxu0 %v4666_v32 }
0x2bda   :  { %5824 = vmatprep.subr.bf16.mxu0 %v6178_v10 }
0x2bdd   :  { %v6067_v2 = vpop.eup %6066 }
0x2bde   :  { %v4608_v15 = vmul.f32 %v6067_v2, %v6063_v54  ;;  %v5915_v54 = vld [vmem:[#allocation5 + $0x200] ss:$8 sps:$4 sm:$0xff]  }
0x2be0   :  { %v4610_v53 = vpack.c.bf16 %v4608_v15, %v4608_v15 }
0x2be1   :  { %v6069_v39 = vpop.eup %6068 }
0x2be2   :  { %v4609_v21 = vmul.f32 %v6069_v39, %v6065_v58  ;;  %5807 = vmatmul.mubr.msk.bf16.vlgmr.msra.gmra.mxu1 %vm157_vm2, %v4610_v53  ;;  %v4820_v39 = vld [vmem:[#allocation7 + $0x37] ss:$0 sm:$0xff] }
0x2be3   :  { %5820 = vmatprep.mubr.msk.bf16.mxu1 %vm6179_vm1, %v6178_v10  ;;  %5817 = vmatpush3.bf16.msra.mxu1 %v5910_v60 }
0x2be4   :  { %v4611_v61 = vpack.c.bf16 %v4609_v21, %v4609_v21  ;;  %5818 = vmatprep.subr.bf16.mxu1 %v6178_v10 }
0x2be6   :  { %5813 = vmatmul.mubr.msk.bf16.vlgmr.msra.gmra.mxu0 %vm157_vm2, %v4611_v61 }
0x2be7   :  { %5832 = vmatprep.mubr.msk.bf16.mxu0 %vm6179_vm1, %v6178_v10  ;;  %5825 = vmatpush3.bf16.msra.mxu0 %v5912_v0 }
0x2be8   :  { %5826 = vmatprep.subr.bf16.mxu0 %v6178_v10 }
0x2beb   :  { %5827 = vmatpush3.bf16.msra.mxu0 %v5913_v41 }
0x2bec   :  { %5828 = vmatprep.subr.bf16.mxu0 %v6178_v10 }
0x2bef   :  { %5829 = vmatpush3.bf16.msra.mxu0 %v5914_v11 }
0x2bf0   :  { %5830 = vmatprep.subr.bf16.mxu0 %v6178_v10 }
0x2bf3   :  { %5831 = vmatpush3.bf16.msra.mxu0 %v5915_v54 }
0x2ca2   :  { %v4654_v9 = vpop.f32.mrf.mxu1 }
0x2ca3   :  { %v4708_v59 = vadd.f32 %v4654_v9, %v4486_v27 }
0x2ca4   :  { %v5808_v4 = vpop.f32.mrf.mxu1 }
0x2ca5   :  { %v4711_v52 = vadd.f32 %v4710_v48, %v4708_v59 }
0x2ca6   :  { %v4657_v8 = vpop.f32.mrf.mxu1  ;;  %v4702_v51 = vpop.f32.mrf.mxu0 }
0x2ca7   :  { %v4709_v12 = vadd.f32 %v4702_v51, %v4487_v24  ;;  %v4713_v6 = vadd.f32 %v4711_v52, %v6868_v57 }
0x2ca8   :  { %v5809_v1 = vpop.f32.mrf.mxu1  ;;  %v5814_v16 = vpop.f32.mrf.mxu0 }
0x2ca9   :  { %v4712_v45 = vadd.f32 %v4710_v48, %v4709_v12  ;;  %v4717_v14 = vsel %vm96_vm0, %v4713_v6, 0.0 }
0x2caa   :  { %v4705_v17 = vpop.f32.mrf.mxu0  ;;  %4718 = vadd.xlane.f32.xlu1 %v4717_v14 }
0x2cab   :  { %v4714_v3 = vadd.f32 %v4712_v45, %v6870_v5  ;;  %v5911_v5 = vld [vmem:[#allocation5 + $0x1e0] ss:$8 sps:$4 sm:$0xff]  }
0x2cac   :  { %v5815_v7 = vpop.f32.mrf.mxu0  ;;  %5819 = vmatpush3.bf16.msra.mxu1 %v5911_v5  ;;  %v4891_v5 = vld [vmem:[#allocation7 + $0x40] ss:$0 sm:$0xff] }
0x2cad   :  { %v4720_v18 = vsel %vm96_vm0, %v4714_v3, 0.0  ;;  %5836 = vmatprep.subr.bf16.mxu1 %v6178_v10 }
0x2cae   :  { %4721 = vadd.xlane.f32.xlu0 %v4720_v18 }
0x2d33   :  { %v4719_v47 = vpop.xlane.xlu1 %4718 }
0x2d34   :  { %v4723_v19 = vmul.f32 0.03125, %v4719_v47 }
0x2d36   :  { %v4725_v22 = vsub.f32 %v4713_v6, %v4723_v19  ;;  %v5916_v19 = vld [vmem:[#allocation5 + $0x250] ss:$8 sps:$4 sm:$0xff]  }
0x2d37   :  { %v4722_v27 = vpop.xlane.xlu0 %4721 }
0x2d38   :  { %v4724_v29 = vmul.f32 0.03125, %v4722_v27  ;;  %v4727_v31 = vmul.f32 %v4725_v22, %v4725_v22 }
0x2d3a   :  { %v4726_v57 = vsub.f32 %v4714_v3, %v4724_v29  ;;  %v4729_v33 = vsel %vm96_vm0, %v4727_v31, 0.0 }
0x2d3b   :  { %4730 = vadd.xlane.f32.xlu1 %v4729_v33 }
0x2d3c   :  { %v4728_v24 = vmul.f32 %v4726_v57, %v4726_v57 }
0x2d3e   :  { %v4732_v28 = vsel %vm96_vm0, %v4728_v24, 0.0 }
0x2d3f   :  { %4733 = vadd.xlane.f32.xlu0 %v4732_v28 }
0x2dc4   :  { %v4731_v37 = vpop.xlane.xlu1 %4730 }
0x2dc5   :  { %v4735_v23 = vmul.f32 0.03125, %v4731_v37 }
0x2dc7   :  { %v4737_v25 = vadd.f32 1e-05, %v4735_v23 }
0x2dc8   :  { %v4734_v34 = vpop.xlane.xlu0 %4733 }
0x2dc9   :  { %6070 = vrsqrt.f32 %v4737_v25  ;;  %v4736_v36 = vmul.f32 0.03125, %v4734_v34  ;;  %v4892_v25 = vld [vmem:[#allocation7 + $0x41] ss:$0 sm:$0xff] }
0x2dcb   :  { %v4738_v42 = vadd.f32 1e-05, %v4736_v36 }
0x2dcd   :  { %6072 = vrsqrt.f32 %v4738_v42 }
0x2dd6   :  { %v6071_v43 = vpop.eup %6070 }
0x2dd7   :  { %v4741_v30 = vmul.f32 %v6071_v43, %v4725_v22  ;;  %v5917_v22 = vld [vmem:[#allocation5 + $0x240] ss:$8 sps:$4 sm:$0xff]  }
0x2dd8   :  { %v4928_v43 = vld [vmem:[#allocation7 + $0x42] ss:$0 sm:$0xff] }
0x2dd9   :  { %v4743_v20 = vmul.f32 %v4741_v30, %v4715_v44 }
0x2dda   :  { %v6073_v50 = vpop.eup %6072 }
0x2ddb   :  { %v4742_v26 = vmul.f32 %v6073_v50, %v4726_v57  ;;  %v4745_v46 = vadd.f32 %v4743_v20, %v4716_v35 }
0x2ddd   :  { %v4744_v13 = vmul.f32 %v4742_v26, %v4715_v44 }
0x2ddf   :  { %v4746_v56 = vadd.f32 %v4744_v13, %v4716_v35 }
0x2de1   :  { %v4747_v49 = vpack.c.bf16 %v4746_v56, %v4745_v46 }
0x2de3   :  { %5821 = vmatmul.mubr.msk.bf16.vlgmr.msra.gmra.mxu1 %vm96_vm0, %v4747_v49 }
0x2de4   :  { %5840 = vmatprep.mubr.msk.bf16.mxu1 %vm6179_vm1, %v6178_v10  ;;  %5837 = vmatpush3.bf16.msra.mxu1 %v5916_v19 }
0x2de5   :  { %5838 = vmatprep.subr.bf16.mxu1 %v6178_v10 }
0x2de8   :  { %5839 = vmatpush3.bf16.msra.mxu1 %v5917_v22 }
0x2ea3   :  { %v4802_v58 = vpop.f32.mrf.mxu1 }
0x2ea4   :  { %v4803_v40 = vadd.f32 %v4802_v58, %v4752_v55 }
0x2ea5   :  { %v5822_v38 = vpop.f32.mrf.mxu1 }
0x2ea6   :  { %v4809_v2 = vmax.f32 %v4803_v40, 0.0 }
0x2ea7   :  { %v4805_v62 = vpop.f32.mrf.mxu1 }
0x2ea8   :  { %v4806_v63 = vadd.f32 %v4805_v62, %v4752_v55 }
0x2ea9   :  { %v5823_v32 = vpop.f32.mrf.mxu1 }
0x2eaa   :  { %v4810_v15 = vmax.f32 %v4806_v63, 0.0 }
0x2eac   :  { %v4811_v53 = vpack.c.bf16 %v4810_v15, %v4809_v2 }
0x2eae   :  { %5833 = vmatmul.mubr.msk.bf16.vlgmr.msra.gmra.mxu0 %vm1169_vm4, %v4811_v53 }
0x2f6e   :  { %v4882_v21 = vpop.f32.mrf.mxu0 }
0x2f6f   :  { %v4883_v61 = vadd.f32 %v4882_v21, %v4820_v39 }
0x2f70   :  { %v5834_v9 = vpop.f32.mrf.mxu0 }
0x2f71   :  { %v4889_v48 = vadd.f32 %v4883_v61, %v4745_v46 }
0x2f72   :  { %v4885_v59 = vpop.f32.mrf.mxu0 }
0x2f73   :  { %v4886_v4 = vadd.f32 %v4885_v59, %v4820_v39  ;;  %v4893_v52 = vsel %vm96_vm0, %v4889_v48, 0.0 }
0x2f74   :  { %4894 = vadd.xlane.f32.xlu1 %v4893_v52  ;;  %v5835_v8 = vpop.f32.mrf.mxu0 }
0x2f75   :  { %v4890_v51 = vadd.f32 %v4886_v4, %v4746_v56 }
0x2f77   :  { %v4896_v12 = vsel %vm96_vm0, %v4890_v51, 0.0 }
0x2f78   :  { %4897 = vadd.xlane.f32.xlu0 %v4896_v12 }
0x2ffd   :  { %v4895_v6 = vpop.xlane.xlu1 %4894 }
0x2ffe   :  { %v4899_v1 = vmul.f32 0.03125, %v4895_v6 }
0x3000   :  { %v4901_v16 = vsub.f32 %v4889_v48, %v4899_v1 }
0x3001   :  { %v4898_v45 = vpop.xlane.xlu0 %4897 }
0x3002   :  { %v4900_v14 = vmul.f32 0.03125, %v4898_v45  ;;  %v4903_v17 = vmul.f32 %v4901_v16, %v4901_v16 }
0x3004   :  { %v4902_v3 = vsub.f32 %v4890_v51, %v4900_v14  ;;  %v4905_v7 = vsel %vm96_vm0, %v4903_v17, 0.0 }
0x3005   :  { %4906 = vadd.xlane.f32.xlu1 %v4905_v7 }
0x3006   :  { %v4904_v18 = vmul.f32 %v4902_v3, %v4902_v3 }
0x3008   :  { %v4908_v47 = vsel %vm96_vm0, %v4904_v18, 0.0 }
0x3009   :  { %4909 = vadd.xlane.f32.xlu0 %v4908_v47 }
0x308e   :  { %v4907_v27 = vpop.xlane.xlu1 %4906 }
0x308f   :  { %v4911_v29 = vmul.f32 0.03125, %v4907_v27 }
0x3091   :  { %v4913_v31 = vadd.f32 1e-05, %v4911_v29 }
0x3092   :  { %v4910_v57 = vpop.xlane.xlu0 %4909 }
0x3093   :  { %6074 = vrsqrt.f32 %v4913_v31  ;;  %v4912_v33 = vmul.f32 0.03125, %v4910_v57 }
0x3095   :  { %v4914_v24 = vadd.f32 1e-05, %v4912_v33 }
0x3097   :  { %6076 = vrsqrt.f32 %v4914_v24 }
0x30a0   :  { %v6075_v28 = vpop.eup %6074 }
0x30a1   :  { %v4917_v60 = vmul.f32 %v6075_v28, %v4901_v16 }
0x30a3   :  { %v4919_v37 = vmul.f32 %v4917_v60, %v4891_v5 }
0x30a4   :  { %v6077_v0 = vpop.eup %6076 }
0x30a5   :  { %v4918_v23 = vmul.f32 %v6077_v0, %v4902_v3  ;;  %v4921_v36 = vadd.f32 %v4919_v37, %v4892_v25 }
0x30a7   :  { %v4920_v34 = vmul.f32 %v4918_v23, %v4891_v5 }
0x30a9   :  { %v4922_v10 = vadd.f32 %v4920_v34, %v4892_v25 }
0x30ab   :  { %v4923_v42 = vpack.c.bf16 %v4922_v10, %v4921_v36 }
0x30ad   :  { %5841 = vmatmul.mubr.msk.bf16.vlgmr.msra.gmra.mxu1 %vm96_vm0, %v4923_v42 }
0x316d   :  { %v4978_v30 = vpop.f32.mrf.mxu1 }
0x316e   :  { %v4979_v50 = vadd.f32 %v4978_v30, %v4928_v43 }
0x316f   :  { %v5842_v44 = vpop.f32.mrf.mxu1 }
0x3170   :  { %v4985_v13 = vsel %vm96_vm0, %v4979_v50, -inf }
0x3171   :  { %v4981_v20 = vpop.f32.mrf.mxu1 }
0x3172   :  { %v4982_v26 = vadd.f32 %v4981_v20, %v4928_v43 }
0x3173   :  { %v5843_v35 = vpop.f32.mrf.mxu1 }
0x3174   :  { %v4986_v46 = vsel %vm96_vm0, %v4982_v26, -inf }
0x3175   :  { %v4987_v56 = vmax.f32 %v4985_v13, %v4986_v46 }
0x3177   :  { %v4988_v49 = vsub.f32 %v4979_v50, %v4987_v56  ;;  %v4989_v41 = vsub.f32 %v4982_v26, %v4987_v56 }
0x3179   :  { %v4990_v11 = vmul.f32 1.442695, %v4988_v49  ;;  %v4992_v54 = vmul.f32 1.442695, %v4989_v41 }
0x317b   :  { %6078 = vpow2.f32 %v4990_v11 }
0x317c   :  { %6080 = vpow2.f32 %v4992_v54 }
0x3188   :  { %v6079_v55 = vpop.eup %6078 }
0x3189   :  { %v6081_v58 = vpop.eup %6080  ;;  %v4994_v38 = vsel %vm96_vm0, %v6079_v55, 0.0 }
0x318a   :  { %v4995_v40 = vsel %vm96_vm0, %v6081_v58, 0.0 }
0x318b   :  { %v4996_v62 = vadd.f32 %v4995_v40, %v4994_v38 }
0x318d   :  { %6082 = vlog2.f32 %v4996_v62 }
0x319a   :  { %v6083_v63 = vpop.eup %6082 }
0x319b   :  { %v4998_v32 = vmul.f32 0.6931472, %v6083_v63 }
0x319d   :  { %v4999_v2 = vadd.f32 %v4998_v32, %v4987_v56 }
0x319f   :  { %v5001_v15 = vsub.f32 %v4982_v26, %v4999_v2  ;;  %v5000_v53 = vsub.f32 %v4979_v50, %v4999_v2 }
0x31a1   :  { %5003 = vst.msk [vmem:[#allocation8 + $0x8] sm:$0xff] %vm96_vm0, %v5001_v15  ;;  %5002 = vst.msk [vmem:[#allocation8] sm:$0xff] %vm96_vm0, %v5000_v53 }
0x31a2   :  { %6155 = shalt.err (!%p6152_p5)
}
0x31a3   :  { %5015 = dma.vmem_to_hbm [thread:$0]  %s5010_s11, 256, %s7062_s3, [#allocation4], %s6172_s17, %s6172_s17, %s6173_s18  }
0x31a4   :  { %6168 = dma.done.wait [#allocation4], 256  }
0x31a5   :  { %6169 = vsyncadd [#allocation4], 4294967040 }
0x31a6   :  { %5019 = vsyncpa [#allocation3], 1 }
0x31a7   :  { %5020 = vsyncpa [#allocation6], 1 }
0x31a8   :  { %5021 = vsyncpa [#allocation4], 1 }

</bundles_post_ra>
